<compile_context>
chip_gen: v6e
topology: v6e:2x2x1
jax: 0.10.0
libtpu: 0.0.40
codegen_flags: <defaults>
</compile_context>

<pallas_src>
import functools

import jax
import jax.numpy as jnp
from jax import lax
from jax.experimental import pallas as pl
from jax.experimental.pallas import tpu as pltpu

_MAX_SINGLE_TILE = 4096   # collapse to one tile when the padded output fits


def _round_up(v, m):
    return ((v + m - 1) // m) * m


def _warp_points_kernel(params_ref, coords_ref, img_ref, o_ref, *,
                        n_warps, h_in, w_in, h_pad, n_ch):
    coords = coords_ref[...]                        # (2, tile_n) f32, lane-dense
    tile_n = coords.shape[1]
    w_pad = img_ref.shape[1]

    x_c = coords[0:1, :]                            # output x-coord (input width axis)
    y_c = coords[1:2, :]                            # output y-coord (input height axis)

    # Gaussian-bump displacement field. dx/dy are pre-scaled by the prob flag.
    xs = x_c
    ys = y_c
    for k in range(n_warps):                        # static, tiny unrolled loop
        cxk = params_ref[0, k]
        cyk = params_ref[1, k]
        dxk = params_ref[2, k]
        dyk = params_ref[3, k]
        rk = params_ref[4, k]
        g = jnp.exp(-((x_c - cxk) ** 2 + (y_c - cyk) ** 2) / (2.0 * rk * rk))
        xs = xs + g * dxk
        ys = ys + g * dyk

    # ---- x (input-width) gather: one-hot column matrix + one MXU matmul ----
    # grid_sample unnormalize with align_corners=True.
    ix = (xs + 1.0) * jnp.float32(0.5 * (w_in - 1))
    ix0f = jnp.floor(ix)
    wx1 = ix - ix0f
    wx0 = 1.0 - wx1
    ix0 = ix0f.astype(jnp.int32)                    # (1, tile_n)

    wrow = lax.broadcasted_iota(jnp.int32, (w_pad, tile_n), 0)
    dcol = wrow - ix0                               # both x-corners in one pass
    cx_mat = (jnp.where(dcol == 0, wx0, 0.0)
              + jnp.where(dcol == 1, wx1, 0.0))     # (w_pad, tile_n) f32
    # Out-of-range corners hit zero-padded image columns/rows (or no iota row
    # at all), which reproduces grid_sample's 'zeros' padding without masks.

    tmp = jnp.dot(img_ref[...], cx_mat.astype(jnp.bfloat16),
                  preferred_element_type=jnp.float32)   # (n_ch*h_pad, tile_n) f32

    # ---- y (input-height) gather: small one-hot + per-channel sublane reduce ----
    iy = (ys + 1.0) * jnp.float32(0.5 * (h_in - 1))
    iy0f = jnp.floor(iy)
    wy1 = iy - iy0f
    wy0 = 1.0 - wy1
    iy0 = iy0f.astype(jnp.int32)

    hrow = lax.broadcasted_iota(jnp.int32, (h_pad, tile_n), 0)
    drow = hrow - iy0
    cy_mat = (jnp.where(drow == 0, wy0, 0.0)
              + jnp.where(drow == 1, wy1, 0.0))     # (h_pad, tile_n) f32

    for c0 in range(n_ch):                          # static, small unrolled loop
        seg = tmp[c0 * h_pad:(c0 + 1) * h_pad, :]   # (h_pad, tile_n), 8-aligned slice
        o_ref[c0:c0 + 1, :] = jnp.sum(seg * cy_mat, axis=0,
                                      keepdims=True).astype(o_ref.dtype)


def _draw_warp_scalars(key, *, r, cx, cy, dx, dy, n_warps, prob):
    """The scalar torch.rand draws of WarpPoints.forward (wrapper-side glue).
    The prob flag is folded directly into dx/dy."""
    k_prob, k_rand = jax.random.split(key)
    flag = (jax.random.uniform(k_prob, ()) <= prob).astype(jnp.float32)
    rands = jax.random.uniform(k_rand, (5, n_warps), dtype=jnp.float32)
    return jnp.stack([
        rands[0] * (cx[1] - cx[0]) + cx[0],
        rands[1] * (cy[1] - cy[0]) + cy[0],
        flag * (rands[2] * (dx[1] - dx[0]) + dx[0]),
        flag * (rands[3] * (dy[1] - dy[0]) + dy[0]),
        rands[4] * (r[1] - r[0]) + r[0],
    ], axis=0).astype(jnp.float32)


@functools.partial(
    jax.jit,
    static_argnames=("r", "cx", "cy", "dx", "dy", "n_warps", "prob", "img_size_out"))
def warp_points(x, key, *, r=(0.0, 2.0), cx=(-0.5, 0.5), cy=(-0.5, 0.5),
                dx=(-0.3, 0.3), dy=(-0.3, 0.3), n_warps=1, prob=0.5,
                img_size_out=(36, 36)):
    """JAX/Pallas equivalent of WarpPoints.forward. x: (C, H_in, W_in)."""
    c, h_in, w_in = x.shape
    h_out, w_out = img_size_out
    assert h_out > 1 and w_out > 1, "align_corners linspace needs img_size_out > 1"

    params = _draw_warp_scalars(key, r=r, cx=cx, cy=cy, dx=dx, dy=dy,
                                n_warps=n_warps, prob=prob)

    # Zero-padded bf16 image, flattened to (C*H_pad, W_pad) for the column matmul.
    h_pad = _round_up(h_in, 8)
    w_pad = _round_up(w_in, 128)
    img = jnp.zeros((c, h_pad, w_pad), jnp.bfloat16)
    img = img.at[:, :h_in, :w_in].set(x.astype(jnp.bfloat16))
    img2d = img.reshape(c * h_pad, w_pad)

    # Output-pixel tiling (flattened o = j*h_out + i, lane-dense).
    n_out = w_out * h_out
    if _round_up(n_out, 128) <= _MAX_SINGLE_TILE:
        tile_n = _round_up(n_out, 128)        # one tile: no per-step grid overhead
    else:
        tile_n = 1024
    n_out_pad = _round_up(n_out, tile_n)
    grid = (n_out_pad // tile_n,)

    # Exact output-grid coords (constant-folded by XLA; no in-kernel div/rem).
    x_lin = jnp.linspace(-1.0, 1.0, h_out, dtype=jnp.float32)     # indexed by i
    y_lin = jnp.linspace(-1.0, 1.0, w_out, dtype=jnp.float32)     # indexed by j
    coords = jnp.zeros((2, n_out_pad), jnp.float32)
    coords = coords.at[0, :n_out].set(jnp.tile(x_lin, (w_out,)))
    coords = coords.at[1, :n_out].set(jnp.repeat(y_lin, h_out))

    kernel = functools.partial(_warp_points_kernel, n_warps=n_warps,
                               h_in=h_in, w_in=w_in, h_pad=h_pad, n_ch=c)

    out = pl.pallas_call(
        kernel,
        out_shape=jax.ShapeDtypeStruct((c, n_out_pad), x.dtype),
        grid=grid,
        in_specs=[
            pl.BlockSpec(memory_space=pltpu.MemorySpace.SMEM),      # warp params (5, n_warps)
            pl.BlockSpec((2, tile_n), lambda o: (0, o)),            # output coords
            pl.BlockSpec((c * h_pad, w_pad), lambda o: (0, 0)),     # image (resident)
        ],
        out_specs=pl.BlockSpec((c, tile_n), lambda o: (0, o)),
        compiler_params=pltpu.CompilerParams(
            dimension_semantics=("parallel",)),
    )(params, coords, img2d)

    # Unpad and reshape to the (C, W_out, H_out) layout torch returns.
    return out[:, :n_out].reshape(c, w_out, h_out)


def _warp_points_reference(x, params, h_out, w_out):
    """Pure-JAX reference with the same math (for a correctness smoke check)."""
    c, h_in, w_in = x.shape
    i = jnp.arange(h_out, dtype=jnp.float32)
    j = jnp.arange(w_out, dtype=jnp.float32)
    x_c = (i * (2.0 / (h_out - 1)) - 1.0)[:, None]          # (H_out, 1)
    y_c = (j * (2.0 / (w_out - 1)) - 1.0)[None, :]          # (1, W_out)
    cxk, cyk, dxk, dyk, rk = params
    g = jnp.exp(-((x_c[..., None] - cxk) ** 2 + (y_c[..., None] - cyk) ** 2)
                / (2.0 * rk * rk))                          # (H_out, W_out, n_warps)
    xs = x_c + (g * dxk).sum(-1)
    ys = y_c + (g * dyk).sum(-1)
    ix = (xs + 1.0) * 0.5 * (w_in - 1)
    iy = (ys + 1.0) * 0.5 * (h_in - 1)
    ix0 = jnp.floor(ix)
    iy0 = jnp.floor(iy)
    ix1 = ix0 + 1.0
    iy1 = iy0 + 1.0
    wx1 = ix - ix0
    wx0 = 1.0 - wx1
    wy1 = iy - iy0
    wy0 = 1.0 - wy1
    out = jnp.zeros((c, h_out, w_out), jnp.float32)
    for px, py, w in ((ix0, iy0, wx0 * wy0), (ix1, iy0, wx1 * wy0),
                      (ix0, iy1, wx0 * wy1), (ix1, iy1, wx1 * wy1)):
        inb = ((px >= 0) & (px <= w_in - 1) & (py >= 0) & (py <= h_in - 1))
        pxc = jnp.clip(px, 0, w_in - 1).astype(jnp.int32)
        pyc = jnp.clip(py, 0, h_in - 1).astype(jnp.int32)
        out = out + x[:, pyc, pxc] * (w * inb.astype(jnp.float32))[None]
    return jnp.transpose(out, (0, 2, 1))                    # (C, W_out, H_out)


if __name__ == "__main__":
    key = jax.random.PRNGKey(0)
    k_x, k_aug = jax.random.split(key)

    # Single image (C, H, W) matching the module defaults img_size_in/out = [36, 36].
    x = jax.random.uniform(k_x, (4, 36, 36), dtype=jnp.float32)

    cfg = dict(r=(0.0, 2.0), cx=(-0.5, 0.5), cy=(-0.5, 0.5),
               dx=(-0.3, 0.3), dy=(-0.3, 0.3), n_warps=1, prob=1.0)

    y = warp_points(x, k_aug, img_size_out=(36, 36), **cfg)
    y = jax.block_until_ready(y)

    assert y.shape == (4, 36, 36) and y.dtype == x.dtype
    assert bool(jnp.all(jnp.isfinite(y)))

    # Smoke-check against a pure-JAX reference (tolerance covers bf16 matmul operands).
    params = _draw_warp_scalars(k_aug, **cfg)
    y_ref = _warp_points_reference(x, params, 36, 36)
    max_err = float(jnp.max(jnp.abs(y.astype(jnp.float32) - y_ref)))
    assert max_err < 5e-2, f"max abs error vs reference: {max_err}"

    print("KERNEL_OK")
</pallas_src>

<mosaic_0001>
module attributes {stable_mosaic.version = 11 : i64} {
  func.func @_warp_points_kernel(%arg0: i32, %arg1: memref<5x1xf32, #tpu.memory_space<smem>>, %arg2: memref<2x1408xf32, #tpu.memory_space<vmem>>, %arg3: memref<160x128xbf16, #tpu.memory_space<vmem>>, %arg4: memref<4x1408xf32, #tpu.memory_space<vmem>>) attributes {dimension_semantics = [#tpu.dimension_semantics<parallel>], iteration_bounds = array<i64: 1>, scalar_prefetch = 0 : i64, scratch_operands = 0 : i64, tpu.core_type = #tpu.core_type<tc>, window_params = [{transform_indices = @transform_0, window_bounds = array<i64: 5, 1>}, {transform_indices = @transform_1, window_bounds = array<i64: 2, 1408>}, {pipeline_mode = #tpu.pipeline_mode<synchronous>, transform_indices = @transform_2, window_bounds = array<i64: 160, 128>}, {transform_indices = @transform_3, window_bounds = array<i64: 4, 1408>}]} {
    %c0 = arith.constant 0 : index
    %c0_0 = arith.constant 0 : index
    %0 = vector.load %arg2[%c0, %c0_0] : memref<2x1408xf32, #tpu.memory_space<vmem>>, vector<2x1408xf32>
    %1 = vector.extract_strided_slice %0 {offsets = [0, 0], sizes = [1, 1408], strides = [1, 1]} : vector<2x1408xf32> to vector<1x1408xf32>
    %2 = vector.extract_strided_slice %0 {offsets = [1, 0], sizes = [1, 1408], strides = [1, 1]} : vector<2x1408xf32> to vector<1x1408xf32>
    %c0_1 = arith.constant 0 : index
    %c0_2 = arith.constant 0 : index
    %3 = memref.load %arg1[%c0_1, %c0_2] : memref<5x1xf32, #tpu.memory_space<smem>>
    %c1 = arith.constant 1 : index
    %c0_3 = arith.constant 0 : index
    %4 = memref.load %arg1[%c1, %c0_3] : memref<5x1xf32, #tpu.memory_space<smem>>
    %c2 = arith.constant 2 : index
    %c0_4 = arith.constant 0 : index
    %5 = memref.load %arg1[%c2, %c0_4] : memref<5x1xf32, #tpu.memory_space<smem>>
    %c3 = arith.constant 3 : index
    %c0_5 = arith.constant 0 : index
    %6 = memref.load %arg1[%c3, %c0_5] : memref<5x1xf32, #tpu.memory_space<smem>>
    %c4 = arith.constant 4 : index
    %c0_6 = arith.constant 0 : index
    %7 = memref.load %arg1[%c4, %c0_6] : memref<5x1xf32, #tpu.memory_space<smem>>
    %8 = vector.broadcast %3 : f32 to vector<1x1408xf32>
    %9 = arith.subf %1, %8 : vector<1x1408xf32>
    %10 = arith.mulf %9, %9 : vector<1x1408xf32>
    %11 = vector.broadcast %4 : f32 to vector<1x1408xf32>
    %12 = arith.subf %2, %11 : vector<1x1408xf32>
    %13 = arith.mulf %12, %12 : vector<1x1408xf32>
    %14 = arith.addf %10, %13 : vector<1x1408xf32>
    %cst = arith.constant 0.000000e+00 : f32
    %15 = vector.broadcast %cst : f32 to vector<1x1408xf32>
    %16 = arith.subf %15, %14 : vector<1x1408xf32>
    %cst_7 = arith.constant 2.000000e+00 : f32
    %17 = arith.mulf %cst_7, %7 : f32
    %18 = arith.mulf %17, %7 : f32
    %19 = vector.broadcast %18 : f32 to vector<1x1408xf32>
    %20 = arith.divf %16, %19 : vector<1x1408xf32>
    %21 = math.exp %20 : vector<1x1408xf32>
    %22 = vector.broadcast %5 : f32 to vector<1x1408xf32>
    %23 = arith.mulf %21, %22 : vector<1x1408xf32>
    %24 = arith.addf %1, %23 : vector<1x1408xf32>
    %25 = vector.broadcast %6 : f32 to vector<1x1408xf32>
    %26 = arith.mulf %21, %25 : vector<1x1408xf32>
    %27 = arith.addf %2, %26 : vector<1x1408xf32>
    %cst_8 = arith.constant 1.000000e+00 : f32
    %28 = vector.broadcast %cst_8 : f32 to vector<1x1408xf32>
    %29 = arith.addf %24, %28 : vector<1x1408xf32>
    %cst_9 = arith.constant 1.750000e+01 : f32
    %30 = vector.broadcast %cst_9 : f32 to vector<1x1408xf32>
    %31 = arith.mulf %29, %30 : vector<1x1408xf32>
    %32 = math.floor %31 : vector<1x1408xf32>
    %33 = arith.subf %31, %32 : vector<1x1408xf32>
    %cst_10 = arith.constant 1.000000e+00 : f32
    %34 = vector.broadcast %cst_10 : f32 to vector<1x1408xf32>
    %35 = arith.subf %34, %33 : vector<1x1408xf32>
    %36 = arith.fptosi %32 : vector<1x1408xf32> to vector<1x1408xi32>
    %37 = tpu.iota {dimensions = array<i32: 0>} : vector<128x1408xi32>
    %38 = vector.broadcast %36 : vector<1x1408xi32> to vector<128x1408xi32>
    %39 = arith.subi %37, %38 : vector<128x1408xi32>
    %c0_i32 = arith.constant 0 : i32
    %40 = vector.broadcast %c0_i32 : i32 to vector<128x1408xi32>
    %41 = arith.cmpi eq, %39, %40 : vector<128x1408xi32>
    %cst_11 = arith.constant 0.000000e+00 : f32
    %42 = vector.shape_cast %35 : vector<1x1408xf32> to vector<1x1408xf32>
    %43 = vector.broadcast %42 : vector<1x1408xf32> to vector<128x1408xf32>
    %44 = vector.broadcast %cst_11 : f32 to vector<128x1408xf32>
    %45 = arith.select %41, %43, %44 : vector<128x1408xi1>, vector<128x1408xf32>
    %c1_i32 = arith.constant 1 : i32
    %46 = vector.broadcast %c1_i32 : i32 to vector<128x1408xi32>
    %47 = arith.cmpi eq, %39, %46 : vector<128x1408xi32>
    %cst_12 = arith.constant 0.000000e+00 : f32
    %48 = vector.shape_cast %33 : vector<1x1408xf32> to vector<1x1408xf32>
    %49 = vector.broadcast %48 : vector<1x1408xf32> to vector<128x1408xf32>
    %50 = vector.broadcast %cst_12 : f32 to vector<128x1408xf32>
    %51 = arith.select %47, %49, %50 : vector<128x1408xi1>, vector<128x1408xf32>
    %52 = arith.addf %45, %51 : vector<128x1408xf32>
    %c0_13 = arith.constant 0 : index
    %c0_14 = arith.constant 0 : index
    %53 = vector.load %arg3[%c0_13, %c0_14] : memref<160x128xbf16, #tpu.memory_space<vmem>>, vector<160x128xbf16>
    %54 = arith.truncf %52 : vector<128x1408xf32> to vector<128x1408xbf16>
    %cst_15 = arith.constant dense<0.000000e+00> : vector<160x1408xf32>
    %55 = tpu.matmul %53, %54, %cst_15 {dimension_numbers = #tpu.dot_dimension_numbers<[1], [0], [0], [1], [0, 0, 1, 1], [], []>} : vector<160x128xbf16>, vector<128x1408xbf16>, vector<160x1408xf32> -> vector<160x1408xf32>
    %cst_16 = arith.constant 1.000000e+00 : f32
    %56 = vector.broadcast %cst_16 : f32 to vector<1x1408xf32>
    %57 = arith.addf %27, %56 : vector<1x1408xf32>
    %cst_17 = arith.constant 1.750000e+01 : f32
    %58 = vector.broadcast %cst_17 : f32 to vector<1x1408xf32>
    %59 = arith.mulf %57, %58 : vector<1x1408xf32>
    %60 = math.floor %59 : vector<1x1408xf32>
    %61 = arith.subf %59, %60 : vector<1x1408xf32>
    %cst_18 = arith.constant 1.000000e+00 : f32
    %62 = vector.broadcast %cst_18 : f32 to vector<1x1408xf32>
    %63 = arith.subf %62, %61 : vector<1x1408xf32>
    %64 = arith.fptosi %60 : vector<1x1408xf32> to vector<1x1408xi32>
    %65 = tpu.iota {dimensions = array<i32: 0>} : vector<40x1408xi32>
    %66 = vector.broadcast %64 : vector<1x1408xi32> to vector<40x1408xi32>
    %67 = arith.subi %65, %66 : vector<40x1408xi32>
    %c0_i32_19 = arith.constant 0 : i32
    %68 = vector.broadcast %c0_i32_19 : i32 to vector<40x1408xi32>
    %69 = arith.cmpi eq, %67, %68 : vector<40x1408xi32>
    %cst_20 = arith.constant 0.000000e+00 : f32
    %70 = vector.shape_cast %63 : vector<1x1408xf32> to vector<1x1408xf32>
    %71 = vector.broadcast %70 : vector<1x1408xf32> to vector<40x1408xf32>
    %72 = vector.broadcast %cst_20 : f32 to vector<40x1408xf32>
    %73 = arith.select %69, %71, %72 : vector<40x1408xi1>, vector<40x1408xf32>
    %c1_i32_21 = arith.constant 1 : i32
    %74 = vector.broadcast %c1_i32_21 : i32 to vector<40x1408xi32>
    %75 = arith.cmpi eq, %67, %74 : vector<40x1408xi32>
    %cst_22 = arith.constant 0.000000e+00 : f32
    %76 = vector.shape_cast %61 : vector<1x1408xf32> to vector<1x1408xf32>
    %77 = vector.broadcast %76 : vector<1x1408xf32> to vector<40x1408xf32>
    %78 = vector.broadcast %cst_22 : f32 to vector<40x1408xf32>
    %79 = arith.select %75, %77, %78 : vector<40x1408xi1>, vector<40x1408xf32>
    %80 = arith.addf %73, %79 : vector<40x1408xf32>
    %81 = vector.extract_strided_slice %55 {offsets = [0, 0], sizes = [40, 1408], strides = [1, 1]} : vector<160x1408xf32> to vector<40x1408xf32>
    %82 = arith.mulf %81, %80 : vector<40x1408xf32>
    %cst_23 = arith.constant dense<0.000000e+00> : vector<1408xf32>
    %83 = vector.multi_reduction <add>, %82, %cst_23 [0] : vector<40x1408xf32> to vector<1408xf32>
    %84 = vector.shape_cast %83 : vector<1408xf32> to vector<1x1408xf32>
    %c0_24 = arith.constant 0 : index
    %c0_25 = arith.constant 0 : index
    %85 = vector.load %arg4[%c0_24, %c0_25] : memref<4x1408xf32, #tpu.memory_space<vmem>>, vector<1x1408xf32>
    tpu.vector_store %arg4[%c0_24, %c0_25], %84 {strides = array<i32>} : memref<4x1408xf32, #tpu.memory_space<vmem>>, vector<1x1408xf32>,
    %86 = vector.extract_strided_slice %55 {offsets = [40, 0], sizes = [40, 1408], strides = [1, 1]} : vector<160x1408xf32> to vector<40x1408xf32>
    %87 = arith.mulf %86, %80 : vector<40x1408xf32>
    %cst_26 = arith.constant dense<0.000000e+00> : vector<1408xf32>
    %88 = vector.multi_reduction <add>, %87, %cst_26 [0] : vector<40x1408xf32> to vector<1408xf32>
    %89 = vector.shape_cast %88 : vector<1408xf32> to vector<1x1408xf32>
    %c1_27 = arith.constant 1 : index
    %c0_28 = arith.constant 0 : index
    %90 = vector.load %arg4[%c1_27, %c0_28] : memref<4x1408xf32, #tpu.memory_space<vmem>>, vector<1x1408xf32>
    tpu.vector_store %arg4[%c1_27, %c0_28], %89 {strides = array<i32>} : memref<4x1408xf32, #tpu.memory_space<vmem>>, vector<1x1408xf32>,
    %91 = vector.extract_strided_slice %55 {offsets = [80, 0], sizes = [40, 1408], strides = [1, 1]} : vector<160x1408xf32> to vector<40x1408xf32>
    %92 = arith.mulf %91, %80 : vector<40x1408xf32>
    %cst_29 = arith.constant dense<0.000000e+00> : vector<1408xf32>
    %93 = vector.multi_reduction <add>, %92, %cst_29 [0] : vector<40x1408xf32> to vector<1408xf32>
    %94 = vector.shape_cast %93 : vector<1408xf32> to vector<1x1408xf32>
    %c2_30 = arith.constant 2 : index
    %c0_31 = arith.constant 0 : index
    %95 = vector.load %arg4[%c2_30, %c0_31] : memref<4x1408xf32, #tpu.memory_space<vmem>>, vector<1x1408xf32>
    tpu.vector_store %arg4[%c2_30, %c0_31], %94 {strides = array<i32>} : memref<4x1408xf32, #tpu.memory_space<vmem>>, vector<1x1408xf32>,
    %96 = vector.extract_strided_slice %55 {offsets = [120, 0], sizes = [40, 1408], strides = [1, 1]} : vector<160x1408xf32> to vector<40x1408xf32>
    %97 = arith.mulf %96, %80 : vector<40x1408xf32>
    %cst_32 = arith.constant dense<0.000000e+00> : vector<1408xf32>
    %98 = vector.multi_reduction <add>, %97, %cst_32 [0] : vector<40x1408xf32> to vector<1408xf32>
    %99 = vector.shape_cast %98 : vector<1408xf32> to vector<1x1408xf32>
    %c3_33 = arith.constant 3 : index
    %c0_34 = arith.constant 0 : index
    %100 = vector.load %arg4[%c3_33, %c0_34] : memref<4x1408xf32, #tpu.memory_space<vmem>>, vector<1x1408xf32>
    tpu.vector_store %arg4[%c3_33, %c0_34], %99 {strides = array<i32>} : memref<4x1408xf32, #tpu.memory_space<vmem>>, vector<1x1408xf32>,
    return
  }
  func.func @transform_0(%arg0: i32) -> (i32, i32) {
    %c0_i32 = arith.constant 0 : i32
    %c0_i32_0 = arith.constant 0 : i32
    %c0_i32_1 = arith.constant 0 : i32
    return %c0_i32, %c0_i32_0 : i32, i32
  }
  func.func @transform_1(%arg0: i32) -> (i32, i32) {
    %c0_i32 = arith.constant 0 : i32
    %c0_i32_0 = arith.constant 0 : i32
    return %c0_i32, %arg0 : i32, i32
  }
  func.func @transform_2(%arg0: i32) -> (i32, i32) {
    %c0_i32 = arith.constant 0 : i32
    %c0_i32_0 = arith.constant 0 : i32
    %c0_i32_1 = arith.constant 0 : i32
    return %c0_i32, %c0_i32_0 : i32, i32
  }
  func.func @transform_3(%arg0: i32) -> (i32, i32) {
    %c0_i32 = arith.constant 0 : i32
    %c0_i32_0 = arith.constant 0 : i32
    return %c0_i32, %arg0 : i32, i32
  }
}

</mosaic_0001>

<bundles_post_ra>
// kernel: tile.8
= control target key start
LH: loop header
LB: loop body
LE: loop exit
PB: predicated region body
PF: predicated region fallthrough
CT: control target
= control target key end

     0   :  { %s46_s0 = inlined_call_operand.vmem [shape: f32[36], index: 0, kind: input, shape index: {}]   ;;  %s47_s1 = inlined_call_operand.vmem [shape: f32[36,36], index: 1, kind: output, shape index: {}]  }
   0x1   :  { %v4_v0 = vld [vmem:[%s46_s0] ss:$0 sm:$0xff] }
   0x2   :  { %5 = vst [vmem:[%s47_s1] sm:$0xff] %v4_v0  ;;  %14 = vst [vmem:[%s47_s1 + $0x8] sm:$0xff] %v4_v0 }
   0x3   :  { %15 = vst [vmem:[%s47_s1 + $0x10] sm:$0xff] %v4_v0  ;;  %16 = vst [vmem:[%s47_s1 + $0x18] sm:$0xff] %v4_v0 }
   0x4   :  { %17 = vst [vmem:[%s47_s1 + $0x20] sm:$0xff] %v4_v0 }

// kernel: warp_points.1
= control target key start
LH: loop header
LB: loop body
LE: loop exit
PB: predicated region body
PF: predicated region fallthrough
CT: control target
= control target key end

     0   :  { %8 = vsyncpa [#allocation3], 0  ;;  %s6920_s0 = inlined_call_operand.vmem [shape: f32[5,1], index: 0, kind: input, shape index: {}]   ;;  %s6921_s1 = inlined_call_operand.vmem [shape: f32[2,1408], index: 1, kind: input, shape index: {}]   ;;  %s6922_s2 = inlined_call_operand.vmem [shape: bf16[160,128], index: 2, kind: input, shape index: {}]   ;;  %s6923_s3 = inlined_call_operand.vmem [shape: f32[4,1408], index: 3, kind: output, shape index: {}]  }
   0x1   :  { %s15_s14 = sshll.u32 %s6920_s0, 4  ;;  %s16_s14 = int_to_ptr.vmem [resolvable:$true] %s15_s14 }
   0x2   :  { %s4224_s15 = scalar_lea.vmem %s16_s14, 128  ;;  %p4229_p1 = scmp.lt.s32.totalorder %s16_s14, %s16_s14 }
   0x3   :  { %p4225_p0 = scmp.ne.s32.totalorder %s16_s14, %s4224_s15  ;;  %p4230_p2 = scmp.lt.s32.totalorder %s4224_s15, %s4224_s15 }
   0x5   :  { %p4231_p3 = por %p4230_p2, %p4229_p1 }
   0x7   :  { %p4232_p4 = pnand %p4231_p3, %p4225_p0 }
   0x9   :  { %4235 = shalt.err (!%p4232_p4)
}
   0xa   :  { %s4238_s16 = smov [#allocation2]  }
   0xb   :  { %18 = dma.vmem_to_smem %s16_s14, 128, %s4238_s16, [#allocation3]  }
   0xc   :  { %4236 = dma.done.wait [#allocation3], 128  }
   0xd   :  { %4237 = vsyncadd [#allocation3], 4294967168 }
   0xe   :  { %26 = sfence }
   0xf   :  { %s31_s17 = sld [smem:[#allocation2]]  ;;  %v28_v0 = vld [vmem:[%s6921_s1] sm:$0xff]  ;;  %v29_v14 = vld [vmem:[%s6921_s1 + $0x8] sm:$0xff]  ;;  %v6924_v20 = vlaneseq  ;;  %v6927_v22 = vmov 0  }
  0x10   :  { %s4097_s18 = sld [smem:[#allocation2 + $0x80]]  ;;  %1687 = vmatprep.mubr.bf16.mxu0 %v6927_v22  ;;  %1820 = vmatprep.mubr.bf16.mxu1 %v6927_v22 }
  0x11   :  { %s4100_s19 = sld [smem:[#allocation2 + $0x200]]  ;;  %v4290_v27 = vshrl.u32 %v6924_v20, 7 }
  0x12   :  { %s4098_s23 = sld [smem:[#allocation2 + $0x100]] }
  0x13   :  { %6981 = vst [vmem:[#allocation5_spill] sm:$0xff] %v4290_v27  ;;  %v4293_v31 = vadd.s32 112, %v4290_v27  ;;  %v4296_v32 = vadd.s32 120, %v4290_v27  ;;  %v4300_v34 = vsub.s32 0, %v4290_v27  ;;  %v4303_v35 = vsub.s32 2, %v4290_v27 }
  0x14   :  { %v4306_v36 = vsub.s32 6, %v4290_v27  ;;  %v4309_v37 = vsub.s32 4, %v4290_v27  ;;  %v4312_v39 = vadd.s32 96, %v4290_v27  ;;  %v4315_v40 = vadd.s32 104, %v4290_v27 }
  0x15   :  { %v4270_v3 = vstv %s31_s17  ;;  %v4318_v41 = vadd.s32 80, %v4290_v27  ;;  %v4321_v42 = vadd.s32 88, %v4290_v27  ;;  %v4324_v43 = vadd.s32 64, %v4290_v27 }
  0x16   :  { %v4267_v1 = vstv %s4097_s18  ;;  %v37_v4 = vsub.f32 %v28_v0, %v4270_v3  ;;  %v38_v17 = vsub.f32 %v29_v14, %v4270_v3  ;;  %v4327_v44 = vadd.s32 72, %v4290_v27 }
  0x17   :  { %v44_v2 = vsub.f32 %v28_v0, %v4267_v1  ;;  %s68_s0 = smul.f32 2.0, %s4100_s19  ;;  %v45_v15 = vsub.f32 %v29_v14, %v4267_v1  ;;  %v4332_v48 = vadd.s32 48, %v4290_v27  ;;  %v4335_v49 = vadd.s32 56, %v4290_v27 }
  0x18   :  { %v40_v7 = vmul.f32 %v37_v4, %v37_v4  ;;  %v4280_v16 = vstv %s4098_s23  ;;  %v41_v23 = vmul.f32 %v38_v17, %v38_v17  ;;  %v4338_v50 = vadd.s32 32, %v4290_v27 }
  0x19   :  { %s69_s22 = smul.f32 %s4100_s19, %s68_s0  ;;  %v47_v5 = vmul.f32 %v44_v2, %v44_v2  ;;  %v48_v18 = vmul.f32 %v45_v15, %v45_v15  ;;  %v4341_v51 = vadd.s32 40, %v4290_v27  ;;  %v4344_v52 = vadd.s32 16, %v4290_v27 }
  0x1a   :  { %6982 = vst [vmem:[#allocation6_spill] sm:$0xff] %v4338_v50  ;;  %v4347_v53 = vadd.s32 24, %v4290_v27  ;;  %v4361_v60 = vadd.s32 8, %v4290_v27 }
  0x1b   :  { %v70_v6 = vstv %s69_s22  ;;  %v4101_v8 = vrot.slane %v47_v5, 9  ;;  %v4102_v24 = vrot.slane %v48_v18, 9  ;;  %6983 = vst [vmem:[#allocation7_spill] sm:$0xff] %v4344_v52  ;;  %s5086_s22 = sld [smem:[#allocation2 + $0x180]] }
  0x1c   :  { %4200 = vrcp.f32 %v70_v6  ;;  %6984 = vst [vmem:[#allocation8_spill] sm:$0xff] %v4347_v53  ;;  %6985 = vst [vmem:[#allocation9_spill] sm:$0xff] %v4361_v60 }
  0x1d   :  { %v62_v9 = vadd.f32 %v4101_v8, %v40_v7  ;;  %v63_v26 = vadd.f32 %v4102_v24, %v41_v23 }
  0x1f   :  { %v65_v10 = vsub.f32 0.0, %v62_v9  ;;  %v66_v29 = vsub.f32 0.0, %v63_v26 }
  0x29   :  { %v4273_v11 = vpop.eup %4200 }
  0x2a   :  { %v72_v12 = vmul.f32 %v4273_v11, %v65_v10  ;;  %v73_v33 = vmul.f32 %v4273_v11, %v66_v29 }
  0x2c   :  { %v75_v13 = vmul.f32 1.442695, %v72_v12  ;;  %v77_v45 = vmul.f32 1.442695, %v73_v33 }
  0x2e   :  { %4202 = vpow2.f32 %v75_v13 }
  0x2f   :  { %4204 = vpow2.f32 %v77_v45 }
  0x3b   :  { %v4283_v19 = vpop.eup %4202 }
  0x3c   :  { %v82_v21 = vmul.f32 %v4283_v19, %v4280_v16 }
  0x3e   :  { %v85_v25 = vadd.f32 %v82_v21, %v28_v0 }
  0x40   :  { %v104_v28 = vadd.f32 1.0, %v85_v25 }
  0x42   :  { %v107_v30 = vmul.f32 17.5, %v104_v28 }
  0x44   :  { %v110_v38 = vfloor.f32 %v107_v30 }
  0x46   :  { %v4329_v46 = vsub.f32 %v107_v30, %v110_v38  ;;  %v4175_v47 = vtrunc.f32 %v110_v38 }
  0x48   :  { %v4350_v54 = vsub.f32 1.0, %v4329_v46  ;;  %v4176_v55 = vcvt.f32.s32 %v4175_v47  ;;  %v1043_v56 = vrot.slane %v4329_v46, %v4303_v35  ;;  %v1051_v57 = vrot.slane %v4329_v46, %v4306_v36 }
  0x49   :  { %v1039_v58 = vrot.slane %v4329_v46, %v4300_v34  ;;  %v1047_v59 = vrot.slane %v4329_v46, %v4309_v37 }
  0x4a   :  { %v146_v61 = vrot.slane %v4176_v55, %v4303_v35  ;;  %v589_v62 = vrot.slane %v4350_v54, %v4303_v35  ;;  %v4367_v63 = vrot.slane %v1043_v56, %v4300_v34  ;;  %v154_v0 = vrot.slane %v4176_v55, %v4306_v36 }
  0x4b   :  { %v597_v2 = vrot.slane %v4350_v54, %v4306_v36  ;;  %v4373_v4 = vrot.slane %v1051_v57, %v4300_v34  ;;  %v142_v5 = vrot.slane %v4176_v55, %v4300_v34  ;;  %v585_v6 = vrot.slane %v4350_v54, %v4300_v34 }
  0x4c   :  { %v4379_v7 = vrot.slane %v146_v61, %v4300_v34  ;;  %v4382_v8 = vrot.slane %v589_v62, %v4300_v34  ;;  %v4385_v9 = vrot.slane %v154_v0, %v4300_v34  ;;  %v4388_v10 = vrot.slane %v1039_v58, %v4300_v34 }
  0x4d   :  { %v4391_v12 = vrot.slane %v597_v2, %v4300_v34  ;;  %v4394_v13 = vrot.slane %v142_v5, %v4300_v34  ;;  %v4397_v14 = vrot.slane %v585_v6, %v4300_v34  ;;  %v150_v15 = vrot.slane %v4176_v55, %v4309_v37  ;;  %v4426_v2 = vpop.eup %4204 }
  0x4e   :  { %v382_v17 = vsub.s32 %v4293_v31, %v4379_v7  ;;  %v393_v18 = vsub.s32 %v4296_v32, %v4379_v7  ;;  %v384_v21 = vsub.s32 %v4293_v31, %v4385_v9  ;;  %v395_v23 = vsub.s32 %v4296_v32, %v4385_v9  ;;  %6986 = vst [vmem:[#allocation10_spill] sm:$0xff] %v4426_v2 }
  0x4f   :  { %v381_v24 = vsub.s32 %v4293_v31, %v4394_v13  ;;  %v392_v25 = vsub.s32 %v4296_v32, %v4394_v13  ;;  %v4413_v26 = vrot.slane %v150_v15, %v4300_v34  ;;  %v593_v28 = vrot.slane %v4350_v54, %v4309_v37 }
  0x50   :  { %vm558_vm0 = vcmp.eq.s32.totalorder %v382_v17, 0  ;;  %vm569_vm1 = vcmp.eq.s32.totalorder %v393_v18, 0  ;;  %vm1012_vm2 = vcmp.eq.s32.totalorder %v382_v17, 1  ;;  %vm1023_vm3 = vcmp.eq.s32.totalorder %v393_v18, 1 }
  0x51   :  { %v836_v29 = vsel %vm558_vm0, %v4382_v8, 0.0  ;;  %v847_v30 = vsel %vm569_vm1, %v4382_v8, 0.0  ;;  %v1290_v33 = vsel %vm1012_vm2, %v4367_v63, 0.0  ;;  %v1301_v38 = vsel %vm1023_vm3, %v4367_v63, 0.0 }
  0x52   :  { %v1466_v45 = vadd.f32 %v1290_v33, %v836_v29  ;;  %v1477_v47 = vadd.f32 %v1301_v38, %v847_v30  ;;  %vm560_vm4 = vcmp.eq.s32.totalorder %v384_v21, 0  ;;  %vm571_vm5 = vcmp.eq.s32.totalorder %v395_v23, 0 }
  0x53   :  { %v838_v55 = vsel %vm560_vm4, %v4391_v12, 0.0  ;;  %v849_v54 = vsel %vm571_vm5, %v4391_v12, 0.0  ;;  %vm1014_vm6 = vcmp.eq.s32.totalorder %v384_v21, 1  ;;  %vm1025_vm7 = vcmp.eq.s32.totalorder %v395_v23, 1 }
  0x54   :  { %v1585_v56 = vpack.c.bf16 %v1477_v47, %v1466_v45  ;;  %v1292_v57 = vsel %vm1014_vm6, %v4373_v4, 0.0  ;;  %v1303_v58 = vsel %vm1025_vm7, %v4373_v4, 0.0  ;;  %vm557_vm8 = vcmp.eq.s32.totalorder %v381_v24, 0 }
  0x55   :  { %v1468_v61 = vadd.f32 %v1292_v57, %v838_v55  ;;  %v1479_v62 = vadd.f32 %v1303_v58, %v849_v54  ;;  %vm568_vm9 = vcmp.eq.s32.totalorder %v392_v25, 0  ;;  %v835_v0 = vsel %vm557_vm8, %v4397_v14, 0.0 }
  0x56   :  { %1655 = vmatprep.subr.bf16.mxu0 %v1585_v56  ;;  %v846_v5 = vsel %vm568_vm9, %v4397_v14, 0.0  ;;  %vm1011_vm10 = vcmp.eq.s32.totalorder %v381_v24, 1  ;;  %vm1022_vm11 = vcmp.eq.s32.totalorder %v392_v25, 1  ;;  %v383_v6 = vsub.s32 %v4293_v31, %v4413_v26 }
  0x57   :  { %v1587_v15 = vpack.c.bf16 %v1479_v62, %v1468_v61  ;;  %v1289_v17 = vsel %vm1011_vm10, %v4388_v10, 0.0  ;;  %v1300_v18 = vsel %vm1022_vm11, %v4388_v10, 0.0  ;;  %v394_v21 = vsub.s32 %v4296_v32, %v4413_v26 }
  0x58   :  { %v1465_v23 = vadd.f32 %v1289_v17, %v835_v0  ;;  %v1476_v29 = vadd.f32 %v1300_v18, %v846_v5  ;;  %vm559_vm12 = vcmp.eq.s32.totalorder %v383_v6, 0  ;;  %v4436_v30 = vrot.slane %v593_v28, %v4300_v34 }
  0x59   :  { %1788 = vmatprep.subr.bf16.mxu1 %v1587_v15  ;;  %vm570_vm13 = vcmp.eq.s32.totalorder %v394_v21, 0  ;;  %vm1013_vm14 = vcmp.eq.s32.totalorder %v383_v6, 1  ;;  %vm1024_vm15 = vcmp.eq.s32.totalorder %v394_v21, 1  ;;  %v4442_v24 = vrot.slane %v1047_v59, %v4300_v34 }
  0x5a   :  { %v1584_v25 = vpack.c.bf16 %v1476_v29, %v1465_v23  ;;  %v837_v33 = vsel %vm559_vm12, %v4436_v30, 0.0  ;;  %v848_v38 = vsel %vm570_vm13, %v4436_v30, 0.0  ;;  %v360_v45 = vsub.s32 %v4312_v39, %v4379_v7 }
  0x5b   :  { %v1291_v28 = vsel %vm1013_vm14, %v4442_v24, 0.0  ;;  %v1302_v47 = vsel %vm1024_vm15, %v4442_v24, 0.0  ;;  %v371_v55 = vsub.s32 %v4315_v40, %v4379_v7  ;;  %v362_v46 = vsub.s32 %v4312_v39, %v4385_v9 }
  0x5c   :  { %1656 = vmatpush1.bf16.msra.mxu0 %v1584_v25  ;;  %v1467_v59 = vadd.f32 %v1291_v28, %v837_v33  ;;  %v1478_v54 = vadd.f32 %v1302_v47, %v848_v38  ;;  %vm536_vm0 = vcmp.eq.s32.totalorder %v360_v45, 0  ;;  %vm990_vm1 = vcmp.eq.s32.totalorder %v360_v45, 1 }
  0x5d   :  { %vm547_vm2 = vcmp.eq.s32.totalorder %v371_v55, 0  ;;  %v814_v56 = vsel %vm536_vm0, %v4382_v8, 0.0  ;;  %vm1001_vm3 = vcmp.eq.s32.totalorder %v371_v55, 1  ;;  %v1268_v57 = vsel %vm990_vm1, %v4367_v63, 0.0 }
  0x5e   :  { %v1586_v58 = vpack.c.bf16 %v1478_v54, %v1467_v59  ;;  %v825_v61 = vsel %vm547_vm2, %v4382_v8, 0.0  ;;  %v1279_v62 = vsel %vm1001_vm3, %v4367_v63, 0.0  ;;  %v1444_v0 = vadd.f32 %v1268_v57, %v814_v56 }
  0x5f   :  { %v1455_v5 = vadd.f32 %v1279_v62, %v825_v61  ;;  %v373_v6 = vsub.s32 %v4315_v40, %v4385_v9  ;;  %vm538_vm4 = vcmp.eq.s32.totalorder %v362_v46, 0  ;;  %vm992_vm5 = vcmp.eq.s32.totalorder %v362_v46, 1 }
  0x60   :  { %1789 = vmatpush1.bf16.msra.mxu1 %v1586_v58  ;;  %v816_v15 = vsel %vm538_vm4, %v4391_v12, 0.0  ;;  %v1270_v17 = vsel %vm992_vm5, %v4373_v4, 0.0  ;;  %v359_v18 = vsub.s32 %v4312_v39, %v4394_v13  ;;  %v370_v21 = vsub.s32 %v4315_v40, %v4394_v13 }
  0x61   :  { %v1574_v23 = vpack.c.bf16 %v1455_v5, %v1444_v0  ;;  %vm549_vm6 = vcmp.eq.s32.totalorder %v373_v6, 0  ;;  %vm1003_vm7 = vcmp.eq.s32.totalorder %v373_v6, 1  ;;  %v1446_v29 = vadd.f32 %v1270_v17, %v816_v15 }
  0x62   :  { %v827_v25 = vsel %vm549_vm6, %v4391_v12, 0.0  ;;  %v1281_v33 = vsel %vm1003_vm7, %v4373_v4, 0.0  ;;  %vm535_vm8 = vcmp.eq.s32.totalorder %v359_v18, 0  ;;  %vm546_vm9 = vcmp.eq.s32.totalorder %v370_v21, 0 }
  0x63   :  { %1657 = vmatprep.subr.bf16.mxu0 %v1574_v23  ;;  %v1457_v38 = vadd.f32 %v1281_v33, %v827_v25  ;;  %v813_v45 = vsel %vm535_vm8, %v4397_v14, 0.0  ;;  %v824_v28 = vsel %vm546_vm9, %v4397_v14, 0.0  ;;  %vm989_vm10 = vcmp.eq.s32.totalorder %v359_v18, 1 }
  0x64   :  { %vm1000_vm11 = vcmp.eq.s32.totalorder %v370_v21, 1  ;;  %v1267_v47 = vsel %vm989_vm10, %v4388_v10, 0.0  ;;  %v361_v55 = vsub.s32 %v4312_v39, %v4413_v26  ;;  %v372_v46 = vsub.s32 %v4315_v40, %v4413_v26 }
  0x65   :  { %v1576_v59 = vpack.c.bf16 %v1457_v38, %v1446_v29  ;;  %v1278_v54 = vsel %vm1000_vm11, %v4388_v10, 0.0  ;;  %v1443_v56 = vadd.f32 %v1267_v47, %v813_v45  ;;  %v338_v57 = vsub.s32 %v4318_v41, %v4379_v7 }
  0x66   :  { %v1454_v58 = vadd.f32 %v1278_v54, %v824_v28  ;;  %vm537_vm12 = vcmp.eq.s32.totalorder %v361_v55, 0  ;;  %vm548_vm13 = vcmp.eq.s32.totalorder %v372_v46, 0  ;;  %vm991_vm14 = vcmp.eq.s32.totalorder %v361_v55, 1 }
  0x67   :  { %1790 = vmatprep.subr.bf16.mxu1 %v1576_v59  ;;  %v815_v61 = vsel %vm537_vm12, %v4436_v30, 0.0  ;;  %v826_v62 = vsel %vm548_vm13, %v4436_v30, 0.0  ;;  %vm1002_vm15 = vcmp.eq.s32.totalorder %v372_v46, 1  ;;  %v1269_v0 = vsel %vm991_vm14, %v4442_v24, 0.0 }
  0x68   :  { %v1573_v5 = vpack.c.bf16 %v1454_v58, %v1443_v56  ;;  %v1280_v6 = vsel %vm1002_vm15, %v4442_v24, 0.0  ;;  %v1445_v15 = vadd.f32 %v1269_v0, %v815_v61  ;;  %v349_v17 = vsub.s32 %v4321_v42, %v4379_v7 }
  0x69   :  { %v1456_v18 = vadd.f32 %v1280_v6, %v826_v62  ;;  %vm514_vm0 = vcmp.eq.s32.totalorder %v338_v57, 0  ;;  %vm968_vm1 = vcmp.eq.s32.totalorder %v338_v57, 1  ;;  %v340_v21 = vsub.s32 %v4318_v41, %v4385_v9 }
  0x6a   :  { %1658 = vmatpush1.bf16.msra.mxu0 %v1573_v5  ;;  %vm525_vm2 = vcmp.eq.s32.totalorder %v349_v17, 0  ;;  %v792_v23 = vsel %vm514_vm0, %v4382_v8, 0.0  ;;  %vm979_vm3 = vcmp.eq.s32.totalorder %v349_v17, 1  ;;  %v1246_v29 = vsel %vm968_vm1, %v4367_v63, 0.0 }
  0x6b   :  { %v1575_v25 = vpack.c.bf16 %v1456_v18, %v1445_v15  ;;  %v803_v33 = vsel %vm525_vm2, %v4382_v8, 0.0  ;;  %v1257_v38 = vsel %vm979_vm3, %v4367_v63, 0.0  ;;  %v1422_v45 = vadd.f32 %v1246_v29, %v792_v23 }
  0x6c   :  { %v1433_v28 = vadd.f32 %v1257_v38, %v803_v33  ;;  %v351_v47 = vsub.s32 %v4321_v42, %v4385_v9  ;;  %vm516_vm4 = vcmp.eq.s32.totalorder %v340_v21, 0  ;;  %vm970_vm5 = vcmp.eq.s32.totalorder %v340_v21, 1 }
  0x6d   :  { %1791 = vmatpush1.bf16.msra.mxu1 %v1575_v25  ;;  %v794_v55 = vsel %vm516_vm4, %v4391_v12, 0.0  ;;  %v1248_v46 = vsel %vm970_vm5, %v4373_v4, 0.0  ;;  %v337_v59 = vsub.s32 %v4318_v41, %v4394_v13  ;;  %v348_v54 = vsub.s32 %v4321_v42, %v4394_v13 }
  0x6e   :  { %v1563_v56 = vpack.c.bf16 %v1433_v28, %v1422_v45  ;;  %vm527_vm6 = vcmp.eq.s32.totalorder %v351_v47, 0  ;;  %vm981_vm7 = vcmp.eq.s32.totalorder %v351_v47, 1  ;;  %v1424_v57 = vadd.f32 %v1248_v46, %v794_v55 }
  0x6f   :  { %v805_v58 = vsel %vm527_vm6, %v4391_v12, 0.0  ;;  %v1259_v61 = vsel %vm981_vm7, %v4373_v4, 0.0  ;;  %vm513_vm8 = vcmp.eq.s32.totalorder %v337_v59, 0  ;;  %vm524_vm9 = vcmp.eq.s32.totalorder %v348_v54, 0 }
  0x70   :  { %1659 = vmatprep.subr.bf16.mxu0 %v1563_v56  ;;  %v1435_v62 = vadd.f32 %v1259_v61, %v805_v58  ;;  %v791_v0 = vsel %vm513_vm8, %v4397_v14, 0.0  ;;  %v802_v5 = vsel %vm524_vm9, %v4397_v14, 0.0  ;;  %vm967_vm10 = vcmp.eq.s32.totalorder %v337_v59, 1 }
  0x71   :  { %vm978_vm11 = vcmp.eq.s32.totalorder %v348_v54, 1  ;;  %v1245_v6 = vsel %vm967_vm10, %v4388_v10, 0.0  ;;  %v339_v15 = vsub.s32 %v4318_v41, %v4413_v26  ;;  %v350_v17 = vsub.s32 %v4321_v42, %v4413_v26 }
  0x72   :  { %v1565_v18 = vpack.c.bf16 %v1435_v62, %v1424_v57  ;;  %v1256_v21 = vsel %vm978_vm11, %v4388_v10, 0.0  ;;  %v1421_v23 = vadd.f32 %v1245_v6, %v791_v0  ;;  %v316_v29 = vsub.s32 %v4324_v43, %v4379_v7 }
  0x73   :  { %v1432_v25 = vadd.f32 %v1256_v21, %v802_v5  ;;  %vm515_vm12 = vcmp.eq.s32.totalorder %v339_v15, 0  ;;  %vm526_vm13 = vcmp.eq.s32.totalorder %v350_v17, 0  ;;  %vm969_vm14 = vcmp.eq.s32.totalorder %v339_v15, 1 }
  0x74   :  { %1792 = vmatprep.subr.bf16.mxu1 %v1565_v18  ;;  %v793_v33 = vsel %vm515_vm12, %v4436_v30, 0.0  ;;  %v804_v38 = vsel %vm526_vm13, %v4436_v30, 0.0  ;;  %vm980_vm15 = vcmp.eq.s32.totalorder %v350_v17, 1  ;;  %v1247_v45 = vsel %vm969_vm14, %v4442_v24, 0.0 }
  0x75   :  { %v1562_v28 = vpack.c.bf16 %v1432_v25, %v1421_v23  ;;  %v1258_v47 = vsel %vm980_vm15, %v4442_v24, 0.0  ;;  %v1423_v55 = vadd.f32 %v1247_v45, %v793_v33  ;;  %v327_v46 = vsub.s32 %v4327_v44, %v4379_v7 }
  0x76   :  { %v1434_v59 = vadd.f32 %v1258_v47, %v804_v38  ;;  %vm492_vm0 = vcmp.eq.s32.totalorder %v316_v29, 0  ;;  %vm946_vm1 = vcmp.eq.s32.totalorder %v316_v29, 1  ;;  %v318_v54 = vsub.s32 %v4324_v43, %v4385_v9 }
  0x77   :  { %1660 = vmatpush1.bf16.msra.mxu0 %v1562_v28  ;;  %vm503_vm2 = vcmp.eq.s32.totalorder %v327_v46, 0  ;;  %v770_v56 = vsel %vm492_vm0, %v4382_v8, 0.0  ;;  %vm957_vm3 = vcmp.eq.s32.totalorder %v327_v46, 1  ;;  %v1224_v57 = vsel %vm946_vm1, %v4367_v63, 0.0 }
  0x78   :  { %v1564_v58 = vpack.c.bf16 %v1434_v59, %v1423_v55  ;;  %v781_v61 = vsel %vm503_vm2, %v4382_v8, 0.0  ;;  %v1235_v62 = vsel %vm957_vm3, %v4367_v63, 0.0  ;;  %v1400_v0 = vadd.f32 %v1224_v57, %v770_v56 }
  0x79   :  { %v1411_v5 = vadd.f32 %v1235_v62, %v781_v61  ;;  %v329_v6 = vsub.s32 %v4327_v44, %v4385_v9  ;;  %vm494_vm4 = vcmp.eq.s32.totalorder %v318_v54, 0  ;;  %vm948_vm5 = vcmp.eq.s32.totalorder %v318_v54, 1 }
  0x7a   :  { %1793 = vmatpush1.bf16.msra.mxu1 %v1564_v58  ;;  %v772_v15 = vsel %vm494_vm4, %v4391_v12, 0.0  ;;  %v1226_v17 = vsel %vm948_vm5, %v4373_v4, 0.0  ;;  %v315_v18 = vsub.s32 %v4324_v43, %v4394_v13  ;;  %v326_v21 = vsub.s32 %v4327_v44, %v4394_v13 }
  0x7b   :  { %v1552_v23 = vpack.c.bf16 %v1411_v5, %v1400_v0  ;;  %vm505_vm6 = vcmp.eq.s32.totalorder %v329_v6, 0  ;;  %vm959_vm7 = vcmp.eq.s32.totalorder %v329_v6, 1  ;;  %v1402_v29 = vadd.f32 %v1226_v17, %v772_v15 }
  0x7c   :  { %v783_v25 = vsel %vm505_vm6, %v4391_v12, 0.0  ;;  %v1237_v33 = vsel %vm959_vm7, %v4373_v4, 0.0  ;;  %vm491_vm8 = vcmp.eq.s32.totalorder %v315_v18, 0  ;;  %vm502_vm9 = vcmp.eq.s32.totalorder %v326_v21, 0 }
  0x7d   :  { %1661 = vmatprep.subr.bf16.mxu0 %v1552_v23  ;;  %v1413_v38 = vadd.f32 %v1237_v33, %v783_v25  ;;  %v769_v45 = vsel %vm491_vm8, %v4397_v14, 0.0  ;;  %v780_v28 = vsel %vm502_vm9, %v4397_v14, 0.0  ;;  %vm945_vm10 = vcmp.eq.s32.totalorder %v315_v18, 1 }
  0x7e   :  { %vm956_vm11 = vcmp.eq.s32.totalorder %v326_v21, 1  ;;  %v1223_v47 = vsel %vm945_vm10, %v4388_v10, 0.0  ;;  %v317_v55 = vsub.s32 %v4324_v43, %v4413_v26  ;;  %v328_v46 = vsub.s32 %v4327_v44, %v4413_v26 }
  0x7f   :  { %v1554_v59 = vpack.c.bf16 %v1413_v38, %v1402_v29  ;;  %v1234_v54 = vsel %vm956_vm11, %v4388_v10, 0.0  ;;  %v1399_v56 = vadd.f32 %v1223_v47, %v769_v45  ;;  %v294_v57 = vsub.s32 %v4332_v48, %v4379_v7 }
  0x80   :  { %v1410_v58 = vadd.f32 %v1234_v54, %v780_v28  ;;  %vm493_vm12 = vcmp.eq.s32.totalorder %v317_v55, 0  ;;  %vm504_vm13 = vcmp.eq.s32.totalorder %v328_v46, 0  ;;  %vm947_vm14 = vcmp.eq.s32.totalorder %v317_v55, 1 }
  0x81   :  { %1794 = vmatprep.subr.bf16.mxu1 %v1554_v59  ;;  %v771_v61 = vsel %vm493_vm12, %v4436_v30, 0.0  ;;  %v782_v62 = vsel %vm504_vm13, %v4436_v30, 0.0  ;;  %vm958_vm15 = vcmp.eq.s32.totalorder %v328_v46, 1  ;;  %v1225_v0 = vsel %vm947_vm14, %v4442_v24, 0.0 }
  0x82   :  { %v1551_v5 = vpack.c.bf16 %v1410_v58, %v1399_v56  ;;  %v1236_v6 = vsel %vm958_vm15, %v4442_v24, 0.0  ;;  %v1401_v15 = vadd.f32 %v1225_v0, %v771_v61  ;;  %v305_v17 = vsub.s32 %v4335_v49, %v4379_v7 }
  0x83   :  { %v1412_v18 = vadd.f32 %v1236_v6, %v782_v62  ;;  %vm470_vm0 = vcmp.eq.s32.totalorder %v294_v57, 0  ;;  %vm924_vm1 = vcmp.eq.s32.totalorder %v294_v57, 1  ;;  %v296_v21 = vsub.s32 %v4332_v48, %v4385_v9 }
  0x84   :  { %1662 = vmatpush1.bf16.msra.mxu0 %v1551_v5  ;;  %vm481_vm2 = vcmp.eq.s32.totalorder %v305_v17, 0  ;;  %v748_v23 = vsel %vm470_vm0, %v4382_v8, 0.0  ;;  %vm935_vm3 = vcmp.eq.s32.totalorder %v305_v17, 1  ;;  %v1202_v29 = vsel %vm924_vm1, %v4367_v63, 0.0 }
  0x85   :  { %v1553_v25 = vpack.c.bf16 %v1412_v18, %v1401_v15  ;;  %v759_v33 = vsel %vm481_vm2, %v4382_v8, 0.0  ;;  %v1213_v38 = vsel %vm935_vm3, %v4367_v63, 0.0  ;;  %v1378_v45 = vadd.f32 %v1202_v29, %v748_v23 }
  0x86   :  { %v1389_v28 = vadd.f32 %v1213_v38, %v759_v33  ;;  %v307_v47 = vsub.s32 %v4335_v49, %v4385_v9  ;;  %vm472_vm4 = vcmp.eq.s32.totalorder %v296_v21, 0  ;;  %vm926_vm5 = vcmp.eq.s32.totalorder %v296_v21, 1 }
  0x87   :  { %1795 = vmatpush1.bf16.msra.mxu1 %v1553_v25  ;;  %v750_v55 = vsel %vm472_vm4, %v4391_v12, 0.0  ;;  %v1204_v46 = vsel %vm926_vm5, %v4373_v4, 0.0  ;;  %v293_v59 = vsub.s32 %v4332_v48, %v4394_v13  ;;  %v304_v54 = vsub.s32 %v4335_v49, %v4394_v13 }
  0x88   :  { %v1541_v56 = vpack.c.bf16 %v1389_v28, %v1378_v45  ;;  %vm483_vm6 = vcmp.eq.s32.totalorder %v307_v47, 0  ;;  %vm937_vm7 = vcmp.eq.s32.totalorder %v307_v47, 1  ;;  %v1380_v57 = vadd.f32 %v1204_v46, %v750_v55 }
  0x89   :  { %v761_v58 = vsel %vm483_vm6, %v4391_v12, 0.0  ;;  %v1215_v61 = vsel %vm937_vm7, %v4373_v4, 0.0  ;;  %vm469_vm8 = vcmp.eq.s32.totalorder %v293_v59, 0  ;;  %vm480_vm9 = vcmp.eq.s32.totalorder %v304_v54, 0 }
  0x8a   :  { %1663 = vmatprep.subr.bf16.mxu0 %v1541_v56  ;;  %v1391_v62 = vadd.f32 %v1215_v61, %v761_v58  ;;  %v747_v0 = vsel %vm469_vm8, %v4397_v14, 0.0  ;;  %v758_v5 = vsel %vm480_vm9, %v4397_v14, 0.0  ;;  %vm923_vm10 = vcmp.eq.s32.totalorder %v293_v59, 1 }
  0x8b   :  { %vm934_vm11 = vcmp.eq.s32.totalorder %v304_v54, 1  ;;  %v1201_v6 = vsel %vm923_vm10, %v4388_v10, 0.0  ;;  %v295_v15 = vsub.s32 %v4332_v48, %v4413_v26  ;;  %v306_v17 = vsub.s32 %v4335_v49, %v4413_v26 }
  0x8c   :  { %v1543_v18 = vpack.c.bf16 %v1391_v62, %v1380_v57  ;;  %v1212_v21 = vsel %vm934_vm11, %v4388_v10, 0.0  ;;  %v1377_v23 = vadd.f32 %v1201_v6, %v747_v0  ;;  %v272_v29 = vsub.s32 %v4338_v50, %v4379_v7 }
  0x8d   :  { %v1388_v25 = vadd.f32 %v1212_v21, %v758_v5  ;;  %vm471_vm12 = vcmp.eq.s32.totalorder %v295_v15, 0  ;;  %vm482_vm13 = vcmp.eq.s32.totalorder %v306_v17, 0  ;;  %vm925_vm14 = vcmp.eq.s32.totalorder %v295_v15, 1 }
  0x8e   :  { %1796 = vmatprep.subr.bf16.mxu1 %v1543_v18  ;;  %v749_v33 = vsel %vm471_vm12, %v4436_v30, 0.0  ;;  %v760_v38 = vsel %vm482_vm13, %v4436_v30, 0.0  ;;  %vm936_vm15 = vcmp.eq.s32.totalorder %v306_v17, 1  ;;  %v1203_v45 = vsel %vm925_vm14, %v4442_v24, 0.0 }
  0x8f   :  { %v1540_v28 = vpack.c.bf16 %v1388_v25, %v1377_v23  ;;  %v1214_v47 = vsel %vm936_vm15, %v4442_v24, 0.0  ;;  %v1379_v55 = vadd.f32 %v1203_v45, %v749_v33  ;;  %v283_v46 = vsub.s32 %v4341_v51, %v4379_v7 }
  0x90   :  { %v1390_v59 = vadd.f32 %v1214_v47, %v760_v38  ;;  %vm448_vm0 = vcmp.eq.s32.totalorder %v272_v29, 0  ;;  %vm902_vm1 = vcmp.eq.s32.totalorder %v272_v29, 1  ;;  %v274_v54 = vsub.s32 %v4338_v50, %v4385_v9 }
  0x91   :  { %1664 = vmatpush1.bf16.msra.mxu0 %v1540_v28  ;;  %vm459_vm2 = vcmp.eq.s32.totalorder %v283_v46, 0  ;;  %v726_v56 = vsel %vm448_vm0, %v4382_v8, 0.0  ;;  %vm913_vm3 = vcmp.eq.s32.totalorder %v283_v46, 1  ;;  %v1180_v57 = vsel %vm902_vm1, %v4367_v63, 0.0 }
  0x92   :  { %v1542_v58 = vpack.c.bf16 %v1390_v59, %v1379_v55  ;;  %v737_v61 = vsel %vm459_vm2, %v4382_v8, 0.0  ;;  %v1191_v62 = vsel %vm913_vm3, %v4367_v63, 0.0  ;;  %v1356_v0 = vadd.f32 %v1180_v57, %v726_v56 }
  0x93   :  { %v1367_v5 = vadd.f32 %v1191_v62, %v737_v61  ;;  %v285_v6 = vsub.s32 %v4341_v51, %v4385_v9  ;;  %vm450_vm4 = vcmp.eq.s32.totalorder %v274_v54, 0  ;;  %vm904_vm5 = vcmp.eq.s32.totalorder %v274_v54, 1 }
  0x94   :  { %1797 = vmatpush1.bf16.msra.mxu1 %v1542_v58  ;;  %v728_v15 = vsel %vm450_vm4, %v4391_v12, 0.0  ;;  %v1182_v17 = vsel %vm904_vm5, %v4373_v4, 0.0  ;;  %v271_v18 = vsub.s32 %v4338_v50, %v4394_v13  ;;  %v282_v21 = vsub.s32 %v4341_v51, %v4394_v13 }
  0x95   :  { %v1530_v23 = vpack.c.bf16 %v1367_v5, %v1356_v0  ;;  %vm461_vm6 = vcmp.eq.s32.totalorder %v285_v6, 0  ;;  %vm915_vm7 = vcmp.eq.s32.totalorder %v285_v6, 1  ;;  %v1358_v29 = vadd.f32 %v1182_v17, %v728_v15 }
  0x96   :  { %v739_v25 = vsel %vm461_vm6, %v4391_v12, 0.0  ;;  %v1193_v33 = vsel %vm915_vm7, %v4373_v4, 0.0  ;;  %vm447_vm8 = vcmp.eq.s32.totalorder %v271_v18, 0  ;;  %vm458_vm9 = vcmp.eq.s32.totalorder %v282_v21, 0 }
  0x97   :  { %1665 = vmatprep.subr.bf16.mxu0 %v1530_v23  ;;  %v1369_v38 = vadd.f32 %v1193_v33, %v739_v25  ;;  %v725_v45 = vsel %vm447_vm8, %v4397_v14, 0.0  ;;  %v736_v28 = vsel %vm458_vm9, %v4397_v14, 0.0  ;;  %vm901_vm10 = vcmp.eq.s32.totalorder %v271_v18, 1 }
  0x98   :  { %vm912_vm11 = vcmp.eq.s32.totalorder %v282_v21, 1  ;;  %v1179_v47 = vsel %vm901_vm10, %v4388_v10, 0.0  ;;  %v273_v55 = vsub.s32 %v4338_v50, %v4413_v26  ;;  %v284_v46 = vsub.s32 %v4341_v51, %v4413_v26 }
  0x99   :  { %v1532_v59 = vpack.c.bf16 %v1369_v38, %v1358_v29  ;;  %v1190_v54 = vsel %vm912_vm11, %v4388_v10, 0.0  ;;  %v1355_v56 = vadd.f32 %v1179_v47, %v725_v45  ;;  %v250_v57 = vsub.s32 %v4344_v52, %v4379_v7 }
  0x9a   :  { %v1366_v58 = vadd.f32 %v1190_v54, %v736_v28  ;;  %vm449_vm12 = vcmp.eq.s32.totalorder %v273_v55, 0  ;;  %vm460_vm13 = vcmp.eq.s32.totalorder %v284_v46, 0  ;;  %vm903_vm14 = vcmp.eq.s32.totalorder %v273_v55, 1 }
  0x9b   :  { %1798 = vmatprep.subr.bf16.mxu1 %v1532_v59  ;;  %v727_v61 = vsel %vm449_vm12, %v4436_v30, 0.0  ;;  %v738_v62 = vsel %vm460_vm13, %v4436_v30, 0.0  ;;  %vm914_vm15 = vcmp.eq.s32.totalorder %v284_v46, 1  ;;  %v1181_v0 = vsel %vm903_vm14, %v4442_v24, 0.0 }
  0x9c   :  { %v1529_v5 = vpack.c.bf16 %v1366_v58, %v1355_v56  ;;  %v1192_v6 = vsel %vm914_vm15, %v4442_v24, 0.0  ;;  %v1357_v15 = vadd.f32 %v1181_v0, %v727_v61  ;;  %v261_v17 = vsub.s32 %v4347_v53, %v4379_v7 }
  0x9d   :  { %v1368_v18 = vadd.f32 %v1192_v6, %v738_v62  ;;  %vm426_vm0 = vcmp.eq.s32.totalorder %v250_v57, 0  ;;  %vm880_vm1 = vcmp.eq.s32.totalorder %v250_v57, 1  ;;  %v252_v21 = vsub.s32 %v4344_v52, %v4385_v9 }
  0x9e   :  { %1666 = vmatpush1.bf16.msra.mxu0 %v1529_v5  ;;  %vm437_vm2 = vcmp.eq.s32.totalorder %v261_v17, 0  ;;  %v704_v23 = vsel %vm426_vm0, %v4382_v8, 0.0  ;;  %vm891_vm3 = vcmp.eq.s32.totalorder %v261_v17, 1  ;;  %v1158_v29 = vsel %vm880_vm1, %v4367_v63, 0.0 }
  0x9f   :  { %v1531_v25 = vpack.c.bf16 %v1368_v18, %v1357_v15  ;;  %v715_v33 = vsel %vm437_vm2, %v4382_v8, 0.0  ;;  %v1169_v38 = vsel %vm891_vm3, %v4367_v63, 0.0  ;;  %v1334_v45 = vadd.f32 %v1158_v29, %v704_v23 }
  0xa0   :  { %v1345_v28 = vadd.f32 %v1169_v38, %v715_v33  ;;  %v263_v47 = vsub.s32 %v4347_v53, %v4385_v9  ;;  %vm428_vm4 = vcmp.eq.s32.totalorder %v252_v21, 0  ;;  %vm882_vm5 = vcmp.eq.s32.totalorder %v252_v21, 1 }
  0xa1   :  { %1799 = vmatpush1.bf16.msra.mxu1 %v1531_v25  ;;  %v706_v55 = vsel %vm428_vm4, %v4391_v12, 0.0  ;;  %v1160_v46 = vsel %vm882_vm5, %v4373_v4, 0.0  ;;  %v249_v59 = vsub.s32 %v4344_v52, %v4394_v13  ;;  %v260_v54 = vsub.s32 %v4347_v53, %v4394_v13 }
  0xa2   :  { %v1519_v56 = vpack.c.bf16 %v1345_v28, %v1334_v45  ;;  %vm439_vm6 = vcmp.eq.s32.totalorder %v263_v47, 0  ;;  %vm893_vm7 = vcmp.eq.s32.totalorder %v263_v47, 1  ;;  %v1336_v57 = vadd.f32 %v1160_v46, %v706_v55 }
  0xa3   :  { %v717_v58 = vsel %vm439_vm6, %v4391_v12, 0.0  ;;  %v1171_v61 = vsel %vm893_vm7, %v4373_v4, 0.0  ;;  %vm425_vm8 = vcmp.eq.s32.totalorder %v249_v59, 0  ;;  %vm436_vm9 = vcmp.eq.s32.totalorder %v260_v54, 0 }
  0xa4   :  { %1667 = vmatprep.subr.bf16.mxu0 %v1519_v56  ;;  %v1347_v62 = vadd.f32 %v1171_v61, %v717_v58  ;;  %v703_v0 = vsel %vm425_vm8, %v4397_v14, 0.0  ;;  %v714_v5 = vsel %vm436_vm9, %v4397_v14, 0.0  ;;  %vm879_vm10 = vcmp.eq.s32.totalorder %v249_v59, 1 }
  0xa5   :  { %vm890_vm11 = vcmp.eq.s32.totalorder %v260_v54, 1  ;;  %v1157_v6 = vsel %vm879_vm10, %v4388_v10, 0.0  ;;  %v251_v15 = vsub.s32 %v4344_v52, %v4413_v26  ;;  %v262_v17 = vsub.s32 %v4347_v53, %v4413_v26 }
  0xa6   :  { %v1521_v18 = vpack.c.bf16 %v1347_v62, %v1336_v57  ;;  %v1168_v21 = vsel %vm890_vm11, %v4388_v10, 0.0  ;;  %v1333_v23 = vadd.f32 %v1157_v6, %v703_v0  ;;  %v228_v29 = vsub.s32 %v4290_v27, %v4379_v7 }
  0xa7   :  { %v1344_v25 = vadd.f32 %v1168_v21, %v714_v5  ;;  %vm427_vm12 = vcmp.eq.s32.totalorder %v251_v15, 0  ;;  %vm438_vm13 = vcmp.eq.s32.totalorder %v262_v17, 0  ;;  %vm881_vm14 = vcmp.eq.s32.totalorder %v251_v15, 1 }
  0xa8   :  { %1800 = vmatprep.subr.bf16.mxu1 %v1521_v18  ;;  %v705_v33 = vsel %vm427_vm12, %v4436_v30, 0.0  ;;  %v716_v38 = vsel %vm438_vm13, %v4436_v30, 0.0  ;;  %vm892_vm15 = vcmp.eq.s32.totalorder %v262_v17, 1  ;;  %v1159_v45 = vsel %vm881_vm14, %v4442_v24, 0.0 }
  0xa9   :  { %v1518_v28 = vpack.c.bf16 %v1344_v25, %v1333_v23  ;;  %v1170_v47 = vsel %vm892_vm15, %v4442_v24, 0.0  ;;  %v1335_v55 = vadd.f32 %v1159_v45, %v705_v33  ;;  %v239_v46 = vsub.s32 %v4361_v60, %v4379_v7 }
  0xaa   :  { %v1346_v59 = vadd.f32 %v1170_v47, %v716_v38  ;;  %vm404_vm0 = vcmp.eq.s32.totalorder %v228_v29, 0  ;;  %vm858_vm1 = vcmp.eq.s32.totalorder %v228_v29, 1  ;;  %v230_v54 = vsub.s32 %v4290_v27, %v4385_v9 }
  0xab   :  { %1668 = vmatpush1.bf16.msra.mxu0 %v1518_v28  ;;  %vm415_vm2 = vcmp.eq.s32.totalorder %v239_v46, 0  ;;  %v682_v56 = vsel %vm404_vm0, %v4382_v8, 0.0  ;;  %vm869_vm3 = vcmp.eq.s32.totalorder %v239_v46, 1  ;;  %v1136_v57 = vsel %vm858_vm1, %v4367_v63, 0.0 }
  0xac   :  { %v1520_v58 = vpack.c.bf16 %v1346_v59, %v1335_v55  ;;  %v693_v61 = vsel %vm415_vm2, %v4382_v8, 0.0  ;;  %v1147_v62 = vsel %vm869_vm3, %v4367_v63, 0.0  ;;  %v1312_v0 = vadd.f32 %v1136_v57, %v682_v56  ;;  %v4208_v56 = vld [vmem:[%s6921_s1 + $0x8] sm:$0xff] }
  0xad   :  { %v1323_v7 = vadd.f32 %v1147_v62, %v693_v61  ;;  %v241_v5 = vsub.s32 %v4361_v60, %v4385_v9  ;;  %vm406_vm4 = vcmp.eq.s32.totalorder %v230_v54, 0  ;;  %vm860_vm5 = vcmp.eq.s32.totalorder %v230_v54, 1  ;;  %v4190_v61 = vld [vmem:[%s6922_s2] sm:$0xff]  }
  0xae   :  { %1801 = vmatpush1.bf16.msra.mxu1 %v1520_v58  ;;  %v684_v6 = vsel %vm406_vm4, %v4391_v12, 0.0  ;;  %v1138_v15 = vsel %vm860_vm5, %v4373_v4, 0.0  ;;  %v227_v17 = vsub.s32 %v4290_v27, %v4394_v13  ;;  %v238_v8 = vsub.s32 %v4361_v60, %v4394_v13 }
  0xaf   :  { %v1508_v18 = vpack.c.bf16 %v1323_v7, %v1312_v0  ;;  %vm417_vm6 = vcmp.eq.s32.totalorder %v241_v5, 0  ;;  %vm871_vm7 = vcmp.eq.s32.totalorder %v241_v5, 1  ;;  %v1314_v63 = vadd.f32 %v1138_v15, %v684_v6 }
  0xb0   :  { %v695_v21 = vsel %vm417_vm6, %v4391_v12, 0.0  ;;  %v1149_v9 = vsel %vm871_vm7, %v4373_v4, 0.0  ;;  %vm403_vm8 = vcmp.eq.s32.totalorder %v227_v17, 0  ;;  %vm414_vm9 = vcmp.eq.s32.totalorder %v238_v8, 0 }
  0xb1   :  { %1669 = vmatprep.subr.bf16.mxu0 %v1508_v18  ;;  %v1325_v23 = vadd.f32 %v1149_v9, %v695_v21  ;;  %v681_v29 = vsel %vm403_vm8, %v4397_v14, 0.0  ;;  %v692_v25 = vsel %vm414_vm9, %v4397_v14, 0.0  ;;  %vm857_vm10 = vcmp.eq.s32.totalorder %v227_v17, 1  ;;  %v30_v14 = vld [vmem:[%s6921_s1 + $0x10] sm:$0x3f] }
  0xb2   :  { %vm868_vm11 = vcmp.eq.s32.totalorder %v238_v8, 1  ;;  %v1135_v13 = vsel %vm857_vm10, %v4388_v10, 0.0  ;;  %v229_v33 = vsub.s32 %v4290_v27, %v4413_v26  ;;  %v240_v12 = vsub.s32 %v4361_v60, %v4413_v26 }
  0xb3   :  { %v1510_v38 = vpack.c.bf16 %v1325_v23, %v1314_v63  ;;  %v1146_v4 = vsel %vm868_vm11, %v4388_v10, 0.0  ;;  %v1311_v45 = vadd.f32 %v1135_v13, %v681_v29  ;;  %v83_v28 = vmul.f32 %v4426_v2, %v4280_v16 }
  0xb4   :  { %v1322_v47 = vadd.f32 %v1146_v4, %v692_v25  ;;  %vm405_vm12 = vcmp.eq.s32.totalorder %v229_v33, 0  ;;  %vm416_vm13 = vcmp.eq.s32.totalorder %v240_v12, 0  ;;  %vm859_vm14 = vcmp.eq.s32.totalorder %v229_v33, 1 }
  0xb5   :  { %1802 = vmatprep.subr.bf16.mxu1 %v1510_v38  ;;  %v683_v55 = vsel %vm405_vm12, %v4436_v30, 0.0  ;;  %v694_v26 = vsel %vm416_vm13, %v4436_v30, 0.0  ;;  %vm870_vm15 = vcmp.eq.s32.totalorder %v240_v12, 1  ;;  %v1137_v10 = vsel %vm859_vm14, %v4442_v24, 0.0 }
  0xb6   :  { %v1507_v46 = vpack.c.bf16 %v1322_v47, %v1311_v45  ;;  %v1148_v59 = vsel %vm870_vm15, %v4442_v24, 0.0  ;;  %v1313_v54 = vadd.f32 %v1137_v10, %v683_v55  ;;  %v86_v57 = vadd.f32 %v4208_v56, %v83_v28 }
  0xb7   :  { %v1324_v58 = vadd.f32 %v1148_v59, %v694_v26  ;;  %v39_v62 = vsub.f32 %v30_v14, %v4270_v3  ;;  %v46_v30 = vsub.f32 %v30_v14, %v4267_v1  ;;  %v4191_v1 = vld [vmem:[%s6922_s2 + $0x8] sm:$0xff]  }
  0xb8   :  { %1670 = vmatpush1.bf16.msra.mxu0 %v1507_v46  ;;  %v105_v0 = vadd.f32 1.0, %v86_v57 }
  0xb9   :  { %v1509_v7 = vpack.c.bf16 %v1324_v58, %v1313_v54  ;;  %v42_v5 = vmul.f32 %v39_v62, %v39_v62  ;;  %v49_v24 = vmul.f32 %v46_v30, %v46_v30 }
  0xba   :  { %v108_v6 = vmul.f32 17.5, %v105_v0 }
  0xbb   :  { %1803 = vmatpush1.bf16.msra.mxu1 %v1509_v7  ;;  %1688 = vmatmul.mubr.bf16.vlgmr.msra.gmra.mxu0 %v4190_v61  ;;  %v4103_v15 = vrot.slane %v49_v24, 9  ;;  %v4770_v24 = vld [vmem:[%s6922_s2 + $0x10] sm:$0xff]  }
  0xbc   :  { %v111_v17 = vfloor.f32 %v108_v6  ;;  %1697 = vmatprep.mubr.bf16.mxu0 %v6927_v22 }
  0xbd   :  { %v64_v8 = vadd.f32 %v4103_v15, %v42_v5 }
  0xbe   :  { %1821 = vmatmul.mubr.bf16.vlgmr.msra.gmra.mxu1 %v4190_v61  ;;  %v4686_v18 = vsub.f32 %v108_v6, %v111_v17  ;;  %v4177_v63 = vtrunc.f32 %v111_v17 }
  0xbf   :  { %1830 = vmatprep.mubr.bf16.mxu1 %v6927_v22  ;;  %v67_v3 = vsub.f32 0.0, %v64_v8 }
  0xc0   :  { %v4693_v21 = vsub.f32 1.0, %v4686_v18  ;;  %v4695_v9 = vcvt.f32.s32 %v4177_v63  ;;  %v1059_v23 = vrot.slane %v4686_v18, %v4303_v35  ;;  %v1055_v29 = vrot.slane %v4686_v18, %v4300_v34 }
  0xc1   :  { %v1067_v25 = vrot.slane %v4686_v18, %v4306_v36  ;;  %v1063_v13 = vrot.slane %v4686_v18, %v4309_v37  ;;  %v4706_v33 = vmul.f32 %v4273_v11, %v67_v3 }
  0xc2   :  { %v162_v12 = vrot.slane %v4695_v9, %v4303_v35  ;;  %v605_v38 = vrot.slane %v4693_v21, %v4303_v35  ;;  %v4713_v4 = vrot.slane %v1059_v23, %v4300_v34  ;;  %v158_v45 = vrot.slane %v4695_v9, %v4300_v34 }
  0xc3   :  { %v601_v28 = vrot.slane %v4693_v21, %v4300_v34  ;;  %v4720_v47 = vrot.slane %v1055_v29, %v4300_v34  ;;  %1698 = vmatmul.mubr.bf16.gmra.mxu0 %v4191_v1  ;;  %v170_v11 = vrot.slane %v4695_v9, %v4306_v36  ;;  %v613_v14 = vrot.slane %v4693_v21, %v4306_v36 }
  0xc4   :  { %v4727_v55 = vrot.slane %v162_v12, %v4300_v34  ;;  %v4730_v26 = vrot.slane %v605_v38, %v4300_v34  ;;  %v4733_v10 = vrot.slane %v158_v45, %v4300_v34  ;;  %1707 = vmatprep.mubr.bf16.mxu0 %v6927_v22  ;;  %v4737_v46 = vrot.slane %v1067_v25, %v4300_v34 }
  0xc5   :  { %v4740_v59 = vrot.slane %v601_v28, %v4300_v34  ;;  %v4743_v54 = vrot.slane %v170_v11, %v4300_v34  ;;  %v4746_v36 = vrot.slane %v613_v14, %v4300_v34  ;;  %v166_v56 = vrot.slane %v4695_v9, %v4309_v37 }
  0xc6   :  { %v386_v57 = vsub.s32 %v4293_v31, %v4727_v55  ;;  %v397_v58 = vsub.s32 %v4296_v32, %v4727_v55  ;;  %v385_v61 = vsub.s32 %v4293_v31, %v4733_v10  ;;  %v396_v62 = vsub.s32 %v4296_v32, %v4733_v10  ;;  %1831 = vmatmul.mubr.bf16.gmra.mxu1 %v4191_v1 }
  0xc7   :  { %v364_v30 = vsub.s32 %v4312_v39, %v4727_v55  ;;  %v375_v0 = vsub.s32 %v4315_v40, %v4727_v55  ;;  %v363_v7 = vsub.s32 %v4312_v39, %v4733_v10  ;;  %v374_v5 = vsub.s32 %v4315_v40, %v4733_v10  ;;  %1840 = vmatprep.mubr.bf16.mxu1 %v6927_v22 }
  0xc8   :  { %vm562_vm0 = vcmp.eq.s32.totalorder %v386_v57, 0  ;;  %vm573_vm1 = vcmp.eq.s32.totalorder %v397_v58, 0  ;;  %vm1016_vm2 = vcmp.eq.s32.totalorder %v386_v57, 1  ;;  %vm1027_vm3 = vcmp.eq.s32.totalorder %v397_v58, 1 }
  0xc9   :  { %v840_v6 = vsel %vm562_vm0, %v4730_v26, 0.0  ;;  %v851_v15 = vsel %vm573_vm1, %v4730_v26, 0.0  ;;  %v1294_v17 = vsel %vm1016_vm2, %v4713_v4, 0.0  ;;  %v1305_v8 = vsel %vm1027_vm3, %v4713_v4, 0.0 }
  0xca   :  { %v1470_v63 = vadd.f32 %v1294_v17, %v840_v6  ;;  %v1481_v1 = vadd.f32 %v1305_v8, %v851_v15  ;;  %vm561_vm4 = vcmp.eq.s32.totalorder %v385_v61, 0  ;;  %vm572_vm5 = vcmp.eq.s32.totalorder %v396_v62, 0 }
  0xcb   :  { %v839_v3 = vsel %vm561_vm4, %v4740_v59, 0.0  ;;  %v850_v23 = vsel %vm572_vm5, %v4740_v59, 0.0  ;;  %vm1015_vm6 = vcmp.eq.s32.totalorder %v385_v61, 1  ;;  %vm1026_vm7 = vcmp.eq.s32.totalorder %v396_v62, 1  ;;  %1708 = vmatmul.mubr.bf16.gmra.mxu0 %v4770_v24  ;;  %v4791_v61 = vld [vmem:[%s6922_s2 + $0x18] sm:$0xff]  }
  0xcc   :  { %v1589_v29 = vpack.c.bf16 %v1481_v1, %v1470_v63  ;;  %v1293_v25 = vsel %vm1015_vm6, %v4720_v47, 0.0  ;;  %v1304_v12 = vsel %vm1026_vm7, %v4720_v47, 0.0  ;;  %vm540_vm8 = vcmp.eq.s32.totalorder %v364_v30, 0  ;;  %1717 = vmatprep.mubr.bf16.mxu0 %v6927_v22 }
  0xcd   :  { %v1469_v38 = vadd.f32 %v1293_v25, %v839_v3  ;;  %v1480_v45 = vadd.f32 %v1304_v12, %v850_v23  ;;  %vm551_vm9 = vcmp.eq.s32.totalorder %v375_v0, 0  ;;  %v818_v28 = vsel %vm540_vm8, %v4730_v26, 0.0 }
  0xce   :  { %1921 = vmatprep.subr.bf16.mxu0 %v1589_v29  ;;  %v829_v11 = vsel %vm551_vm9, %v4730_v26, 0.0  ;;  %vm994_vm10 = vcmp.eq.s32.totalorder %v364_v30, 1  ;;  %vm1005_vm11 = vcmp.eq.s32.totalorder %v375_v0, 1  ;;  %vm539_vm12 = vcmp.eq.s32.totalorder %v363_v7, 0  ;;  %1841 = vmatmul.mubr.bf16.gmra.mxu1 %v4770_v24 }
  0xcf   :  { %v1588_v14 = vpack.c.bf16 %v1480_v45, %v1469_v38  ;;  %v1272_v57 = vsel %vm994_vm10, %v4713_v4, 0.0  ;;  %v1283_v58 = vsel %vm1005_vm11, %v4713_v4, 0.0  ;;  %vm550_vm13 = vcmp.eq.s32.totalorder %v374_v5, 0  ;;  %1850 = vmatprep.mubr.bf16.mxu1 %v6927_v22 }
  0xd0   :  { %v1448_v62 = vadd.f32 %v1272_v57, %v818_v28  ;;  %v1459_v6 = vadd.f32 %v1283_v58, %v829_v11  ;;  %v817_v30 = vsel %vm539_vm12, %v4740_v59, 0.0  ;;  %v828_v0 = vsel %vm550_vm13, %v4740_v59, 0.0  ;;  %v4818_v58 = vld [vmem:[%s6922_s2 + $0x20] sm:$0xff]  }
  0xd1   :  { %1922 = vmatpush1.bf16.msra.mxu0 %v1588_v14  ;;  %vm993_vm14 = vcmp.eq.s32.totalorder %v363_v7, 1  ;;  %vm1004_vm15 = vcmp.eq.s32.totalorder %v374_v5, 1  ;;  %v342_v15 = vsub.s32 %v4318_v41, %v4727_v55  ;;  %v353_v17 = vsub.s32 %v4321_v42, %v4727_v55 }
  0xd2   :  { %v1578_v8 = vpack.c.bf16 %v1459_v6, %v1448_v62  ;;  %v1271_v63 = vsel %vm993_vm14, %v4720_v47, 0.0  ;;  %v1282_v1 = vsel %vm1004_vm15, %v4720_v47, 0.0  ;;  %v341_v3 = vsub.s32 %v4318_v41, %v4733_v10 }
  0xd3   :  { %v1447_v23 = vadd.f32 %v1271_v63, %v817_v30  ;;  %v1458_v29 = vadd.f32 %v1282_v1, %v828_v0  ;;  %vm518_vm0 = vcmp.eq.s32.totalorder %v342_v15, 0  ;;  %vm529_vm1 = vcmp.eq.s32.totalorder %v353_v17, 0  ;;  %1718 = vmatmul.mubr.bf16.gmra.mxu0 %v4791_v61 }
  0xd4   :  { %1923 = vmatprep.subr.bf16.mxu0 %v1578_v8  ;;  %v796_v7 = vsel %vm518_vm0, %v4730_v26, 0.0  ;;  %v807_v5 = vsel %vm529_vm1, %v4730_v26, 0.0  ;;  %vm972_vm2 = vcmp.eq.s32.totalorder %v342_v15, 1  ;;  %vm983_vm3 = vcmp.eq.s32.totalorder %v353_v17, 1  ;;  %1727 = vmatprep.mubr.bf16.mxu0 %v6927_v22 }
  0xd5   :  { %v1577_v25 = vpack.c.bf16 %v1458_v29, %v1447_v23  ;;  %v1250_v12 = vsel %vm972_vm2, %v4713_v4, 0.0  ;;  %v1261_v38 = vsel %vm983_vm3, %v4713_v4, 0.0  ;;  %v352_v45 = vsub.s32 %v4321_v42, %v4733_v10 }
  0xd6   :  { %v1426_v28 = vadd.f32 %v1250_v12, %v796_v7  ;;  %v1437_v11 = vadd.f32 %v1261_v38, %v807_v5  ;;  %vm517_vm4 = vcmp.eq.s32.totalorder %v341_v3, 0  ;;  %vm971_vm5 = vcmp.eq.s32.totalorder %v341_v3, 1  ;;  %1851 = vmatmul.mubr.bf16.gmra.mxu1 %v4791_v61 }
  0xd7   :  { %1924 = vmatpush1.bf16.msra.mxu0 %v1577_v25  ;;  %vm528_vm6 = vcmp.eq.s32.totalorder %v352_v45, 0  ;;  %v795_v14 = vsel %vm517_vm4, %v4740_v59, 0.0  ;;  %vm982_vm7 = vcmp.eq.s32.totalorder %v352_v45, 1  ;;  %v1249_v57 = vsel %vm971_vm5, %v4720_v47, 0.0  ;;  %1860 = vmatprep.mubr.bf16.mxu1 %v6927_v22 }
  0xd8   :  { %v1567_v62 = vpack.c.bf16 %v1437_v11, %v1426_v28  ;;  %v806_v6 = vsel %vm528_vm6, %v4740_v59, 0.0  ;;  %v1260_v30 = vsel %vm982_vm7, %v4720_v47, 0.0  ;;  %v1425_v0 = vadd.f32 %v1249_v57, %v795_v14  ;;  %v4854_v14 = vld [vmem:[%s6922_s2 + $0x28] sm:$0xff]  }
  0xd9   :  { %v1436_v15 = vadd.f32 %v1260_v30, %v806_v6  ;;  %v320_v17 = vsub.s32 %v4324_v43, %v4727_v55  ;;  %v331_v8 = vsub.s32 %v4327_v44, %v4727_v55  ;;  %v319_v63 = vsub.s32 %v4324_v43, %v4733_v10 }
  0xda   :  { %1925 = vmatprep.subr.bf16.mxu0 %v1567_v62  ;;  %v330_v1 = vsub.s32 %v4327_v44, %v4733_v10  ;;  %v388_v3 = vsub.s32 %v4293_v31, %v4743_v54  ;;  %v399_v23 = vsub.s32 %v4296_v32, %v4743_v54  ;;  %v4838_v29 = vrot.slane %v166_v56, %v4300_v34 }
  0xdb   :  { %v1566_v7 = vpack.c.bf16 %v1436_v15, %v1425_v0  ;;  %vm496_vm8 = vcmp.eq.s32.totalorder %v320_v17, 0  ;;  %vm507_vm9 = vcmp.eq.s32.totalorder %v331_v8, 0  ;;  %vm950_vm10 = vcmp.eq.s32.totalorder %v320_v17, 1  ;;  %1728 = vmatmul.mubr.bf16.gmra.mxu0 %v4818_v58 }
  0xdc   :  { %v774_v5 = vsel %vm496_vm8, %v4730_v26, 0.0  ;;  %v785_v25 = vsel %vm507_vm9, %v4730_v26, 0.0  ;;  %vm961_vm11 = vcmp.eq.s32.totalorder %v331_v8, 1  ;;  %v1228_v12 = vsel %vm950_vm10, %v4713_v4, 0.0  ;;  %1737 = vmatprep.mubr.bf16.mxu0 %v6927_v22 }
  0xdd   :  { %1926 = vmatpush1.bf16.msra.mxu0 %v1566_v7  ;;  %v1239_v9 = vsel %vm961_vm11, %v4713_v4, 0.0  ;;  %v1404_v56 = vadd.f32 %v1228_v12, %v774_v5  ;;  %vm495_vm12 = vcmp.eq.s32.totalorder %v319_v63, 0  ;;  %vm506_vm13 = vcmp.eq.s32.totalorder %v330_v1, 0 }
  0xde   :  { %v1415_v38 = vadd.f32 %v1239_v9, %v785_v25  ;;  %v773_v45 = vsel %vm495_vm12, %v4740_v59, 0.0  ;;  %v784_v28 = vsel %vm506_vm13, %v4740_v59, 0.0  ;;  %vm949_vm14 = vcmp.eq.s32.totalorder %v319_v63, 1  ;;  %1861 = vmatmul.mubr.bf16.gmra.mxu1 %v4818_v58 }
  0xdf   :  { %vm960_vm15 = vcmp.eq.s32.totalorder %v330_v1, 1  ;;  %v1227_v11 = vsel %vm949_vm14, %v4720_v47, 0.0  ;;  %vm564_vm0 = vcmp.eq.s32.totalorder %v388_v3, 0  ;;  %vm575_vm1 = vcmp.eq.s32.totalorder %v399_v23, 0  ;;  %1870 = vmatprep.mubr.bf16.mxu1 %v6927_v22 }
  0xe0   :  { %v1556_v57 = vpack.c.bf16 %v1415_v38, %v1404_v56  ;;  %v1238_v62 = vsel %vm960_vm15, %v4720_v47, 0.0  ;;  %v1403_v6 = vadd.f32 %v1227_v11, %v773_v45  ;;  %v842_v30 = vsel %vm564_vm0, %v4746_v36, 0.0 }
  0xe1   :  { %v1414_v0 = vadd.f32 %v1238_v62, %v784_v28  ;;  %v853_v15 = vsel %vm575_vm1, %v4746_v36, 0.0  ;;  %vm1018_vm2 = vcmp.eq.s32.totalorder %v388_v3, 1  ;;  %vm1029_vm3 = vcmp.eq.s32.totalorder %v399_v23, 1  ;;  %v4901_v62 = vld [vmem:[%s6922_s2 + $0x30] sm:$0xff]  }
  0xe2   :  { %1927 = vmatprep.subr.bf16.mxu0 %v1556_v57  ;;  %v1296_v17 = vsel %vm1018_vm2, %v4737_v46, 0.0  ;;  %v1307_v8 = vsel %vm1029_vm3, %v4737_v46, 0.0  ;;  %v387_v63 = vsub.s32 %v4293_v31, %v4838_v29  ;;  %v398_v1 = vsub.s32 %v4296_v32, %v4838_v29 }
  0xe3   :  { %v1555_v7 = vpack.c.bf16 %v1414_v0, %v1403_v6  ;;  %v1472_v5 = vadd.f32 %v1296_v17, %v842_v30  ;;  %v1483_v25 = vadd.f32 %v1307_v8, %v853_v15  ;;  %v609_v12 = vrot.slane %v4693_v21, %v4309_v37  ;;  %1738 = vmatmul.mubr.bf16.gmra.mxu0 %v4854_v14 }
  0xe4   :  { %vm563_vm4 = vcmp.eq.s32.totalorder %v387_v63, 0  ;;  %vm574_vm5 = vcmp.eq.s32.totalorder %v398_v1, 0  ;;  %vm1017_vm6 = vcmp.eq.s32.totalorder %v387_v63, 1  ;;  %vm1028_vm7 = vcmp.eq.s32.totalorder %v398_v1, 1  ;;  %1747 = vmatprep.mubr.bf16.mxu0 %v6927_v22 }
  0xe5   :  { %1928 = vmatpush1.bf16.msra.mxu0 %v1555_v7  ;;  %v1591_v3 = vpack.c.bf16 %v1483_v25, %v1472_v5  ;;  %v4870_v23 = vrot.slane %v609_v12, %v4300_v34  ;;  %v4876_v9 = vrot.slane %v1063_v13, %v4300_v34  ;;  %v298_v21 = vsub.s32 %v4332_v48, %v4727_v55 }
  0xe6   :  { %1871 = vmatmul.mubr.bf16.gmra.mxu1 %v4854_v14  ;;  %v309_v56 = vsub.s32 %v4335_v49, %v4727_v55  ;;  %v297_v38 = vsub.s32 %v4332_v48, %v4733_v10  ;;  %v308_v45 = vsub.s32 %v4335_v49, %v4733_v10  ;;  %v366_v28 = vsub.s32 %v4312_v39, %v4743_v54 }
  0xe7   :  { %2054 = vmatprep.subr.bf16.mxu1 %v1591_v3  ;;  %v841_v18 = vsel %vm563_vm4, %v4870_v23, 0.0  ;;  %v852_v13 = vsel %vm574_vm5, %v4870_v23, 0.0  ;;  %v1295_v11 = vsel %vm1017_vm6, %v4876_v9, 0.0  ;;  %v1306_v57 = vsel %vm1028_vm7, %v4876_v9, 0.0  ;;  %1880 = vmatprep.mubr.bf16.mxu1 %v6927_v22 }
  0xe8   :  { %v1471_v6 = vadd.f32 %v1295_v11, %v841_v18  ;;  %v1482_v30 = vadd.f32 %v1306_v57, %v852_v13  ;;  %vm474_vm8 = vcmp.eq.s32.totalorder %v298_v21, 0  ;;  %vm485_vm9 = vcmp.eq.s32.totalorder %v309_v56, 0  ;;  %v4924_v57 = vld [vmem:[%s6922_s2 + $0x38] sm:$0xff]  }
  0xe9   :  { %v752_v0 = vsel %vm474_vm8, %v4730_v26, 0.0  ;;  %v763_v15 = vsel %vm485_vm9, %v4730_v26, 0.0  ;;  %vm928_vm10 = vcmp.eq.s32.totalorder %v298_v21, 1  ;;  %vm939_vm11 = vcmp.eq.s32.totalorder %v309_v56, 1 }
  0xea   :  { %v1590_v17 = vpack.c.bf16 %v1482_v30, %v1471_v6  ;;  %v1206_v8 = vsel %vm928_vm10, %v4713_v4, 0.0  ;;  %v1217_v63 = vsel %vm939_vm11, %v4713_v4, 0.0  ;;  %vm473_vm12 = vcmp.eq.s32.totalorder %v297_v38, 0 }
  0xeb   :  { %v1382_v1 = vadd.f32 %v1206_v8, %v752_v0  ;;  %v1393_v7 = vadd.f32 %v1217_v63, %v763_v15  ;;  %vm484_vm13 = vcmp.eq.s32.totalorder %v308_v45, 0  ;;  %v751_v5 = vsel %vm473_vm12, %v4740_v59, 0.0  ;;  %1748 = vmatmul.mubr.bf16.gmra.mxu0 %v4901_v62 }
  0xec   :  { %2055 = vmatpush1.bf16.msra.mxu1 %v1590_v17  ;;  %v762_v25 = vsel %vm484_vm13, %v4740_v59, 0.0  ;;  %vm927_vm14 = vcmp.eq.s32.totalorder %v297_v38, 1  ;;  %vm938_vm15 = vcmp.eq.s32.totalorder %v308_v45, 1  ;;  %v377_v12 = vsub.s32 %v4315_v40, %v4743_v54  ;;  %1757 = vmatprep.mubr.bf16.mxu0 %v6927_v22 }
  0xed   :  { %v1545_v3 = vpack.c.bf16 %v1393_v7, %v1382_v1  ;;  %v1205_v21 = vsel %vm927_vm14, %v4720_v47, 0.0  ;;  %v1216_v56 = vsel %vm938_vm15, %v4720_v47, 0.0  ;;  %vm542_vm0 = vcmp.eq.s32.totalorder %v366_v28, 0 }
  0xee   :  { %v1381_v18 = vadd.f32 %v1205_v21, %v751_v5  ;;  %v1392_v13 = vadd.f32 %v1216_v56, %v762_v25  ;;  %1881 = vmatmul.mubr.bf16.gmra.mxu1 %v4901_v62  ;;  %vm553_vm1 = vcmp.eq.s32.totalorder %v377_v12, 0  ;;  %v820_v11 = vsel %vm542_vm0, %v4746_v36, 0.0 }
  0xef   :  { %1929 = vmatprep.subr.bf16.mxu0 %v1545_v3  ;;  %v831_v38 = vsel %vm553_vm1, %v4746_v36, 0.0  ;;  %vm996_vm2 = vcmp.eq.s32.totalorder %v366_v28, 1  ;;  %vm1007_vm3 = vcmp.eq.s32.totalorder %v377_v12, 1  ;;  %v365_v45 = vsub.s32 %v4312_v39, %v4838_v29  ;;  %1890 = vmatprep.mubr.bf16.mxu1 %v6927_v22 }
  0xf0   :  { %v1544_v6 = vpack.c.bf16 %v1392_v13, %v1381_v18  ;;  %v1274_v30 = vsel %vm996_vm2, %v4737_v46, 0.0  ;;  %v1285_v0 = vsel %vm1007_vm3, %v4737_v46, 0.0  ;;  %v376_v15 = vsub.s32 %v4315_v40, %v4838_v29 }
  0xf1   :  { %v1450_v28 = vadd.f32 %v1274_v30, %v820_v11  ;;  %v1461_v17 = vadd.f32 %v1285_v0, %v831_v38  ;;  %vm541_vm4 = vcmp.eq.s32.totalorder %v365_v45, 0  ;;  %vm995_vm5 = vcmp.eq.s32.totalorder %v365_v45, 1 }
  0xf2   :  { %1930 = vmatpush1.bf16.msra.mxu0 %v1544_v6  ;;  %vm552_vm6 = vcmp.eq.s32.totalorder %v376_v15, 0  ;;  %v819_v8 = vsel %vm541_vm4, %v4870_v23, 0.0  ;;  %vm1006_vm7 = vcmp.eq.s32.totalorder %v376_v15, 1  ;;  %v1273_v63 = vsel %vm995_vm5, %v4876_v9, 0.0  ;;  %v4958_v15 = vld [vmem:[%s6922_s2 + $0x40] sm:$0xff]  }
  0xf3   :  { %v1580_v1 = vpack.c.bf16 %v1461_v17, %v1450_v28  ;;  %v830_v7 = vsel %vm552_vm6, %v4870_v23, 0.0  ;;  %v1284_v5 = vsel %vm1006_vm7, %v4876_v9, 0.0  ;;  %v1449_v25 = vadd.f32 %v1273_v63, %v819_v8  ;;  %1758 = vmatmul.mubr.bf16.gmra.mxu0 %v4924_v57 }
  0xf4   :  { %v1460_v12 = vadd.f32 %v1284_v5, %v830_v7  ;;  %v276_v3 = vsub.s32 %v4338_v50, %v4727_v55  ;;  %v287_v21 = vsub.s32 %v4341_v51, %v4727_v55  ;;  %v275_v56 = vsub.s32 %v4338_v50, %v4733_v10  ;;  %1767 = vmatprep.mubr.bf16.mxu0 %v6927_v22 }
  0xf5   :  { %2056 = vmatprep.subr.bf16.mxu1 %v1580_v1  ;;  %v286_v18 = vsub.s32 %v4341_v51, %v4733_v10  ;;  %v344_v13 = vsub.s32 %v4318_v41, %v4743_v54  ;;  %v355_v11 = vsub.s32 %v4321_v42, %v4743_v54  ;;  %v343_v38 = vsub.s32 %v4318_v41, %v4838_v29 }
  0xf6   :  { %v1579_v45 = vpack.c.bf16 %v1460_v12, %v1449_v25  ;;  %vm452_vm8 = vcmp.eq.s32.totalorder %v276_v3, 0  ;;  %vm463_vm9 = vcmp.eq.s32.totalorder %v287_v21, 0  ;;  %vm906_vm10 = vcmp.eq.s32.totalorder %v276_v3, 1  ;;  %1891 = vmatmul.mubr.bf16.gmra.mxu1 %v4924_v57 }
  0xf7   :  { %v730_v6 = vsel %vm452_vm8, %v4730_v26, 0.0  ;;  %v741_v30 = vsel %vm463_vm9, %v4730_v26, 0.0  ;;  %vm917_vm11 = vcmp.eq.s32.totalorder %v287_v21, 1  ;;  %v1184_v0 = vsel %vm906_vm10, %v4713_v4, 0.0  ;;  %1900 = vmatprep.mubr.bf16.mxu1 %v6927_v22 }
  0xf8   :  { %2057 = vmatpush1.bf16.msra.mxu1 %v1579_v45  ;;  %v1195_v28 = vsel %vm917_vm11, %v4713_v4, 0.0  ;;  %v1360_v17 = vadd.f32 %v1184_v0, %v730_v6  ;;  %vm451_vm12 = vcmp.eq.s32.totalorder %v275_v56, 0  ;;  %vm462_vm13 = vcmp.eq.s32.totalorder %v286_v18, 0 }
  0xf9   :  { %v1371_v8 = vadd.f32 %v1195_v28, %v741_v30  ;;  %v729_v63 = vsel %vm451_vm12, %v4740_v59, 0.0  ;;  %v740_v1 = vsel %vm462_vm13, %v4740_v59, 0.0  ;;  %vm905_vm14 = vcmp.eq.s32.totalorder %v275_v56, 1 }
  0xfa   :  { %vm916_vm15 = vcmp.eq.s32.totalorder %v286_v18, 1  ;;  %v1183_v7 = vsel %vm905_vm14, %v4720_v47, 0.0  ;;  %vm520_vm0 = vcmp.eq.s32.totalorder %v344_v13, 0  ;;  %vm531_vm1 = vcmp.eq.s32.totalorder %v355_v11, 0 }
  0xfb   :  { %v1534_v5 = vpack.c.bf16 %v1371_v8, %v1360_v17  ;;  %v1194_v25 = vsel %vm916_vm15, %v4720_v47, 0.0  ;;  %v1359_v12 = vadd.f32 %v1183_v7, %v729_v63  ;;  %v798_v3 = vsel %vm520_vm0, %v4746_v36, 0.0  ;;  %1768 = vmatmul.mubr.bf16.gmra.mxu0 %v4958_v15 }
  0xfc   :  { %v1370_v21 = vadd.f32 %v1194_v25, %v740_v1  ;;  %v809_v45 = vsel %vm531_vm1, %v4746_v36, 0.0  ;;  %vm974_vm2 = vcmp.eq.s32.totalorder %v344_v13, 1  ;;  %vm985_vm3 = vcmp.eq.s32.totalorder %v355_v11, 1  ;;  %1777 = vmatprep.mubr.bf16.mxu0 %v6927_v22  ;;  %v4981_v11 = vld [vmem:[%s6922_s2 + $0x48] sm:$0xff]  }
  0xfd   :  { %1931 = vmatprep.subr.bf16.mxu0 %v1534_v5  ;;  %v1252_v56 = vsel %vm974_vm2, %v4737_v46, 0.0  ;;  %v1263_v18 = vsel %vm985_vm3, %v4737_v46, 0.0  ;;  %v354_v6 = vsub.s32 %v4321_v42, %v4838_v29  ;;  %vm519_vm4 = vcmp.eq.s32.totalorder %v343_v38, 0 }
  0xfe   :  { %v1533_v30 = vpack.c.bf16 %v1370_v21, %v1359_v12  ;;  %v1428_v0 = vadd.f32 %v1252_v56, %v798_v3  ;;  %v1439_v28 = vadd.f32 %v1263_v18, %v809_v45  ;;  %v797_v17 = vsel %vm519_vm4, %v4870_v23, 0.0  ;;  %1901 = vmatmul.mubr.bf16.gmra.mxu1 %v4958_v15 }
  0xff   :  { %vm530_vm5 = vcmp.eq.s32.totalorder %v354_v6, 0  ;;  %vm973_vm6 = vcmp.eq.s32.totalorder %v343_v38, 1  ;;  %vm984_vm7 = vcmp.eq.s32.totalorder %v354_v6, 1  ;;  %v254_v13 = vsub.s32 %v4344_v52, %v4727_v55  ;;  %1910 = vmatprep.mubr.bf16.mxu1 %v6927_v22 }
 0x100   :  { %1932 = vmatpush1.bf16.msra.mxu0 %v1533_v30  ;;  %v1569_v8 = vpack.c.bf16 %v1439_v28, %v1428_v0  ;;  %v808_v63 = vsel %vm530_vm5, %v4870_v23, 0.0  ;;  %v1251_v1 = vsel %vm973_vm6, %v4876_v9, 0.0  ;;  %v1262_v7 = vsel %vm984_vm7, %v4876_v9, 0.0 }
 0x101   :  { %v1427_v38 = vadd.f32 %v1251_v1, %v797_v17  ;;  %v1438_v5 = vadd.f32 %v1262_v7, %v808_v63  ;;  %v265_v25 = vsub.s32 %v4347_v53, %v4727_v55  ;;  %vm430_vm8 = vcmp.eq.s32.totalorder %v254_v13, 0 }
 0x102   :  { %2058 = vmatprep.subr.bf16.mxu1 %v1569_v8  ;;  %v708_v12 = vsel %vm430_vm8, %v4730_v26, 0.0  ;;  %vm884_vm9 = vcmp.eq.s32.totalorder %v254_v13, 1  ;;  %v322_v3 = vsub.s32 %v4324_v43, %v4743_v54  ;;  %v333_v21 = vsub.s32 %v4327_v44, %v4743_v54 }
 0x103   :  { %v1568_v45 = vpack.c.bf16 %v1438_v5, %v1427_v38  ;;  %vm441_vm10 = vcmp.eq.s32.totalorder %v265_v25, 0  ;;  %vm895_vm11 = vcmp.eq.s32.totalorder %v265_v25, 1  ;;  %v1162_v56 = vsel %vm884_vm9, %v4713_v4, 0.0  ;;  %1778 = vmatmul.mubr.bf16.gmra.mxu0 %v4981_v11 }
 0x104   :  { %v719_v18 = vsel %vm441_vm10, %v4730_v26, 0.0  ;;  %v1173_v6 = vsel %vm895_vm11, %v4713_v4, 0.0  ;;  %v1338_v30 = vadd.f32 %v1162_v56, %v708_v12  ;;  %vm498_vm12 = vcmp.eq.s32.totalorder %v322_v3, 0  ;;  %1953 = vmatprep.mubr.bf16.mxu0 %v6927_v22 }
 0x105   :  { %2059 = vmatpush1.bf16.msra.mxu1 %v1568_v45  ;;  %v1349_v0 = vadd.f32 %v1173_v6, %v719_v18  ;;  %vm509_vm13 = vcmp.eq.s32.totalorder %v333_v21, 0  ;;  %v776_v28 = vsel %vm498_vm12, %v4746_v36, 0.0  ;;  %vm952_vm14 = vcmp.eq.s32.totalorder %v322_v3, 1 }
 0x106   :  { %v787_v17 = vsel %vm509_vm13, %v4746_v36, 0.0  ;;  %vm963_vm15 = vcmp.eq.s32.totalorder %v333_v21, 1  ;;  %v1230_v13 = vsel %vm952_vm14, %v4737_v46, 0.0  ;;  %v253_v8 = vsub.s32 %v4344_v52, %v4733_v10  ;;  %1911 = vmatmul.mubr.bf16.gmra.mxu1 %v4981_v11 }
 0x107   :  { %v1523_v63 = vpack.c.bf16 %v1349_v0, %v1338_v30  ;;  %v1241_v1 = vsel %vm963_vm15, %v4737_v46, 0.0  ;;  %v1406_v7 = vadd.f32 %v1230_v13, %v776_v28  ;;  %v264_v38 = vsub.s32 %v4347_v53, %v4733_v10  ;;  %2086 = vmatprep.mubr.bf16.mxu1 %v6927_v22 }
 0x108   :  { %v1417_v5 = vadd.f32 %v1241_v1, %v787_v17  ;;  %vm429_vm0 = vcmp.eq.s32.totalorder %v253_v8, 0  ;;  %vm883_vm1 = vcmp.eq.s32.totalorder %v253_v8, 1  ;;  %v321_v25 = vsub.s32 %v4324_v43, %v4838_v29 }
 0x109   :  { %1933 = vmatprep.subr.bf16.mxu0 %v1523_v63  ;;  %vm440_vm2 = vcmp.eq.s32.totalorder %v264_v38, 0  ;;  %v707_v12 = vsel %vm429_vm0, %v4740_v59, 0.0  ;;  %vm894_vm3 = vcmp.eq.s32.totalorder %v264_v38, 1  ;;  %v1161_v3 = vsel %vm883_vm1, %v4720_v47, 0.0 }
 0x10a   :  { %v1558_v21 = vpack.c.bf16 %v1417_v5, %v1406_v7  ;;  %v718_v45 = vsel %vm440_vm2, %v4740_v59, 0.0  ;;  %v1172_v56 = vsel %vm894_vm3, %v4720_v47, 0.0  ;;  %v1337_v18 = vadd.f32 %v1161_v3, %v707_v12 }
 0x10b   :  { %v1348_v6 = vadd.f32 %v1172_v56, %v718_v45  ;;  %v332_v30 = vsub.s32 %v4327_v44, %v4838_v29  ;;  %vm497_vm4 = vcmp.eq.s32.totalorder %v321_v25, 0  ;;  %vm951_vm5 = vcmp.eq.s32.totalorder %v321_v25, 1 }
 0x10c   :  { %2060 = vmatprep.subr.bf16.mxu1 %v1558_v21  ;;  %v775_v0 = vsel %vm497_vm4, %v4870_v23, 0.0  ;;  %v1229_v28 = vsel %vm951_vm5, %v4876_v9, 0.0  ;;  %v300_v17 = vsub.s32 %v4332_v48, %v4743_v54  ;;  %v311_v13 = vsub.s32 %v4335_v49, %v4743_v54 }
 0x10d   :  { %v1522_v8 = vpack.c.bf16 %v1348_v6, %v1337_v18  ;;  %vm508_vm6 = vcmp.eq.s32.totalorder %v332_v30, 0  ;;  %vm962_vm7 = vcmp.eq.s32.totalorder %v332_v30, 1  ;;  %v1405_v63 = vadd.f32 %v1229_v28, %v775_v0 }
 0x10e   :  { %v786_v1 = vsel %vm508_vm6, %v4870_v23, 0.0  ;;  %v1240_v7 = vsel %vm962_vm7, %v4876_v9, 0.0  ;;  %vm476_vm8 = vcmp.eq.s32.totalorder %v300_v17, 0  ;;  %vm487_vm9 = vcmp.eq.s32.totalorder %v311_v13, 0 }
 0x10f   :  { %1934 = vmatpush1.bf16.msra.mxu0 %v1522_v8  ;;  %v1416_v38 = vadd.f32 %v1240_v7, %v786_v1  ;;  %v754_v5 = vsel %vm476_vm8, %v4746_v36, 0.0  ;;  %v765_v25 = vsel %vm487_vm9, %v4746_v36, 0.0  ;;  %vm930_vm10 = vcmp.eq.s32.totalorder %v300_v17, 1 }
 0x110   :  { %vm941_vm11 = vcmp.eq.s32.totalorder %v311_v13, 1  ;;  %v1208_v12 = vsel %vm930_vm10, %v4737_v46, 0.0  ;;  %v299_v3 = vsub.s32 %v4332_v48, %v4838_v29  ;;  %v310_v21 = vsub.s32 %v4335_v49, %v4838_v29 }
 0x111   :  { %v1557_v45 = vpack.c.bf16 %v1416_v38, %v1405_v63  ;;  %v1219_v56 = vsel %vm941_vm11, %v4737_v46, 0.0  ;;  %v1384_v18 = vadd.f32 %v1208_v12, %v754_v5  ;;  %v278_v6 = vsub.s32 %v4338_v50, %v4743_v54 }
 0x112   :  { %v1395_v30 = vadd.f32 %v1219_v56, %v765_v25  ;;  %vm475_vm12 = vcmp.eq.s32.totalorder %v299_v3, 0  ;;  %vm486_vm13 = vcmp.eq.s32.totalorder %v310_v21, 0  ;;  %vm929_vm14 = vcmp.eq.s32.totalorder %v299_v3, 1 }
 0x113   :  { %2061 = vmatpush1.bf16.msra.mxu1 %v1557_v45  ;;  %v753_v0 = vsel %vm475_vm12, %v4870_v23, 0.0  ;;  %v764_v28 = vsel %vm486_vm13, %v4870_v23, 0.0  ;;  %vm940_vm15 = vcmp.eq.s32.totalorder %v310_v21, 1  ;;  %v1207_v17 = vsel %vm929_vm14, %v4876_v9, 0.0 }
 0x114   :  { %v1547_v13 = vpack.c.bf16 %v1395_v30, %v1384_v18  ;;  %v1218_v8 = vsel %vm940_vm15, %v4876_v9, 0.0  ;;  %v1383_v63 = vadd.f32 %v1207_v17, %v753_v0  ;;  %v289_v1 = vsub.s32 %v4341_v51, %v4743_v54 }
 0x115   :  { %v1394_v7 = vadd.f32 %v1218_v8, %v764_v28  ;;  %vm454_vm0 = vcmp.eq.s32.totalorder %v278_v6, 0  ;;  %vm908_vm1 = vcmp.eq.s32.totalorder %v278_v6, 1  ;;  %v277_v38 = vsub.s32 %v4338_v50, %v4838_v29 }
 0x116   :  { %2062 = vmatprep.subr.bf16.mxu1 %v1547_v13  ;;  %vm465_vm2 = vcmp.eq.s32.totalorder %v289_v1, 0  ;;  %v732_v5 = vsel %vm454_vm0, %v4746_v36, 0.0  ;;  %vm919_vm3 = vcmp.eq.s32.totalorder %v289_v1, 1  ;;  %v1186_v25 = vsel %vm908_vm1, %v4737_v46, 0.0 }
 0x117   :  { %v1546_v12 = vpack.c.bf16 %v1394_v7, %v1383_v63  ;;  %v743_v3 = vsel %vm465_vm2, %v4746_v36, 0.0  ;;  %v1197_v21 = vsel %vm919_vm3, %v4737_v46, 0.0  ;;  %v1362_v45 = vadd.f32 %v1186_v25, %v732_v5 }
 0x118   :  { %v1373_v56 = vadd.f32 %v1197_v21, %v743_v3  ;;  %v288_v18 = vsub.s32 %v4341_v51, %v4838_v29  ;;  %vm453_vm4 = vcmp.eq.s32.totalorder %v277_v38, 0  ;;  %vm907_vm5 = vcmp.eq.s32.totalorder %v277_v38, 1 }
 0x119   :  { %2063 = vmatpush1.bf16.msra.mxu1 %v1546_v12  ;;  %v731_v6 = vsel %vm453_vm4, %v4870_v23, 0.0  ;;  %v1185_v30 = vsel %vm907_vm5, %v4876_v9, 0.0  ;;  %v232_v0 = vsub.s32 %v4290_v27, %v4727_v55  ;;  %v243_v28 = vsub.s32 %v4361_v60, %v4727_v55 }
 0x11a   :  { %v1536_v17 = vpack.c.bf16 %v1373_v56, %v1362_v45  ;;  %vm464_vm6 = vcmp.eq.s32.totalorder %v288_v18, 0  ;;  %vm918_vm7 = vcmp.eq.s32.totalorder %v288_v18, 1  ;;  %v1361_v13 = vadd.f32 %v1185_v30, %v731_v6 }
 0x11b   :  { %v742_v8 = vsel %vm464_vm6, %v4870_v23, 0.0  ;;  %v1196_v63 = vsel %vm918_vm7, %v4876_v9, 0.0  ;;  %vm408_vm8 = vcmp.eq.s32.totalorder %v232_v0, 0  ;;  %vm419_vm9 = vcmp.eq.s32.totalorder %v243_v28, 0 }
 0x11c   :  { %2064 = vmatprep.subr.bf16.mxu1 %v1536_v17  ;;  %v1372_v1 = vadd.f32 %v1196_v63, %v742_v8  ;;  %v686_v7 = vsel %vm408_vm8, %v4730_v26, 0.0  ;;  %v697_v38 = vsel %vm419_vm9, %v4730_v26, 0.0  ;;  %vm862_vm10 = vcmp.eq.s32.totalorder %v232_v0, 1 }
 0x11d   :  { %vm873_vm11 = vcmp.eq.s32.totalorder %v243_v28, 1  ;;  %v1140_v55 = vsel %vm862_vm10, %v4713_v4, 0.0  ;;  %v231_v5 = vsub.s32 %v4290_v27, %v4733_v10  ;;  %v242_v25 = vsub.s32 %v4361_v60, %v4733_v10 }
 0x11e   :  { %v1535_v12 = vpack.c.bf16 %v1372_v1, %v1361_v13  ;;  %v1151_v3 = vsel %vm873_vm11, %v4713_v4, 0.0  ;;  %v1316_v21 = vadd.f32 %v1140_v55, %v686_v7  ;;  %v256_v45 = vsub.s32 %v4344_v52, %v4743_v54 }
 0x11f   :  { %v1327_v56 = vadd.f32 %v1151_v3, %v697_v38  ;;  %vm407_vm12 = vcmp.eq.s32.totalorder %v231_v5, 0  ;;  %vm418_vm13 = vcmp.eq.s32.totalorder %v242_v25, 0  ;;  %vm861_vm14 = vcmp.eq.s32.totalorder %v231_v5, 1 }
 0x120   :  { %2065 = vmatpush1.bf16.msra.mxu1 %v1535_v12  ;;  %v685_v26 = vsel %vm407_vm12, %v4740_v59, 0.0  ;;  %v696_v18 = vsel %vm418_vm13, %v4740_v59, 0.0  ;;  %vm872_vm15 = vcmp.eq.s32.totalorder %v242_v25, 1  ;;  %v1139_v6 = vsel %vm861_vm14, %v4720_v47, 0.0 }
 0x121   :  { %v1512_v10 = vpack.c.bf16 %v1327_v56, %v1316_v21  ;;  %v1150_v30 = vsel %vm872_vm15, %v4720_v47, 0.0  ;;  %v1315_v4 = vadd.f32 %v1139_v6, %v685_v26  ;;  %v267_v0 = vsub.s32 %v4347_v53, %v4743_v54 }
 0x122   :  { %v1326_v28 = vadd.f32 %v1150_v30, %v696_v18  ;;  %vm432_vm0 = vcmp.eq.s32.totalorder %v256_v45, 0  ;;  %vm886_vm1 = vcmp.eq.s32.totalorder %v256_v45, 1  ;;  %v255_v17 = vsub.s32 %v4344_v52, %v4838_v29 }
 0x123   :  { %1935 = vmatprep.subr.bf16.mxu0 %v1512_v10  ;;  %vm443_vm2 = vcmp.eq.s32.totalorder %v267_v0, 0  ;;  %v710_v59 = vsel %vm432_vm0, %v4746_v36, 0.0  ;;  %vm897_vm3 = vcmp.eq.s32.totalorder %v267_v0, 1  ;;  %v1164_v13 = vsel %vm886_vm1, %v4737_v46, 0.0 }
 0x124   :  { %v1511_v8 = vpack.c.bf16 %v1326_v28, %v1315_v4  ;;  %v721_v47 = vsel %vm443_vm2, %v4746_v36, 0.0  ;;  %v1175_v63 = vsel %vm897_vm3, %v4737_v46, 0.0  ;;  %v1340_v1 = vadd.f32 %v1164_v13, %v710_v59 }
 0x125   :  { %v1351_v7 = vadd.f32 %v1175_v63, %v721_v47  ;;  %v266_v38 = vsub.s32 %v4347_v53, %v4838_v29  ;;  %vm431_vm4 = vcmp.eq.s32.totalorder %v255_v17, 0  ;;  %vm885_vm5 = vcmp.eq.s32.totalorder %v255_v17, 1 }
 0x126   :  { %1936 = vmatpush1.bf16.msra.mxu0 %v1511_v8  ;;  %v709_v55 = vsel %vm431_vm4, %v4870_v23, 0.0  ;;  %v1163_v5 = vsel %vm885_vm5, %v4876_v9, 0.0  ;;  %v234_v25 = vsub.s32 %v4290_v27, %v4743_v54  ;;  %v245_v12 = vsub.s32 %v4361_v60, %v4743_v54  ;;  %v5095_v54 = vld [vmem:[%s6922_s2] sm:$0xff]  }
 0x127   :  { %v1525_v3 = vpack.c.bf16 %v1351_v7, %v1340_v1  ;;  %vm442_vm6 = vcmp.eq.s32.totalorder %v266_v38, 0  ;;  %vm896_vm7 = vcmp.eq.s32.totalorder %v266_v38, 1  ;;  %v1339_v21 = vadd.f32 %v1163_v5, %v709_v55  ;;  %v4211_v55 = vld [vmem:[%s6921_s1] sm:$0xff] }
 0x128   :  { %v720_v45 = vsel %vm442_vm6, %v4870_v23, 0.0  ;;  %v1174_v56 = vsel %vm896_vm7, %v4876_v9, 0.0  ;;  %vm410_vm8 = vcmp.eq.s32.totalorder %v234_v25, 0  ;;  %vm421_vm9 = vcmp.eq.s32.totalorder %v245_v12, 0 }
 0x129   :  { %2066 = vmatprep.subr.bf16.mxu1 %v1525_v3  ;;  %v1350_v26 = vadd.f32 %v1174_v56, %v720_v45  ;;  %v688_v18 = vsel %vm410_vm8, %v4746_v36, 0.0  ;;  %v699_v6 = vsel %vm421_vm9, %v4746_v36, 0.0  ;;  %vm864_vm10 = vcmp.eq.s32.totalorder %v234_v25, 1  ;;  %1954 = vmatmul.mubr.bf16.vlgmr.msra.gmra.mxu0 %v5095_v54 }
 0x12a   :  { %vm875_vm11 = vcmp.eq.s32.totalorder %v245_v12, 1  ;;  %v1142_v10 = vsel %vm864_vm10, %v4737_v46, 0.0  ;;  %v233_v30 = vsub.s32 %v4290_v27, %v4838_v29  ;;  %v244_v4 = vsub.s32 %v4361_v60, %v4838_v29  ;;  %1963 = vmatprep.mubr.bf16.mxu0 %v6927_v22 }
 0x12b   :  { %v1524_v36 = vpack.c.bf16 %v1350_v26, %v1339_v21  ;;  %v1153_v0 = vsel %vm875_vm11, %v4737_v46, 0.0  ;;  %v1318_v28 = vadd.f32 %v1142_v10, %v688_v18  ;;  %v79_v17 = vmul.f32 1.442695, %v4706_v33  ;;  %v4212_v10 = vld [vmem:[%s6921_s1 + $0x10] sm:$0x3f] }
 0x12c   :  { %v1329_v59 = vadd.f32 %v1153_v0, %v699_v6  ;;  %vm409_vm12 = vcmp.eq.s32.totalorder %v233_v30, 0  ;;  %vm420_vm13 = vcmp.eq.s32.totalorder %v244_v4, 0  ;;  %vm863_vm14 = vcmp.eq.s32.totalorder %v233_v30, 1 }
 0x12d   :  { %2067 = vmatpush1.bf16.msra.mxu1 %v1524_v36  ;;  %v687_v13 = vsel %vm409_vm12, %v4870_v23, 0.0  ;;  %v698_v8 = vsel %vm420_vm13, %v4870_v23, 0.0  ;;  %vm874_vm15 = vcmp.eq.s32.totalorder %v244_v4, 1  ;;  %v1141_v29 = vsel %vm863_vm14, %v4876_v9, 0.0  ;;  %v5118_v23 = vld [vmem:[%s6922_s2 + $0x8] sm:$0xff]  }
 0x12e   :  { %v1514_v47 = vpack.c.bf16 %v1329_v59, %v1318_v28  ;;  %v1152_v63 = vsel %vm874_vm15, %v4876_v9, 0.0  ;;  %v1317_v46 = vadd.f32 %v1141_v29, %v687_v13  ;;  %4206 = vpow2.f32 %v79_v17 }
 0x12f   :  { %v1328_v1 = vadd.f32 %v1152_v63, %v698_v8  ;;  %v5111_v7 = vstv %s5086_s22  ;;  %v5134_v26 = vsub.s32 1, %v4290_v27  ;;  %v5137_v18 = vsub.s32 5, %v4290_v27 }
 0x130   :  { %6987 = vst [vmem:[#allocation11_spill] sm:$0xff] %v5111_v7  ;;  %2068 = vmatprep.subr.bf16.mxu1 %v1514_v47  ;;  %v89_v33 = vmul.f32 %v4283_v19, %v5111_v7  ;;  %v5140_v6 = vsub.s32 3, %v4290_v27 }
 0x131   :  { %v1513_v38 = vpack.c.bf16 %v1328_v1, %v1317_v46  ;;  %1964 = vmatmul.mubr.bf16.gmra.mxu0 %v5118_v23  ;;  %6989 = vst [vmem:[#allocation13_spill] sm:$0xff] %v5134_v26  ;;  %6990 = vst [vmem:[#allocation14_spill] sm:$0xff] %v5137_v18 }
 0x132   :  { %1973 = vmatprep.mubr.bf16.mxu0 %v6927_v22  ;;  %v95_v9 = vrot.slane %v89_v33, 7  ;;  %6991 = vst [vmem:[#allocation15_spill] sm:$0xff] %v5140_v6 }
 0x133   :  { %2069 = vmatpush1.bf16.msra.mxu1 %v1513_v38 }
 0x134   :  { %v101_v5 = vadd.f32 %v4211_v55, %v95_v9 }
 0x136   :  { %2087 = vmatmul.mubr.bf16.vlgmr.msra.gmra.mxu1 %v5095_v54  ;;  %v2433_v19 = vadd.f32 1.0, %v101_v5 }
 0x137   :  { %2096 = vmatprep.mubr.bf16.mxu1 %v6927_v22 }
 0x138   :  { %v2436_v25 = vmul.f32 17.5, %v2433_v19 }
 0x139   :  { %1974 = vmatmul.mubr.bf16.gmra.mxu0 %v4770_v24  ;;  %v5143_v24 = vsub.s32 7, %v4290_v27 }
 0x13a   :  { %1983 = vmatprep.mubr.bf16.mxu0 %v6927_v22  ;;  %v2439_v12 = vfloor.f32 %v2436_v25 }
 0x13b   :  { %v5129_v3 = vpop.eup %4206  ;;  %6992 = vst [vmem:[#allocation16_spill] sm:$0xff] %v5143_v24 }
 0x13c   :  { %6988 = vst [vmem:[#allocation12_spill] sm:$0xff] %v5129_v3  ;;  %v84_v21 = vmul.f32 %v5129_v3, %v4280_v16  ;;  %v2442_v45 = vsub.f32 %v2436_v25, %v2439_v12  ;;  %v4181_v56 = vtrunc.f32 %v2439_v12 }
 0x13e   :  { %v87_v30 = vadd.f32 %v4212_v10, %v84_v21  ;;  %2097 = vmatmul.mubr.bf16.gmra.mxu1 %v5118_v23  ;;  %v5149_v16 = vsub.f32 1.0, %v2442_v45  ;;  %v5151_v4 = vcvt.f32.s32 %v4181_v56  ;;  %v2867_v36 = vrot.slane %v2442_v45, %v5134_v26 }
 0x13f   :  { %2106 = vmatprep.mubr.bf16.mxu1 %v6927_v22  ;;  %v2875_v0 = vrot.slane %v2442_v45, %v5137_v18  ;;  %v2871_v28 = vrot.slane %v2442_v45, %v5140_v6  ;;  %v2879_v17 = vrot.slane %v2442_v45, %v5143_v24 }
 0x140   :  { %v106_v59 = vadd.f32 1.0, %v87_v30  ;;  %v2454_v13 = vrot.slane %v5151_v4, %v5134_v26  ;;  %v2655_v8 = vrot.slane %v5149_v16, %v5134_v26  ;;  %v5163_v29 = vrot.slane %v2867_v36, %v5134_v26 }
 0x141   :  { %1984 = vmatmul.mubr.bf16.gmra.mxu0 %v4791_v61  ;;  %v2462_v47 = vrot.slane %v5151_v4, %v5137_v18  ;;  %v2663_v63 = vrot.slane %v5149_v16, %v5137_v18  ;;  %v5171_v46 = vrot.slane %v2875_v0, %v5134_v26  ;;  %v2458_v1 = vrot.slane %v5151_v4, %v5140_v6 }
 0x142   :  { %6993 = vst [vmem:[#allocation17_spill] sm:$0xff] %v5163_v29  ;;  %v109_v33 = vmul.f32 17.5, %v106_v59  ;;  %1993 = vmatprep.mubr.bf16.mxu0 %v6927_v22  ;;  %v5177_v38 = vrot.slane %v2454_v13, %v5134_v26  ;;  %v5180_v61 = vrot.slane %v2655_v8, %v5134_v26  ;;  %v2659_v9 = vrot.slane %v5149_v16, %v5140_v6  ;;  %v5217_v13 = vld [vmem:[%s6922_s2 + $0x10] sm:$0xff]  }
 0x143   :  { %6994 = vst [vmem:[#allocation18_spill] sm:$0xff] %v5171_v46  ;;  %v5185_v55 = vrot.slane %v2462_v47, %v5134_v26  ;;  %v5188_v5 = vrot.slane %v2663_v63, %v5134_v26  ;;  %v5191_v19 = vrot.slane %v2458_v1, %v5134_v26  ;;  %v5194_v25 = vrot.slane %v2871_v28, %v5134_v26 }
 0x144   :  { %v112_v12 = vfloor.f32 %v109_v33  ;;  %v2539_v21 = vsub.s32 %v4290_v27, %v5177_v38  ;;  %v5199_v45 = vrot.slane %v2659_v9, %v5134_v26  ;;  %v5212_v0 = vrot.slane %v2879_v17, %v5134_v26  ;;  %6997 = vst [vmem:[#allocation21_spill] sm:$0xff] %v5217_v13 }
 0x145   :  { %6995 = vst [vmem:[#allocation19_spill] sm:$0xff] %v5188_v5  ;;  %v2541_v10 = vsub.s32 %v4290_v27, %v5185_v55  ;;  %v5207_v30 = vsub.s32 %v4290_v27, %v5191_v19 }
 0x146   :  { %6996 = vst [vmem:[#allocation20_spill] sm:$0xff] %v5212_v0  ;;  %v115_v28 = vsub.f32 %v109_v33, %v112_v12  ;;  %v4179_v59 = vtrunc.f32 %v112_v12  ;;  %2107 = vmatmul.mubr.bf16.gmra.mxu1 %v5217_v13  ;;  %vm2594_vm0 = vcmp.eq.s32.totalorder %v2539_v21, 0  ;;  %vm2806_vm1 = vcmp.eq.s32.totalorder %v2539_v21, 1 }
 0x147   :  { %2116 = vmatprep.mubr.bf16.mxu1 %v6927_v22  ;;  %v2751_v8 = vsel %vm2594_vm0, %v5180_v61, 0.0  ;;  %v2963_v47 = vsel %vm2806_vm1, %v5163_v29, 0.0  ;;  %vm2596_vm2 = vcmp.eq.s32.totalorder %v2541_v10, 0  ;;  %vm2808_vm3 = vcmp.eq.s32.totalorder %v2541_v10, 1 }
 0x148   :  { %v118_v17 = vsub.f32 1.0, %v115_v28  ;;  %v4180_v63 = vcvt.f32.s32 %v4179_v59  ;;  %v1075_v1 = vrot.slane %v115_v28, %v4303_v35  ;;  %v1071_v33 = vrot.slane %v115_v28, %v4300_v34 }
 0x149   :  { %1994 = vmatmul.mubr.bf16.gmra.mxu0 %v4818_v58  ;;  %v1079_v9 = vrot.slane %v115_v28, %v4309_v37  ;;  %v5227_v12 = vadd.f32 %v2963_v47, %v2751_v8  ;;  %v2753_v21 = vsel %vm2596_vm2, %v5188_v5, 0.0  ;;  %v2965_v20 = vsel %vm2808_vm3, %v5171_v46, 0.0 }
 0x14a   :  { %v178_v36 = vrot.slane %v4180_v63, %v4303_v35  ;;  %v621_v10 = vrot.slane %v118_v17, %v4303_v35  ;;  %v5234_v59 = vrot.slane %v1075_v1, %v4300_v34  ;;  %v174_v56 = vrot.slane %v4180_v63, %v4300_v34  ;;  %2003 = vmatprep.mubr.bf16.mxu0 %v6927_v22 }
 0x14b   :  { %v617_v58 = vrot.slane %v118_v17, %v4300_v34  ;;  %v5240_v28 = vrot.slane %v1071_v33, %v4300_v34  ;;  %v182_v8 = vrot.slane %v4180_v63, %v4309_v37  ;;  %v625_v47 = vrot.slane %v118_v17, %v4309_v37 }
 0x14c   :  { %v5245_v6 = vrot.slane %v178_v36, %v4300_v34  ;;  %v5248_v35 = vrot.slane %v621_v10, %v4300_v34  ;;  %v5251_v1 = vrot.slane %v174_v56, %v4300_v34  ;;  %v5254_v22 = vrot.slane %v1079_v9, %v4300_v34  ;;  %v5278_v10 = vld [vmem:[%s6922_s2 + $0x18] sm:$0xff]  }
 0x14d   :  { %v5257_v18 = vrot.slane %v617_v58, %v4300_v34  ;;  %v5260_v33 = vrot.slane %v182_v8, %v4300_v34  ;;  %v5263_v37 = vrot.slane %v625_v47, %v4300_v34  ;;  %v5265_v36 = vadd.f32 %v2965_v20, %v2753_v21  ;;  %6998 = vst [vmem:[#allocation22_spill] sm:$0xff] %v5278_v10 }
 0x14e   :  { %v390_v17 = vsub.s32 %v4293_v31, %v5245_v6  ;;  %v401_v56 = vsub.s32 %v4296_v32, %v5245_v6  ;;  %v389_v63 = vsub.s32 %v4293_v31, %v5251_v1  ;;  %v400_v9 = vsub.s32 %v4296_v32, %v5251_v1  ;;  %2117 = vmatmul.mubr.bf16.gmra.mxu1 %v5278_v10 }
 0x14f   :  { %v368_v20 = vsub.s32 %v4312_v39, %v5245_v6  ;;  %v379_v34 = vsub.s32 %v4315_v40, %v5245_v6  ;;  %v367_v21 = vsub.s32 %v4312_v39, %v5251_v1  ;;  %v378_v58 = vsub.s32 %v4315_v40, %v5251_v1 }
 0x150   :  { %v6999_v8 = vmov 0   ;;  %vm566_vm4 = vcmp.eq.s32.totalorder %v390_v17, 0  ;;  %vm577_vm5 = vcmp.eq.s32.totalorder %v401_v56, 0  ;;  %vm1020_vm6 = vcmp.eq.s32.totalorder %v390_v17, 1 }
 0x151   :  { %2126 = vmatprep.mubr.bf16.mxu1 %v6999_v8  ;;  %vm1031_vm7 = vcmp.eq.s32.totalorder %v401_v56, 1  ;;  %v844_v47 = vsel %vm566_vm4, %v5248_v35, 0.0  ;;  %v855_v3 = vsel %vm577_vm5, %v5248_v35, 0.0  ;;  %v1298_v2 = vsel %vm1020_vm6, %v5234_v59, 0.0  ;;  %2004 = vmatmul.mubr.bf16.gmra.mxu0 %v4854_v14 }
 0x152   :  { %v1309_v7 = vsel %vm1031_vm7, %v5234_v59, 0.0  ;;  %v1474_v10 = vadd.f32 %v1298_v2, %v844_v47  ;;  %vm565_vm8 = vcmp.eq.s32.totalorder %v389_v63, 0  ;;  %vm576_vm9 = vcmp.eq.s32.totalorder %v400_v9, 0  ;;  %2013 = vmatprep.mubr.bf16.mxu0 %v6999_v8 }
 0x153   :  { %v1485_v13 = vadd.f32 %v1309_v7, %v855_v3  ;;  %v843_v46 = vsel %vm565_vm8, %v5257_v18, 0.0  ;;  %v854_v17 = vsel %vm576_vm9, %v5257_v18, 0.0  ;;  %vm1019_vm10 = vcmp.eq.s32.totalorder %v389_v63, 1  ;;  %v5305_v3 = vld [vmem:[%s6922_s2 + $0x20] sm:$0xff]  }
 0x154   :  { %vm1030_vm11 = vcmp.eq.s32.totalorder %v400_v9, 1  ;;  %v1297_v5 = vsel %vm1019_vm10, %v5240_v28, 0.0  ;;  %vm544_vm12 = vcmp.eq.s32.totalorder %v368_v20, 0  ;;  %vm555_vm13 = vcmp.eq.s32.totalorder %v379_v34, 0 }
 0x155   :  { %v1593_v56 = vpack.c.bf16 %v1485_v13, %v1474_v10  ;;  %v1308_v29 = vsel %vm1030_vm11, %v5240_v28, 0.0  ;;  %v1473_v0 = vadd.f32 %v1297_v5, %v843_v46  ;;  %v822_v2 = vsel %vm544_vm12, %v5248_v35, 0.0 }
 0x156   :  { %v1484_v14 = vadd.f32 %v1308_v29, %v854_v17  ;;  %v833_v7 = vsel %vm555_vm13, %v5248_v35, 0.0  ;;  %vm998_vm14 = vcmp.eq.s32.totalorder %v368_v20, 1  ;;  %vm1009_vm15 = vcmp.eq.s32.totalorder %v379_v34, 1  ;;  %2127 = vmatmul.mubr.bf16.gmra.mxu1 %v5305_v3 }
 0x157   :  { %2187 = vmatprep.subr.bf16.mxu0 %v1593_v56  ;;  %vm543_vm0 = vcmp.eq.s32.totalorder %v367_v21, 0  ;;  %v1276_v46 = vsel %vm998_vm14, %v5234_v59, 0.0  ;;  %v1287_v29 = vsel %vm1009_vm15, %v5234_v59, 0.0  ;;  %vm554_vm1 = vcmp.eq.s32.totalorder %v378_v58, 0  ;;  %2136 = vmatprep.mubr.bf16.mxu1 %v6999_v8 }
 0x158   :  { %v1592_v13 = vpack.c.bf16 %v1484_v14, %v1473_v0  ;;  %v1452_v5 = vadd.f32 %v1276_v46, %v822_v2  ;;  %v1463_v63 = vadd.f32 %v1287_v29, %v833_v7  ;;  %v821_v9 = vsel %vm543_vm0, %v5257_v18, 0.0 }
 0x159   :  { %v832_v10 = vsel %vm554_vm1, %v5257_v18, 0.0  ;;  %vm997_vm2 = vcmp.eq.s32.totalorder %v367_v21, 1  ;;  %vm1008_vm3 = vcmp.eq.s32.totalorder %v378_v58, 1  ;;  %v346_v20 = vsub.s32 %v4318_v41, %v5245_v6  ;;  %2014 = vmatmul.mubr.bf16.gmra.mxu0 %v4901_v62 }
 0x15a   :  { %2188 = vmatpush1.bf16.msra.mxu0 %v1592_v13  ;;  %v357_v0 = vsub.s32 %v4321_v42, %v5245_v6  ;;  %v1582_v34 = vpack.c.bf16 %v1463_v63, %v1452_v5  ;;  %v1275_v47 = vsel %vm997_vm2, %v5240_v28, 0.0  ;;  %v1286_v17 = vsel %vm1008_vm3, %v5240_v28, 0.0  ;;  %2023 = vmatprep.mubr.bf16.mxu0 %v6999_v8  ;;  %v5332_v63 = vld [vmem:[%s6922_s2 + $0x28] sm:$0xff]  }
 0x15b   :  { %v345_v56 = vsub.s32 %v4318_v41, %v5251_v1  ;;  %v1451_v14 = vadd.f32 %v1275_v47, %v821_v9  ;;  %v1462_v2 = vadd.f32 %v1286_v17, %v832_v10  ;;  %vm522_vm4 = vcmp.eq.s32.totalorder %v346_v20, 0 }
 0x15c   :  { %vm533_vm5 = vcmp.eq.s32.totalorder %v357_v0, 0  ;;  %2189 = vmatprep.subr.bf16.mxu0 %v1582_v34  ;;  %v800_v21 = vsel %vm522_vm4, %v5248_v35, 0.0  ;;  %vm976_vm6 = vcmp.eq.s32.totalorder %v346_v20, 1  ;;  %vm987_vm7 = vcmp.eq.s32.totalorder %v357_v0, 1 }
 0x15d   :  { %v811_v58 = vsel %vm533_vm5, %v5248_v35, 0.0  ;;  %v1581_v7 = vpack.c.bf16 %v1462_v2, %v1451_v14  ;;  %v1254_v13 = vsel %vm976_vm6, %v5234_v59, 0.0  ;;  %v1265_v46 = vsel %vm987_vm7, %v5234_v59, 0.0 }
 0x15e   :  { %v356_v62 = vsub.s32 %v4321_v42, %v5251_v1  ;;  %v1430_v29 = vadd.f32 %v1254_v13, %v800_v21  ;;  %v1441_v5 = vadd.f32 %v1265_v46, %v811_v58  ;;  %vm521_vm8 = vcmp.eq.s32.totalorder %v345_v56, 0  ;;  %2137 = vmatmul.mubr.bf16.gmra.mxu1 %v5332_v63 }
 0x15f   :  { %vm975_vm9 = vcmp.eq.s32.totalorder %v345_v56, 1  ;;  %2190 = vmatpush1.bf16.msra.mxu0 %v1581_v7  ;;  %v799_v9 = vsel %vm521_vm8, %v5257_v18, 0.0  ;;  %2146 = vmatprep.mubr.bf16.mxu1 %v6999_v8  ;;  %v324_v56 = vsub.s32 %v4324_v43, %v5245_v6  ;;  %v335_v14 = vsub.s32 %v4327_v44, %v5245_v6 }
 0x160   :  { %vm532_vm10 = vcmp.eq.s32.totalorder %v356_v62, 0  ;;  %vm986_vm11 = vcmp.eq.s32.totalorder %v356_v62, 1  ;;  %v1253_v10 = vsel %vm975_vm9, %v5240_v28, 0.0  ;;  %v1571_v20 = vpack.c.bf16 %v1441_v5, %v1430_v29 }
 0x161   :  { %v810_v0 = vsel %vm532_vm10, %v5257_v18, 0.0  ;;  %v1264_v34 = vsel %vm986_vm11, %v5240_v28, 0.0  ;;  %v1429_v47 = vadd.f32 %v1253_v10, %v799_v9  ;;  %v323_v2 = vsub.s32 %v4324_v43, %v5251_v1  ;;  %2024 = vmatmul.mubr.bf16.gmra.mxu0 %v4924_v57 }
 0x162   :  { %v1440_v17 = vadd.f32 %v1264_v34, %v810_v0  ;;  %2191 = vmatprep.subr.bf16.mxu0 %v1571_v20  ;;  %v334_v21 = vsub.s32 %v4327_v44, %v5251_v1  ;;  %v391_v58 = vsub.s32 %v4293_v31, %v5260_v33  ;;  %v402_v7 = vsub.s32 %v4296_v32, %v5260_v33  ;;  %v5365_v20 = vld [vmem:[%s6922_s2 + $0x30] sm:$0xff]  }
 0x163   :  { %v302_v13 = vsub.s32 %v4332_v48, %v5245_v6  ;;  %vm500_vm12 = vcmp.eq.s32.totalorder %v324_v56, 0  ;;  %vm511_vm13 = vcmp.eq.s32.totalorder %v335_v14, 0  ;;  %vm954_vm14 = vcmp.eq.s32.totalorder %v324_v56, 1  ;;  %2033 = vmatprep.mubr.bf16.mxu0 %v6999_v8 }
 0x164   :  { %v1570_v46 = vpack.c.bf16 %v1440_v17, %v1429_v47  ;;  %v778_v62 = vsel %vm500_vm12, %v5248_v35, 0.0  ;;  %v789_v29 = vsel %vm511_vm13, %v5248_v35, 0.0  ;;  %vm965_vm15 = vcmp.eq.s32.totalorder %v335_v14, 1 }
 0x165   :  { %v1232_v5 = vsel %vm954_vm14, %v5234_v59, 0.0  ;;  %v1243_v31 = vsel %vm965_vm15, %v5234_v59, 0.0  ;;  %vm499_vm0 = vcmp.eq.s32.totalorder %v323_v2, 0  ;;  %vm510_vm1 = vcmp.eq.s32.totalorder %v334_v21, 0 }
 0x166   :  { %2192 = vmatpush1.bf16.msra.mxu0 %v1570_v46  ;;  %v1408_v32 = vadd.f32 %v1232_v5, %v778_v62  ;;  %v1419_v9 = vadd.f32 %v1243_v31, %v789_v29  ;;  %v777_v10 = vsel %vm499_vm0, %v5257_v18, 0.0  ;;  %v788_v57 = vsel %vm510_vm1, %v5257_v18, 0.0  ;;  %2147 = vmatmul.mubr.bf16.gmra.mxu1 %v5365_v20 }
 0x167   :  { %vm953_vm2 = vcmp.eq.s32.totalorder %v323_v2, 1  ;;  %vm964_vm3 = vcmp.eq.s32.totalorder %v334_v21, 1  ;;  %vm567_vm4 = vcmp.eq.s32.totalorder %v391_v58, 0  ;;  %vm578_vm5 = vcmp.eq.s32.totalorder %v402_v7, 0  ;;  %2156 = vmatprep.mubr.bf16.mxu1 %v6999_v8 }
 0x168   :  { %v1231_v0 = vsel %vm953_vm2, %v5240_v28, 0.0  ;;  %v1560_v34 = vpack.c.bf16 %v1419_v9, %v1408_v32  ;;  %v1242_v47 = vsel %vm964_vm3, %v5240_v28, 0.0  ;;  %v845_v56 = vsel %vm567_vm4, %v5263_v37, 0.0 }
 0x169   :  { %v1407_v17 = vadd.f32 %v1231_v0, %v777_v10  ;;  %v1418_v14 = vadd.f32 %v1242_v47, %v788_v57  ;;  %v856_v2 = vsel %vm578_vm5, %v5263_v37, 0.0  ;;  %vm1021_vm6 = vcmp.eq.s32.totalorder %v391_v58, 1  ;;  %2034 = vmatmul.mubr.bf16.gmra.mxu0 %v4958_v15 }
 0x16a   :  { %vm1032_vm7 = vcmp.eq.s32.totalorder %v402_v7, 1  ;;  %2193 = vmatprep.subr.bf16.mxu0 %v1560_v34  ;;  %v1299_v21 = vsel %vm1021_vm6, %v5254_v22, 0.0  ;;  %v313_v62 = vsub.s32 %v4335_v49, %v5245_v6  ;;  %vm478_vm8 = vcmp.eq.s32.totalorder %v302_v13, 0  ;;  %2043 = vmatprep.mubr.bf16.mxu0 %v6999_v8 }
 0x16b   :  { %v1310_v46 = vsel %vm1032_vm7, %v5254_v22, 0.0  ;;  %v1559_v29 = vpack.c.bf16 %v1418_v14, %v1407_v17  ;;  %v1475_v5 = vadd.f32 %v1299_v21, %v845_v56  ;;  %v756_v32 = vsel %vm478_vm8, %v5248_v35, 0.0 }
 0x16c   :  { %v1486_v31 = vadd.f32 %v1310_v46, %v856_v2  ;;  %vm489_vm9 = vcmp.eq.s32.totalorder %v313_v62, 0  ;;  %vm932_vm10 = vcmp.eq.s32.totalorder %v302_v13, 1  ;;  %vm943_vm11 = vcmp.eq.s32.totalorder %v313_v62, 1  ;;  %v5390_v13 = vld [vmem:[%s6922_s2 + $0x38] sm:$0xff]  }
 0x16d   :  { %v301_v58 = vsub.s32 %v4332_v48, %v5251_v1  ;;  %2194 = vmatpush1.bf16.msra.mxu0 %v1559_v29  ;;  %v767_v9 = vsel %vm489_vm9, %v5248_v35, 0.0  ;;  %v1210_v10 = vsel %vm932_vm10, %v5234_v59, 0.0  ;;  %v1221_v57 = vsel %vm943_vm11, %v5234_v59, 0.0  ;;  %7000 = vst [vmem:[#allocation23_spill] sm:$0xff] %v5390_v13 }
 0x16e   :  { %v1594_v7 = vpack.c.bf16 %v1486_v31, %v1475_v5  ;;  %v1386_v0 = vadd.f32 %v1210_v10, %v756_v32  ;;  %v1397_v34 = vadd.f32 %v1221_v57, %v767_v9  ;;  %v312_v15 = vsub.s32 %v4335_v49, %v5251_v1  ;;  %2157 = vmatmul.mubr.bf16.gmra.mxu1 %v5390_v13 }
 0x16f   :  { %vm477_vm12 = vcmp.eq.s32.totalorder %v301_v58, 0  ;;  %vm931_vm13 = vcmp.eq.s32.totalorder %v301_v58, 1  ;;  %v369_v17 = vsub.s32 %v4312_v39, %v5260_v33  ;;  %v380_v56 = vsub.s32 %v4315_v40, %v5260_v33  ;;  %2166 = vmatprep.mubr.bf16.mxu1 %v6999_v8 }
 0x170   :  { %4139 = vmatprep.subr.bf16.mxu1 %v1594_v7  ;;  %v755_v47 = vsel %vm477_vm12, %v5257_v18, 0.0  ;;  %v1549_v14 = vpack.c.bf16 %v1397_v34, %v1386_v0  ;;  %vm488_vm14 = vcmp.eq.s32.totalorder %v312_v15, 0  ;;  %vm942_vm15 = vcmp.eq.s32.totalorder %v312_v15, 1  ;;  %v5419_v34 = vld [vmem:[%s6922_s2 + $0x40] sm:$0xff]  }
 0x171   :  { %4140 = vmatpush3.bf16.msra.mxu1 %v1594_v7  ;;  %v1209_v2 = vsel %vm931_vm13, %v5240_v28, 0.0  ;;  %v766_v21 = vsel %vm488_vm14, %v5257_v18, 0.0  ;;  %v1220_v46 = vsel %vm942_vm15, %v5240_v28, 0.0  ;;  %vm545_vm0 = vcmp.eq.s32.totalorder %v369_v17, 0  ;;  %2044 = vmatmul.mubr.bf16.gmra.mxu0 %v4981_v11  ;;  %7001 = vst [vmem:[#allocation24_spill] sm:$0xff] %v5419_v34 }
 0x172   :  { %v1385_v62 = vadd.f32 %v1209_v2, %v755_v47  ;;  %2195 = vmatprep.subr.bf16.mxu0 %v1549_v14  ;;  %v1396_v29 = vadd.f32 %v1220_v46, %v766_v21  ;;  %vm556_vm1 = vcmp.eq.s32.totalorder %v380_v56, 0  ;;  %v823_v39 = vsel %vm545_vm0, %v5263_v37, 0.0  ;;  %2219 = vmatprep.mubr.bf16.mxu0 %v6999_v8 }
 0x173   :  { %vm999_vm2 = vcmp.eq.s32.totalorder %v369_v17, 1  ;;  %v834_v40 = vsel %vm556_vm1, %v5263_v37, 0.0  ;;  %vm1010_vm3 = vcmp.eq.s32.totalorder %v380_v56, 1  ;;  %v280_v31 = vsub.s32 %v4338_v50, %v5245_v6 }
 0x174   :  { %v1277_v5 = vsel %vm999_vm2, %v5254_v22, 0.0  ;;  %v1548_v32 = vpack.c.bf16 %v1396_v29, %v1385_v62  ;;  %v1288_v58 = vsel %vm1010_vm3, %v5254_v22, 0.0  ;;  %v291_v9 = vsub.s32 %v4341_v51, %v5245_v6 }
 0x175   :  { %v1453_v7 = vadd.f32 %v1277_v5, %v823_v39  ;;  %v1464_v10 = vadd.f32 %v1288_v58, %v834_v40  ;;  %vm456_vm4 = vcmp.eq.s32.totalorder %v280_v31, 0  ;;  %vm910_vm5 = vcmp.eq.s32.totalorder %v280_v31, 1 }
 0x176   :  { %v279_v57 = vsub.s32 %v4338_v50, %v5251_v1  ;;  %2196 = vmatpush1.bf16.msra.mxu0 %v1548_v32  ;;  %vm467_vm6 = vcmp.eq.s32.totalorder %v291_v9, 0  ;;  %v734_v0 = vsel %vm456_vm4, %v5248_v35, 0.0  ;;  %vm921_vm7 = vcmp.eq.s32.totalorder %v291_v9, 1  ;;  %2167 = vmatmul.mubr.bf16.gmra.mxu1 %v5419_v34 }
 0x177   :  { %v1188_v11 = vsel %vm910_vm5, %v5234_v59, 0.0  ;;  %v1583_v15 = vpack.c.bf16 %v1464_v10, %v1453_v7  ;;  %v745_v47 = vsel %vm467_vm6, %v5248_v35, 0.0  ;;  %v1199_v17 = vsel %vm921_vm7, %v5234_v59, 0.0  ;;  %2176 = vmatprep.mubr.bf16.mxu1 %v6999_v8 }
 0x178   :  { %v1364_v56 = vadd.f32 %v1188_v11, %v734_v0  ;;  %v1375_v14 = vadd.f32 %v1199_v17, %v745_v47  ;;  %v290_v2 = vsub.s32 %v4341_v51, %v5251_v1  ;;  %vm455_vm8 = vcmp.eq.s32.totalorder %v279_v57, 0  ;;  %v5452_v17 = vld [vmem:[%s6922_s2 + $0x48] sm:$0xff]  }
 0x179   :  { %vm909_vm9 = vcmp.eq.s32.totalorder %v279_v57, 1  ;;  %4141 = vmatprep.subr.bf16.mxu1 %v1583_v15  ;;  %v733_v21 = vsel %vm455_vm8, %v5257_v18, 0.0  ;;  %v347_v62 = vsub.s32 %v4318_v41, %v5260_v33  ;;  %v358_v29 = vsub.s32 %v4321_v42, %v5260_v33  ;;  %7002 = vst [vmem:[#allocation25_spill] sm:$0xff] %v5452_v17 }
 0x17a   :  { %v1187_v46 = vsel %vm909_vm9, %v5240_v28, 0.0  ;;  %4142 = vmatpush3.bf16.msra.mxu1 %v1583_v15  ;;  %v1538_v39 = vpack.c.bf16 %v1375_v14, %v1364_v56  ;;  %vm466_vm10 = vcmp.eq.s32.totalorder %v290_v2, 0  ;;  %vm920_vm11 = vcmp.eq.s32.totalorder %v290_v2, 1 }
 0x17b   :  { %v1363_v40 = vadd.f32 %v1187_v46, %v733_v21  ;;  %v744_v5 = vsel %vm466_vm10, %v5257_v18, 0.0  ;;  %v1198_v31 = vsel %vm920_vm11, %v5240_v28, 0.0  ;;  %vm523_vm12 = vcmp.eq.s32.totalorder %v347_v62, 0  ;;  %v5435_v32 = vpop.f32.mrf.mxu0 }
 0x17c   :  { %vm534_vm13 = vcmp.eq.s32.totalorder %v358_v29, 0  ;;  %2197 = vmatprep.subr.bf16.mxu0 %v1538_v39  ;;  %v1374_v58 = vadd.f32 %v1198_v31, %v744_v5  ;;  %v801_v41 = vsel %vm523_vm12, %v5263_v37, 0.0  ;;  %vm977_vm14 = vcmp.eq.s32.totalorder %v347_v62, 1 }
 0x17d   :  { %v812_v7 = vsel %vm534_vm13, %v5263_v37, 0.0  ;;  %vm988_vm15 = vcmp.eq.s32.totalorder %v358_v29, 1  ;;  %v1255_v42 = vsel %vm977_vm14, %v5254_v22, 0.0  ;;  %v258_v9 = vsub.s32 %v4344_v52, %v5245_v6  ;;  %v5444_v57 = vpop.f32.mrf.mxu0 }
 0x17e   :  { %v269_v10 = vsub.s32 %v4347_v53, %v5245_v6  ;;  %v1537_v0 = vpack.c.bf16 %v1374_v58, %v1363_v40  ;;  %v1266_v11 = vsel %vm988_vm15, %v5254_v22, 0.0  ;;  %v1431_v15 = vadd.f32 %v1255_v42, %v801_v41  ;;  %2177 = vmatmul.mubr.bf16.gmra.mxu1 %v5452_v17  ;;  %v5455_v56 = vpop.f32.mrf.mxu1 }
 0x17f   :  { %v257_v47 = vsub.s32 %v4344_v52, %v5251_v1  ;;  %v1442_v14 = vadd.f32 %v1266_v11, %v812_v7  ;;  %vm434_vm0 = vcmp.eq.s32.totalorder %v258_v9, 0  ;;  %vm888_vm2 = vcmp.eq.s32.totalorder %v258_v9, 1  ;;  %4155 = vmatprep.mubr.bf16.mxu1 %v5095_v54  ;;  %v5458_v2 = vpop.f32.mrf.mxu0 }
 0x180   :  { %vm445_vm1 = vcmp.eq.s32.totalorder %v269_v10, 0  ;;  %2198 = vmatpush1.bf16.msra.mxu0 %v1537_v0  ;;  %v712_v21 = vsel %vm434_vm0, %v5248_v35, 0.0  ;;  %vm899_vm3 = vcmp.eq.s32.totalorder %v269_v10, 1  ;;  %v1166_v62 = vsel %vm888_vm2, %v5234_v59, 0.0  ;;  %v5463_v29 = vpop.f32.mrf.mxu1 }
 0x181   :  { %v723_v46 = vsel %vm445_vm1, %v5248_v35, 0.0  ;;  %v1572_v39 = vpack.c.bf16 %v1442_v14, %v1431_v15  ;;  %v1177_v40 = vsel %vm899_vm3, %v5234_v59, 0.0  ;;  %v1342_v5 = vadd.f32 %v1166_v62, %v712_v21  ;;  %v5468_v58 = vpop.f32.mrf.mxu0 }
 0x182   :  { %v268_v31 = vsub.s32 %v4347_v53, %v5251_v1  ;;  %v1353_v41 = vadd.f32 %v1177_v40, %v723_v46  ;;  %vm433_vm4 = vcmp.eq.s32.totalorder %v257_v47, 0  ;;  %vm887_vm5 = vcmp.eq.s32.totalorder %v257_v47, 1  ;;  %v5472_v42 = vpop.f32.mrf.mxu1 }
 0x183   :  { %v325_v7 = vsub.s32 %v4324_v43, %v5260_v33  ;;  %4143 = vmatprep.subr.bf16.mxu1 %v1572_v39  ;;  %v711_v9 = vsel %vm433_vm4, %v5257_v18, 0.0  ;;  %v1165_v10 = vsel %vm887_vm5, %v5240_v28, 0.0  ;;  %v5476_v0 = vpop.f32.mrf.mxu0  ;;  %v336_v46 = vsub.s32 %v4327_v44, %v5260_v33 }
 0x184   :  { %vm444_vm6 = vcmp.eq.s32.totalorder %v268_v31, 0  ;;  %vm898_vm7 = vcmp.eq.s32.totalorder %v268_v31, 1  ;;  %4144 = vmatpush3.bf16.msra.mxu1 %v1572_v39  ;;  %v1527_v11 = vpack.c.bf16 %v1353_v41, %v1342_v5  ;;  %v1341_v14 = vadd.f32 %v1165_v10, %v711_v9  ;;  %v5480_v21 = vpop.f32.mrf.mxu1 }
 0x185   :  { %v722_v15 = vsel %vm444_vm6, %v5257_v18, 0.0  ;;  %v1176_v47 = vsel %vm898_vm7, %v5240_v28, 0.0  ;;  %vm501_vm8 = vcmp.eq.s32.totalorder %v325_v7, 0  ;;  %vm955_vm9 = vcmp.eq.s32.totalorder %v325_v7, 1  ;;  %v5484_v62 = vpop.f32.mrf.mxu0 }
 0x186   :  { %v1352_v43 = vadd.f32 %v1176_v47, %v722_v15  ;;  %2199 = vmatprep.subr.bf16.mxu0 %v1527_v11  ;;  %v779_v40 = vsel %vm501_vm8, %v5263_v37, 0.0  ;;  %v1233_v39 = vsel %vm955_vm9, %v5254_v22, 0.0  ;;  %v236_v5 = vsub.s32 %v4290_v27, %v5245_v6  ;;  %v5492_v41 = vpop.f32.mrf.mxu1 }
 0x187   :  { %v247_v31 = vsub.s32 %v4361_v60, %v5245_v6  ;;  %vm512_vm10 = vcmp.eq.s32.totalorder %v336_v46, 0  ;;  %vm966_vm11 = vcmp.eq.s32.totalorder %v336_v46, 1  ;;  %v1409_v44 = vadd.f32 %v1233_v39, %v779_v40  ;;  %v5494_v7 = vpop.f32.mrf.mxu0 }
 0x188   :  { %v1526_v9 = vpack.c.bf16 %v1352_v43, %v1341_v14  ;;  %v790_v10 = vsel %vm512_vm10, %v5263_v37, 0.0  ;;  %v1244_v11 = vsel %vm966_vm11, %v5254_v22, 0.0  ;;  %vm412_vm12 = vcmp.eq.s32.totalorder %v236_v5, 0  ;;  %v5498_v15 = vpop.f32.mrf.mxu1 }
 0x189   :  { %vm423_vm13 = vcmp.eq.s32.totalorder %v247_v31, 0  ;;  %v1420_v47 = vadd.f32 %v1244_v11, %v790_v10  ;;  %v690_v6 = vsel %vm412_vm12, %v5248_v35, 0.0  ;;  %vm866_vm14 = vcmp.eq.s32.totalorder %v236_v5, 1  ;;  %v5502_v14 = vpop.f32.mrf.mxu0 }
 0x18a   :  { %2200 = vmatpush1.bf16.msra.mxu0 %v1526_v9  ;;  %v701_v17 = vsel %vm423_vm13, %v5248_v35, 0.0  ;;  %vm877_vm15 = vcmp.eq.s32.totalorder %v247_v31, 1  ;;  %v1144_v43 = vsel %vm866_vm14, %v5234_v59, 0.0  ;;  %v235_v46 = vsub.s32 %v4290_v27, %v5251_v1  ;;  %v5509_v39 = vpop.f32.mrf.mxu1 }
 0x18b   :  { %v246_v40 = vsub.s32 %v4361_v60, %v5251_v1  ;;  %v1561_v9 = vpack.c.bf16 %v1420_v47, %v1409_v44  ;;  %v1155_v10 = vsel %vm877_vm15, %v5234_v59, 0.0  ;;  %v1320_v11 = vadd.f32 %v1144_v43, %v690_v6  ;;  %v5514_v5 = vpop.f32.mrf.mxu0 }
 0x18c   :  { %v303_v35 = vsub.s32 %v4332_v48, %v5260_v33  ;;  %v1331_v31 = vadd.f32 %v1155_v10, %v701_v17  ;;  %vm411_vm0 = vcmp.eq.s32.totalorder %v235_v46, 0  ;;  %vm865_vm2 = vcmp.eq.s32.totalorder %v235_v46, 1  ;;  %v5516_v34 = vpop.f32.mrf.mxu1 }
 0x18d   :  { %vm422_vm1 = vcmp.eq.s32.totalorder %v246_v40, 0  ;;  %4145 = vmatprep.subr.bf16.mxu1 %v1561_v9  ;;  %v689_v1 = vsel %vm411_vm0, %v5257_v18, 0.0  ;;  %vm876_vm3 = vcmp.eq.s32.totalorder %v246_v40, 1  ;;  %v1143_v59 = vsel %vm865_vm2, %v5240_v28, 0.0  ;;  %v5521_v44 = vpop.f32.mrf.mxu0 }
 0x18e   :  { %v700_v13 = vsel %vm422_vm1, %v5257_v18, 0.0  ;;  %4146 = vmatpush3.bf16.msra.mxu1 %v1561_v9  ;;  %v1516_v48 = vpack.c.bf16 %v1331_v31, %v1320_v11  ;;  %v1154_v47 = vsel %vm876_vm3, %v5240_v28, 0.0  ;;  %v1319_v17 = vadd.f32 %v1143_v59, %v689_v1  ;;  %v5526_v43 = vpop.f32.mrf.mxu1 }
 0x18f   :  { %v314_v6 = vsub.s32 %v4335_v49, %v5260_v33  ;;  %v1330_v46 = vadd.f32 %v1154_v47, %v700_v13  ;;  %vm479_vm4 = vcmp.eq.s32.totalorder %v303_v35, 0  ;;  %vm933_vm5 = vcmp.eq.s32.totalorder %v303_v35, 1  ;;  %v5530_v40 = vpop.f32.mrf.mxu0 }
 0x190   :  { %v281_v18 = vsub.s32 %v4338_v50, %v5260_v33  ;;  %2201 = vmatprep.subr.bf16.mxu0 %v1516_v48  ;;  %v757_v9 = vsel %vm479_vm4, %v5263_v37, 0.0  ;;  %v1211_v28 = vsel %vm933_vm5, %v5254_v22, 0.0  ;;  %v5534_v10 = vpop.f32.mrf.mxu1  ;;  %v292_v59 = vsub.s32 %v4341_v51, %v5260_v33 }
 0x191   :  { %vm490_vm6 = vcmp.eq.s32.totalorder %v314_v6, 0  ;;  %vm944_vm7 = vcmp.eq.s32.totalorder %v314_v6, 1  ;;  %7003 = vst [vmem:[#allocation26_spill] sm:$0xff] %v5534_v10  ;;  %v1515_v49 = vpack.c.bf16 %v1330_v46, %v1319_v17  ;;  %v1387_v35 = vadd.f32 %v1211_v28, %v757_v9  ;;  %v5538_v31 = vpop.f32.mrf.mxu0 }
 0x192   :  { %v768_v11 = vsel %vm490_vm6, %v5263_v37, 0.0  ;;  %v1222_v13 = vsel %vm944_vm7, %v5254_v22, 0.0  ;;  %vm457_vm8 = vcmp.eq.s32.totalorder %v281_v18, 0  ;;  %vm911_vm9 = vcmp.eq.s32.totalorder %v281_v18, 1  ;;  %v5542_v48 = vpop.f32.mrf.mxu1 }
 0x193   :  { %v1398_v1 = vadd.f32 %v1222_v13, %v768_v11  ;;  %2202 = vmatpush1.bf16.msra.mxu0 %v1515_v49  ;;  %v735_v47 = vsel %vm457_vm8, %v5263_v37, 0.0  ;;  %v1189_v17 = vsel %vm911_vm9, %v5254_v22, 0.0  ;;  %v259_v6 = vsub.s32 %v4344_v52, %v5260_v33  ;;  %v5550_v9 = vpop.f32.mrf.mxu0 }
 0x194   :  { %v270_v46 = vsub.s32 %v4347_v53, %v5260_v33  ;;  %7004 = vst [vmem:[#allocation27_spill] sm:$0xff] %v5550_v9  ;;  %vm468_vm10 = vcmp.eq.s32.totalorder %v292_v59, 0  ;;  %vm922_vm11 = vcmp.eq.s32.totalorder %v292_v59, 1  ;;  %v1365_v51 = vadd.f32 %v1189_v17, %v735_v47  ;;  %v5552_v18 = vpop.f32.mrf.mxu1 }
 0x195   :  { %v1550_v28 = vpack.c.bf16 %v1398_v1, %v1387_v35  ;;  %v746_v49 = vsel %vm468_vm10, %v5263_v37, 0.0  ;;  %v1200_v11 = vsel %vm922_vm11, %v5254_v22, 0.0  ;;  %vm435_vm12 = vcmp.eq.s32.totalorder %v259_v6, 0  ;;  %v5556_v13 = vpop.f32.mrf.mxu0 }
 0x196   :  { %vm446_vm13 = vcmp.eq.s32.totalorder %v270_v46, 0  ;;  %7005 = vst [vmem:[#allocation28_spill] sm:$0xff] %v5556_v13  ;;  %v1376_v10 = vadd.f32 %v1200_v11, %v746_v49  ;;  %2220 = vmatmul.mubr.bf16.vlgmr.msra.gmra.mxu0 %v5095_v54  ;;  %v713_v9 = vsel %vm435_vm12, %v5263_v37, 0.0  ;;  %vm889_vm14 = vcmp.eq.s32.totalorder %v259_v6, 1  ;;  %v5561_v1 = vpop.f32.mrf.mxu1 }
 0x197   :  { %4147 = vmatprep.subr.bf16.mxu1 %v1550_v28  ;;  %v724_v35 = vsel %vm446_vm13, %v5263_v37, 0.0  ;;  %7006 = vst [vmem:[#allocation29_spill] sm:$0xff] %v5561_v1  ;;  %vm900_vm15 = vcmp.eq.s32.totalorder %v270_v46, 1  ;;  %v1167_v59 = vsel %vm889_vm14, %v5254_v22, 0.0  ;;  %v237_v47 = vsub.s32 %v4290_v27, %v5260_v33  ;;  %2229 = vmatprep.mubr.bf16.mxu0 %v6999_v8  ;;  %v5569_v54 = vpop.f32.mrf.mxu0 }
 0x198   :  { %4148 = vmatpush3.bf16.msra.mxu1 %v1550_v28  ;;  %v248_v17 = vsub.s32 %v4361_v60, %v5260_v33  ;;  %v1539_v49 = vpack.c.bf16 %v1376_v10, %v1365_v51  ;;  %v1178_v11 = vsel %vm900_vm15, %v5254_v22, 0.0  ;;  %v1343_v6 = vadd.f32 %v1167_v59, %v713_v9  ;;  %v5576_v46 = vpop.f32.mrf.mxu1 }
 0x199   :  { %v5574_v28 = vmul.f32 %v5227_v12, %v5435_v32  ;;  %v1354_v13 = vadd.f32 %v1178_v11, %v724_v35  ;;  %vm413_vm0 = vcmp.eq.s32.totalorder %v237_v47, 0  ;;  %vm867_vm2 = vcmp.eq.s32.totalorder %v237_v47, 1  ;;  %v5578_v1 = vpop.f32.mrf.mxu0 }
 0x19a   :  { %vm424_vm1 = vcmp.eq.s32.totalorder %v248_v17, 0  ;;  %7007 = vst [vmem:[#allocation30_spill] sm:$0xff] %v5578_v1  ;;  %4149 = vmatprep.subr.bf16.mxu1 %v1539_v49  ;;  %v691_v33 = vsel %vm413_vm0, %v5263_v37, 0.0  ;;  %vm878_vm3 = vcmp.eq.s32.totalorder %v248_v17, 1  ;;  %v1145_v9 = vsel %vm867_vm2, %v5254_v22, 0.0  ;;  %v5583_v51 = vpop.f32.mrf.mxu1 }
 0x19b   :  { %v702_v10 = vsel %vm424_vm1, %v5263_v37, 0.0  ;;  %v1528_v32 = vpack.c.bf16 %v1354_v13, %v1343_v6  ;;  %v1156_v59 = vsel %vm878_vm3, %v5254_v22, 0.0  ;;  %v1321_v35 = vadd.f32 %v1145_v9, %v691_v33  ;;  %v5590_v11 = vpop.f32.mrf.mxu0 }
 0x19c   :  { %4150 = vmatpush3.bf16.msra.mxu1 %v1539_v49  ;;  %v5588_v47 = vmul.f32 %v5265_v36, %v5455_v56  ;;  %7008 = vst [vmem:[#allocation31_spill] sm:$0xff] %v5590_v11  ;;  %v1332_v1 = vadd.f32 %v1156_v59, %v702_v10  ;;  %vm2595_vm4 = vcmp.eq.s32.totalorder %v5207_v30, 0  ;;  %vm2807_vm5 = vcmp.eq.s32.totalorder %v5207_v30, 1  ;;  %v5600_v13 = vpop.f32.mrf.mxu1 }
 0x19d   :  { %v7009_v37 = vrot.slane %v5151_v4, %v5143_v24  ;;  %7010 = vst [vmem:[#allocation32_spill] sm:$0xff] %v5600_v13  ;;  %4151 = vmatprep.subr.bf16.mxu1 %v1528_v32  ;;  %v2752_v22 = vsel %vm2595_vm4, %v5199_v45, 0.0  ;;  %v2964_v56 = vsel %vm2807_vm5, %v5194_v25, 0.0  ;;  %v7011_v49 = vrot.slane %v5149_v16, %v5143_v24  ;;  %v5612_v33 = vpop.f32.mrf.mxu0  ;;  %v7017_v24 = vld [vmem:[#allocation17_spill] sm:$0xff] }
 0x19e   :  { %v2550_v30 = vsub.s32 %v4361_v60, %v5177_v38  ;;  %7012 = vst [vmem:[#allocation33_spill] sm:$0xff] %v5612_v33  ;;  %v1517_v4 = vpack.c.bf16 %v1332_v1, %v1321_v35  ;;  %2230 = vmatmul.mubr.bf16.gmra.mxu0 %v5118_v23  ;;  %v5615_v10 = vadd.f32 %v2964_v56, %v2752_v22 }
 0x19f   :  { %v5598_v17 = vrot.slane %v7009_v37, %v5134_v26  ;;  %v5608_v6 = vrot.slane %v7011_v49, %v5134_v26  ;;  %v2552_v59 = vsub.s32 %v4361_v60, %v5185_v55  ;;  %v5621_v37 = vpop.f32.mrf.mxu1  ;;  %2239 = vmatprep.mubr.bf16.mxu0 %v6999_v8  ;;  %v2551_v16 = vsub.s32 %v4361_v60, %v5191_v19  ;;  %v5628_v1 = vpop.f32.mrf.mxu0  ;;  %v7016_v49 = vld [vmem:[#allocation20_spill] sm:$0xff] }
 0x1a0   :  { %7013 = vst [vmem:[#allocation34_spill] sm:$0xff] %v5621_v37  ;;  %4152 = vmatpush3.bf16.msra.mxu1 %v1528_v32  ;;  %vm2605_vm6 = vcmp.eq.s32.totalorder %v2550_v30, 0  ;;  %vm2817_vm7 = vcmp.eq.s32.totalorder %v2550_v30, 1  ;;  %7014 = vst [vmem:[#allocation35_spill] sm:$0xff] %v5628_v1  ;;  %v3074_v35 = vmul.f32 %v5615_v10, %v5444_v57  ;;  %v7020_v57 = vld [vmem:[#allocation19_spill] sm:$0xff] }
 0x1a1   :  { %v2542_v9 = vsub.s32 %v4290_v27, %v5598_v17  ;;  %v2553_v23 = vsub.s32 %v4361_v60, %v5598_v17  ;;  %4153 = vmatprep.subr.bf16.mxu1 %v1517_v4  ;;  %v2762_v32 = vsel %vm2605_vm6, %v5180_v61, 0.0  ;;  %v5633_v22 = vpop.f32.mrf.mxu1  ;;  %v2974_v26 = vsel %vm2817_vm7, %v7017_v24, 0.0  ;;  %v5638_v60 = vpop.f32.mrf.mxu0 }
 0x1a2   :  { %7015 = vst [vmem:[#allocation36_spill] sm:$0xff] %v5633_v22  ;;  %vm2607_vm10 = vcmp.eq.s32.totalorder %v2552_v59, 0  ;;  %7018 = vst [vmem:[#allocation20_spill] sm:$0xff] %v5638_v60  ;;  %v5642_v33 = vadd.f32 %v2974_v26, %v2762_v32  ;;  %vm2819_vm11 = vcmp.eq.s32.totalorder %v2552_v59, 1  ;;  %v7022_v22 = vld [vmem:[#allocation18_spill] sm:$0xff]  ;;  %vm2606_vm12 = vcmp.eq.s32.totalorder %v2551_v16, 0 }
 0x1a3   :  { %vm2597_vm8 = vcmp.eq.s32.totalorder %v2542_v9, 0  ;;  %vm2809_vm9 = vcmp.eq.s32.totalorder %v2542_v9, 1  ;;  %v2764_v37 = vsel %vm2607_vm10, %v7020_v57, 0.0  ;;  %v5645_v9 = vpop.f32.mrf.mxu1  ;;  %v2976_v11 = vsel %vm2819_vm11, %v7022_v22, 0.0  ;;  %v5648_v13 = vpop.f32.mrf.mxu0 }
 0x1a4   :  { %v2754_v56 = vsel %vm2597_vm8, %v5608_v6, 0.0  ;;  %v2966_v30 = vsel %vm2809_vm9, %v7016_v49, 0.0  ;;  %7021 = vst [vmem:[#allocation19_spill] sm:$0xff] %v5645_v9  ;;  %4154 = vmatpush3.bf16.msra.mxu1 %v1517_v4  ;;  %vm2818_vm13 = vcmp.eq.s32.totalorder %v2551_v16, 1  ;;  %vm2608_vm14 = vcmp.eq.s32.totalorder %v2553_v23, 0  ;;  %7023 = vst [vmem:[#allocation18_spill] sm:$0xff] %v5648_v13 }
 0x1a5   :  { %v5640_v1 = vadd.f32 %v2966_v30, %v2754_v56  ;;  %v3084_v26 = vmul.f32 %v5642_v33, %v5458_v2  ;;  %v5654_v32 = vadd.f32 %v2976_v11, %v2764_v37  ;;  %v2763_v59 = vsel %vm2606_vm12, %v5199_v45, 0.0  ;;  %v5657_v56 = vpop.f32.mrf.mxu1  ;;  %v5663_v13 = vpop.f32.mrf.mxu0  ;;  %v4221_v2 = vld [vmem:[%s6922_s2 + $0x8] sm:$0xff]  }
 0x1a6   :  { %7024 = vst [vmem:[#allocation37_spill] sm:$0xff] %v5657_v56  ;;  %v2975_v4 = vsel %vm2818_vm13, %v5194_v25, 0.0  ;;  %v2765_v30 = vsel %vm2608_vm14, %v5608_v6, 0.0  ;;  %vm2820_vm15 = vcmp.eq.s32.totalorder %v2553_v23, 1  ;;  %v2561_v16 = vsub.s32 %v4344_v52, %v5177_v38  ;;  %7025 = vst [vmem:[#allocation38_spill] sm:$0xff] %v5663_v13 }
 0x1a7   :  { %7019 = vst [vmem:[#allocation17_spill] sm:$0xff] %v5640_v1  ;;  %v3076_v60 = vmul.f32 %v5640_v1, %v5463_v29  ;;  %4156 = vmatmul.mubr.bf16.vlgmr.msra.gmra.mxu1 %v4221_v2  ;;  %v7026_v29 = vld [vmem:[#allocation21_spill] sm:$0xff]  ;;  %v3128_v11 = vadd.f32 %v3084_v26, %v5574_v28  ;;  %v3086_v37 = vmul.f32 %v5654_v32, %v5472_v42  ;;  %v2977_v23 = vsel %vm2820_vm15, %v7016_v49, 0.0  ;;  %v5675_v9 = vpop.f32.mrf.mxu1  ;;  %v5683_v26 = vpop.f32.mrf.mxu0 }
 0x1a8   :  { %2240 = vmatmul.mubr.bf16.gmra.mxu0 %v7026_v29  ;;  %v5672_v56 = vadd.f32 %v2975_v4, %v2763_v59  ;;  %7027 = vst [vmem:[#allocation21_spill] sm:$0xff] %v5675_v9  ;;  %4159 = vmatprep.mubr.bf16.mxu1 %v7026_v29  ;;  %v5679_v13 = vadd.f32 %v2977_v23, %v2765_v30  ;;  %vm2616_vm0 = vcmp.eq.s32.totalorder %v2561_v16, 0  ;;  %vm2828_vm1 = vcmp.eq.s32.totalorder %v2561_v16, 1 }
 0x1a9   :  { %2249 = vmatprep.mubr.bf16.mxu0 %v6999_v8  ;;  %v2563_v28 = vsub.s32 %v4344_v52, %v5185_v55  ;;  %7028 = vst [vmem:[#allocation39_spill] sm:$0xff] %v5683_v26  ;;  %v3148_v42 = vadd.f32 %v3086_v37, %v5588_v47  ;;  %v2773_v4 = vsel %vm2616_vm0, %v5180_v61, 0.0  ;;  %v2985_v2 = vsel %vm2828_vm1, %v7017_v24, 0.0  ;;  %v5690_v29 = vpop.f32.mrf.mxu1  ;;  %v5696_v23 = vpop.f32.mrf.mxu0 }
 0x1aa   :  { %v3085_v59 = vmul.f32 %v5672_v56, %v5468_v58  ;;  %7029 = vst [vmem:[#allocation40_spill] sm:$0xff] %v5690_v29  ;;  %v3087_v30 = vmul.f32 %v5679_v13, %v5480_v21  ;;  %v5694_v16 = vadd.f32 %v2985_v2, %v2773_v4  ;;  %7030 = vst [vmem:[#allocation41_spill] sm:$0xff] %v5696_v23 }
 0x1ab   :  { %vm2618_vm2 = vcmp.eq.s32.totalorder %v2563_v28, 0  ;;  %vm2830_vm3 = vcmp.eq.s32.totalorder %v2563_v28, 1  ;;  %v2562_v37 = vsub.s32 %v4344_v52, %v5191_v19  ;;  %v5702_v9 = vpop.f32.mrf.mxu1  ;;  %v2564_v28 = vsub.s32 %v4344_v52, %v5598_v17  ;;  %v5710_v2 = vpop.f32.mrf.mxu0  ;;  %v7035_v52 = vld [vmem:[#allocation22_spill] sm:$0xff] }
 0x1ac   :  { %v3138_v26 = vadd.f32 %v3085_v59, %v3074_v35  ;;  %v2775_v47 = vsel %vm2618_vm2, %v7020_v57, 0.0  ;;  %v2987_v58 = vsel %vm2830_vm3, %v7022_v22, 0.0  ;;  %7031 = vst [vmem:[#allocation42_spill] sm:$0xff] %v5702_v9  ;;  %v3158_v29 = vadd.f32 %v3087_v30, %v3076_v60  ;;  %7032 = vst [vmem:[#allocation43_spill] sm:$0xff] %v5710_v2 }
 0x1ad   :  { %v3095_v21 = vmul.f32 %v5694_v16, %v5476_v0  ;;  %v5706_v4 = vadd.f32 %v2987_v58, %v2775_v47  ;;  %vm2617_vm4 = vcmp.eq.s32.totalorder %v2562_v37, 0  ;;  %vm2829_vm5 = vcmp.eq.s32.totalorder %v2562_v37, 1  ;;  %v5716_v23 = vpop.f32.mrf.mxu1  ;;  %v5722_v58 = vpop.f32.mrf.mxu0 }
 0x1ae   :  { %v2572_v35 = vsub.s32 %v4347_v53, %v5177_v38  ;;  %v2574_v59 = vsub.s32 %v4347_v53, %v5185_v55  ;;  %7033 = vst [vmem:[#allocation44_spill] sm:$0xff] %v5716_v23  ;;  %v2774_v30 = vsel %vm2617_vm4, %v5199_v45, 0.0  ;;  %v2986_v47 = vsel %vm2829_vm5, %v5194_v25, 0.0  ;;  %7034 = vst [vmem:[#allocation45_spill] sm:$0xff] %v5722_v58 }
 0x1af   :  { %v3129_v60 = vadd.f32 %v3128_v11, %v3095_v21  ;;  %v3097_v0 = vmul.f32 %v5706_v4, %v5492_v41  ;;  %4160 = vmatmul.mubr.bf16.gmra.mxu1 %v7035_v52  ;;  %v5726_v37 = vadd.f32 %v2986_v47, %v2774_v30  ;;  %vm2619_vm6 = vcmp.eq.s32.totalorder %v2564_v28, 0 }
 0x1b0   :  { %2250 = vmatmul.mubr.bf16.gmra.mxu0 %v7035_v52  ;;  %vm2831_vm7 = vcmp.eq.s32.totalorder %v2564_v28, 1  ;;  %vm2627_vm8 = vcmp.eq.s32.totalorder %v2572_v35, 0  ;;  %4163 = vmatprep.mubr.bf16.mxu1 %v5305_v3  ;;  %v2776_v11 = vsel %vm2619_vm6, %v5608_v6, 0.0  ;;  %vm2839_vm9 = vcmp.eq.s32.totalorder %v2572_v35, 1  ;;  %v5737_v28 = vpop.f32.mrf.mxu1 }
 0x1b1   :  { %2259 = vmatprep.mubr.bf16.mxu0 %v6999_v8  ;;  %v3149_v41 = vadd.f32 %v3148_v42, %v3097_v0  ;;  %v2988_v21 = vsel %vm2831_vm7, %v7016_v49, 0.0  ;;  %v2784_v58 = vsel %vm2627_vm8, %v5180_v61, 0.0  ;;  %v3096_v2 = vmul.f32 %v5726_v37, %v5484_v62  ;;  %7036 = vst [vmem:[#allocation22_spill] sm:$0xff] %v5737_v28  ;;  %v5743_v0 = vpop.f32.mrf.mxu0 }
 0x1b2   :  { %v5735_v52 = vadd.f32 %v2988_v21, %v2776_v11  ;;  %vm2629_vm10 = vcmp.eq.s32.totalorder %v2574_v59, 0  ;;  %v2996_v30 = vsel %vm2839_vm9, %v7017_v24, 0.0  ;;  %vm2841_vm11 = vcmp.eq.s32.totalorder %v2574_v59, 1 }
 0x1b3   :  { %v2786_v47 = vsel %vm2629_vm10, %v7020_v57, 0.0  ;;  %v2573_v42 = vsub.s32 %v4347_v53, %v5191_v19  ;;  %v3139_v23 = vadd.f32 %v3138_v26, %v3096_v2  ;;  %v5747_v11 = vadd.f32 %v2996_v30, %v2784_v58 }
 0x1b4   :  { %v3098_v62 = vmul.f32 %v5735_v52, %v5498_v15  ;;  %v2998_v35 = vsel %vm2841_vm11, %v7022_v22, 0.0  ;;  %v2575_v59 = vsub.s32 %v4347_v53, %v5598_v17  ;;  %v5758_v15 = vpop.f32.mrf.mxu1 }
 0x1b5   :  { %v5750_v21 = vadd.f32 %v2998_v35, %v2786_v47  ;;  %vm2628_vm12 = vcmp.eq.s32.totalorder %v2573_v42, 0  ;;  %vm2840_vm13 = vcmp.eq.s32.totalorder %v2573_v42, 1  ;;  %v3106_v9 = vmul.f32 %v5747_v11, %v5494_v7  ;;  %v5764_v47 = vpop.f32.mrf.mxu0 }
 0x1b6   :  { %v3159_v28 = vadd.f32 %v3158_v29, %v3098_v62  ;;  %v2785_v26 = vsel %vm2628_vm12, %v5199_v45, 0.0  ;;  %v2997_v2 = vsel %vm2840_vm13, %v5194_v25, 0.0  ;;  %vm2630_vm14 = vcmp.eq.s32.totalorder %v2575_v59, 0 }
 0x1b7   :  { %v3108_v58 = vmul.f32 %v5750_v21, %v5509_v39  ;;  %v5762_v30 = vadd.f32 %v2997_v2, %v2785_v26  ;;  %vm2842_vm15 = vcmp.eq.s32.totalorder %v2575_v59, 1  ;;  %4164 = vmatmul.mubr.bf16.gmra.mxu1 %v5332_v63  ;;  %v3130_v7 = vadd.f32 %v3129_v60, %v3106_v9  ;;  %v5782_v60 = vpop.f32.mrf.mxu1  ;;  %v5788_v2 = vpop.f32.mrf.mxu0 }
 0x1b8   :  { %2260 = vmatmul.mubr.bf16.gmra.mxu0 %v5305_v3  ;;  %v2787_v29 = vsel %vm2630_vm14, %v5608_v6, 0.0  ;;  %v2999_v42 = vsel %vm2842_vm15, %v7016_v49, 0.0  ;;  %v2583_v62 = vsub.s32 %v4338_v50, %v5177_v38  ;;  %4167 = vmatprep.mubr.bf16.mxu1 %v5365_v20  ;;  %v2585_v3 = vsub.s32 %v4338_v50, %v5185_v55 }
 0x1b9   :  { %2269 = vmatprep.mubr.bf16.mxu0 %v6999_v8  ;;  %v3150_v39 = vadd.f32 %v3149_v41, %v3108_v58  ;;  %v3107_v35 = vmul.f32 %v5762_v30, %v5502_v14  ;;  %v5776_v59 = vadd.f32 %v2999_v42, %v2787_v29  ;;  %v2584_v9 = vsub.s32 %v4338_v50, %v5191_v19 }
 0x1ba   :  { %vm2638_vm0 = vcmp.eq.s32.totalorder %v2583_v62, 0  ;;  %vm2850_vm1 = vcmp.eq.s32.totalorder %v2583_v62, 1  ;;  %vm2640_vm2 = vcmp.eq.s32.totalorder %v2585_v3, 0  ;;  %vm2852_vm3 = vcmp.eq.s32.totalorder %v2585_v3, 1  ;;  %v5799_v62 = vpop.f32.mrf.mxu1 }
 0x1bb   :  { %v3140_v38 = vadd.f32 %v3139_v23, %v3107_v35  ;;  %v3109_v41 = vmul.f32 %v5776_v59, %v5516_v34  ;;  %v2795_v26 = vsel %vm2638_vm0, %v5180_v61, 0.0  ;;  %v3007_v14 = vsel %vm2850_vm1, %v7017_v24, 0.0 }
 0x1bc   :  { %v5790_v58 = vadd.f32 %v3007_v14, %v2795_v26  ;;  %vm2639_vm4 = vcmp.eq.s32.totalorder %v2584_v9, 0  ;;  %v2797_v19 = vsel %vm2640_vm2, %v7020_v57, 0.0  ;;  %v3009_v29 = vsel %vm2852_vm3, %v7022_v22, 0.0  ;;  %v5808_v57 = vpop.f32.mrf.mxu0  ;;  %v5827_v14 = vpop.f32.mrf.mxu1 }
 0x1bd   :  { %v3160_v55 = vadd.f32 %v3159_v28, %v3109_v41  ;;  %v2796_v23 = vsel %vm2639_vm4, %v5199_v45, 0.0  ;;  %v5797_v61 = vadd.f32 %v3009_v29, %v2797_v19  ;;  %vm2851_vm5 = vcmp.eq.s32.totalorder %v2584_v9, 1 }
 0x1be   :  { %v3117_v34 = vmul.f32 %v5790_v58, %v5514_v5  ;;  %v4240_v24 = vmov 1966171168   ;;  %v3008_v35 = vsel %vm2851_vm5, %v5194_v25, 0.0  ;;  %v2586_v28 = vsub.s32 %v4338_v50, %v5598_v17  ;;  %v7037_v5 = vld [vmem:[#allocation23_spill] sm:$0xff] }
 0x1bf   :  { %v3254_v42 = vunpack.c.l.s4 %v4240_v24  ;;  %v3330_v22 = vmul.f32 %v5227_v12, %v5530_v40  ;;  %v3332_v45 = vmul.f32 %v5265_v36, %v5542_v48  ;;  %4168 = vmatmul.mubr.bf16.gmra.mxu1 %v7037_v5  ;;  %v3119_v9 = vmul.f32 %v5797_v61, %v5526_v43  ;;  %v7038_v40 = vld [vmem:[#allocation24_spill] sm:$0xff]  ;;  %v5835_v24 = vpop.f32.mrf.mxu0 }
 0x1c0   :  { %2270 = vmatmul.mubr.bf16.gmra.mxu0 %v5332_v63  ;;  %v3131_v3 = vadd.f32 %v3130_v7, %v3117_v34  ;;  %v5814_v25 = vadd.f32 %v3008_v35, %v2796_v23  ;;  %vm2641_vm6 = vcmp.eq.s32.totalorder %v2586_v28, 0  ;;  %vm2853_vm7 = vcmp.eq.s32.totalorder %v2586_v28, 1  ;;  %4171 = vmatprep.mubr.bf16.mxu1 %v7038_v40  ;;  %v7040_v23 = vld [vmem:[#allocation27_spill] sm:$0xff]  ;;  %v7041_v34 = vld [vmem:[#allocation29_spill] sm:$0xff]  ;;  %7042 = vst [vmem:[#allocation24_spill] sm:$0xff] %v5835_v24  ;;  %v5845_v24 = vpop.f32.mrf.mxu1 }
 0x1c1   :  { %v3255_v41 = vunpack.c.0.s8 %v3254_v42  ;;  %2279 = vmatprep.mubr.bf16.mxu0 %v6999_v8  ;;  %v3331_v48 = vmul.f32 %v5615_v10, %v5538_v31  ;;  %v3333_v63 = vmul.f32 %v5640_v1, %v5552_v18  ;;  %v3151_v7 = vadd.f32 %v3150_v39, %v3119_v9 }
 0x1c2   :  { %v3132_v17 = vrot.slane %v3131_v3, 4  ;;  %v3118_v43 = vmul.f32 %v5814_v25, %v5521_v44  ;;  %v2798_v19 = vsel %vm2641_vm6, %v5608_v6, 0.0  ;;  %v3010_v29 = vsel %vm2853_vm7, %v7016_v49, 0.0 }
 0x1c3   :  { %v5825_v26 = vsub.s32 %v3255_v41, %v4290_v27  ;;  %v3341_v31 = vmul.f32 %v5642_v33, %v7040_v23  ;;  %v3343_v18 = vmul.f32 %v5654_v32, %v7041_v34  ;;  %v3152_v42 = vrot.slane %v3151_v7, 4  ;;  %v7043_v41 = vld [vmem:[#allocation28_spill] sm:$0xff]  ;;  %v7044_v27 = vld [vmem:[#allocation26_spill] sm:$0xff] }
 0x1c4   :  { %v3133_v39 = vadd.f32 %v3132_v17, %v3131_v3  ;;  %v3141_v44 = vadd.f32 %v3140_v38, %v3118_v43  ;;  %v5837_v35 = vadd.f32 %v3010_v29, %v2798_v19  ;;  %v3342_v6 = vmul.f32 %v5672_v56, %v7043_v41  ;;  %v5851_v17 = vpop.f32.mrf.mxu0  ;;  %v7046_v29 = vld [vmem:[#allocation25_spill] sm:$0xff]  ;;  %v5860_v41 = vpop.f32.mrf.mxu1 }
 0x1c5   :  { %7039 = vst [vmem:[#allocation23_spill] sm:$0xff] %v5825_v26  ;;  %v3385_v28 = vadd.f32 %v3341_v31, %v3330_v22  ;;  %v3405_v9 = vadd.f32 %v3343_v18, %v3332_v45  ;;  %v3344_v49 = vmul.f32 %v5679_v13, %v5576_v46  ;;  %v3153_v23 = vadd.f32 %v3152_v42, %v3151_v7  ;;  %v7048_v31 = vld [vmem:[#allocation32_spill] sm:$0xff] }
 0x1c6   :  { %v3134_v50 = vrot.slane %v3133_v39, 2  ;;  %v3142_v53 = vrot.slane %v3141_v44, 4  ;;  %v3120_v34 = vmul.f32 %v5837_v35, %v7044_v27  ;;  %v3395_v3 = vadd.f32 %v3342_v6, %v3331_v48  ;;  %7045 = vst [vmem:[#allocation27_spill] sm:$0xff] %v5851_v17  ;;  %7049 = vst [vmem:[#allocation29_spill] sm:$0xff] %v5860_v41  ;;  %v7051_v6 = vld [vmem:[#allocation34_spill] sm:$0xff]  ;;  %v7053_v17 = vld [vmem:[#allocation36_spill] sm:$0xff]  ;;  %v5874_v41 = vpop.f32.mrf.mxu1 }
 0x1c7   :  { %v3415_v38 = vadd.f32 %v3344_v49, %v3333_v63  ;;  %v3352_v22 = vmul.f32 %v5694_v16, %v5569_v54  ;;  %v3354_v45 = vmul.f32 %v5706_v4, %v5583_v51  ;;  %v3154_v46 = vrot.slane %v3153_v23, 2  ;;  %4172 = vmatmul.mubr.bf16.gmra.mxu1 %v7046_v29  ;;  %v7047_v63 = vld [vmem:[#allocation30_spill] sm:$0xff]  ;;  %7055 = vst [vmem:[#allocation28_spill] sm:$0xff] %v5874_v41 }
 0x1c8   :  { %v3135_v43 = vadd.f32 %v3134_v50, %v3133_v39  ;;  %2280 = vmatmul.mubr.bf16.gmra.mxu0 %v5365_v20  ;;  %v3143_v7 = vadd.f32 %v3142_v53, %v3141_v44  ;;  %v3161_v19 = vadd.f32 %v3160_v55, %v3120_v34  ;;  %v3353_v54 = vmul.f32 %v5726_v37, %v7047_v63  ;;  %v7050_v55 = vld [vmem:[#allocation31_spill] sm:$0xff] }
 0x1c9   :  { %2289 = vmatprep.mubr.bf16.mxu0 %v6999_v8  ;;  %v3386_v27 = vadd.f32 %v3385_v28, %v3352_v22  ;;  %v3406_v48 = vadd.f32 %v3405_v9, %v3354_v45  ;;  %v3355_v51 = vmul.f32 %v5735_v52, %v7048_v31  ;;  %v3155_v42 = vadd.f32 %v3154_v46, %v3153_v23  ;;  %v5866_v9 = vpop.f32.mrf.mxu0  ;;  %v7052_v46 = vld [vmem:[#allocation33_spill] sm:$0xff] }
 0x1ca   :  { %v3136_v18 = vrot.slane %v3135_v43, 1  ;;  %v3144_v50 = vrot.slane %v3143_v7, 2  ;;  %v3162_v39 = vrot.slane %v3161_v19, 4  ;;  %v3396_v53 = vadd.f32 %v3395_v3, %v3353_v54 }
 0x1cb   :  { %v3416_v20 = vadd.f32 %v3415_v38, %v3355_v51  ;;  %v3363_v44 = vmul.f32 %v5747_v11, %v7050_v55  ;;  %v3365_v28 = vmul.f32 %v5750_v21, %v7051_v6  ;;  %v3156_v34 = vrot.slane %v3155_v42, 1  ;;  %v7054_v55 = vld [vmem:[#allocation35_spill] sm:$0xff] }
 0x1cc   :  { %v3137_v49 = vadd.f32 %v3136_v18, %v3135_v43  ;;  %v3145_v22 = vadd.f32 %v3144_v50, %v3143_v7  ;;  %v3163_v45 = vadd.f32 %v3162_v39, %v3161_v19  ;;  %v3364_v31 = vmul.f32 %v5762_v30, %v7052_v46  ;;  %v7056_v7 = vld [vmem:[#allocation19_spill] sm:$0xff]  ;;  %v5880_v50 = vpop.f32.mrf.mxu0 }
 0x1cd   :  { %v3387_v63 = vadd.f32 %v3386_v27, %v3363_v44  ;;  %v3407_v23 = vadd.f32 %v3406_v48, %v3365_v28  ;;  %v3366_v3 = vmul.f32 %v5776_v59, %v7053_v17  ;;  %v3157_v38 = vadd.f32 %v3156_v34, %v3155_v42  ;;  %v7057_v27 = vld [vmem:[#allocation20_spill] sm:$0xff]  ;;  %7058 = vst [vmem:[#allocation26_spill] sm:$0xff] %v5880_v50  ;;  %v7059_v44 = vld [vmem:[#allocation37_spill] sm:$0xff]  ;;  %v7060_v34 = vld [vmem:[#allocation18_spill] sm:$0xff] }
 0x1ce   :  { %v3146_v54 = vrot.slane %v3145_v22, 1  ;;  %v3164_v51 = vrot.slane %v3163_v45, 2  ;;  %v3374_v6 = vmul.f32 %v5790_v58, %v7054_v55  ;;  %v3397_v43 = vadd.f32 %v3396_v53, %v3364_v31  ;;  %v7061_v31 = vld [vmem:[#allocation21_spill] sm:$0xff] }
 0x1cf   :  { %v3417_v18 = vadd.f32 %v3416_v20, %v3366_v3  ;;  %v3376_v19 = vmul.f32 %v5797_v61, %v7056_v7  ;;  %v3375_v48 = vmul.f32 %v5814_v25, %v7057_v27  ;;  %v3377_v28 = vmul.f32 %v5837_v35, %v7059_v44  ;;  %v7064_v27 = vld [vmem:[#allocation40_spill] sm:$0xff] }
 0x1d0   :  { %v3147_v39 = vadd.f32 %v3146_v54, %v3145_v22  ;;  %v3165_v17 = vadd.f32 %v3164_v51, %v3163_v45  ;;  %2290 = vmatmul.mubr.bf16.gmra.mxu0 %v7037_v5  ;;  %v3388_v42 = vadd.f32 %v3387_v63, %v3374_v6  ;;  %v3584_v46 = vmul.f32 %v5227_v12, %v7060_v34  ;;  %v5890_v54 = vpop.f32.mrf.mxu1  ;;  %v7063_v51 = vld [vmem:[#allocation38_spill] sm:$0xff] }
 0x1d1   :  { %2299 = vmatprep.mubr.bf16.mxu0 %v6999_v8  ;;  %v3408_v53 = vadd.f32 %v3407_v23, %v3376_v19  ;;  %v3398_v20 = vadd.f32 %v3397_v43, %v3375_v48  ;;  %v3586_v3 = vmul.f32 %v5265_v36, %v7061_v31  ;;  %v3418_v45 = vadd.f32 %v3417_v18, %v3377_v28  ;;  %v5896_v43 = vpop.f32.mrf.mxu0  ;;  %v7066_v28 = vld [vmem:[#allocation39_spill] sm:$0xff]  ;;  %v7067_v31 = vld [vmem:[#allocation42_spill] sm:$0xff] }
 0x1d2   :  { %v3249_v55 = vcombine.low %v3137_v49, %v3147_v39  ;;  %v3166_v7 = vrot.slane %v3165_v17, 1  ;;  %v3389_v22 = vrot.slane %v3388_v42, 4  ;;  %7062 = vst [vmem:[#allocation25_spill] sm:$0xff] %v5890_v54  ;;  %v3585_v6 = vmul.f32 %v5615_v10, %v7063_v51  ;;  %7065 = vst [vmem:[#allocation30_spill] sm:$0xff] %v5896_v43 }
 0x1d3   :  { %v3409_v5 = vrot.slane %v3408_v53, 4  ;;  %v3399_v63 = vrot.slane %v3398_v20, 4  ;;  %v3587_v23 = vmul.f32 %v5640_v1, %v7064_v27  ;;  %v3419_v39 = vrot.slane %v3418_v45, 4  ;;  %v7068_v27 = vld [vmem:[#allocation41_spill] sm:$0xff]  ;;  %v5907_v1 = vpop.f32.mrf.mxu1 }
 0x1d4   :  { %v5899_v19 = vrot.slane %v3249_v55, %v5825_v26  ;;  %v3167_v48 = vadd.f32 %v3166_v7, %v3165_v17  ;;  %v3390_v49 = vadd.f32 %v3389_v22, %v3388_v42  ;;  %v3595_v34 = vmul.f32 %v5642_v33, %v7066_v28  ;;  %v7070_v28 = vld [vmem:[#allocation43_spill] sm:$0xff] }
 0x1d5   :  { %v3410_v44 = vadd.f32 %v3409_v5, %v3408_v53  ;;  %v3400_v18 = vadd.f32 %v3399_v63, %v3398_v20  ;;  %v3597_v50 = vmul.f32 %v5654_v32, %v7067_v31  ;;  %v3420_v54 = vadd.f32 %v3419_v39, %v3418_v45  ;;  %v5909_v53 = vpop.f32.mrf.mxu0  ;;  %v7071_v31 = vld [vmem:[#allocation22_spill] sm:$0xff] }
 0x1d6   :  { %v3250_v51 = vcombine.low %v3157_v38, %v3167_v48  ;;  %v3391_v41 = vrot.slane %v3390_v49, 2  ;;  %v3596_v43 = vmul.f32 %v5672_v56, %v7068_v27  ;;  %v3639_v42 = vadd.f32 %v3595_v34, %v3584_v46  ;;  %v7069_v48 = vld [vmem:[#allocation44_spill] sm:$0xff] }
 0x1d7   :  { %v3411_v55 = vrot.slane %v3410_v44, 2  ;;  %v3401_v17 = vrot.slane %v3400_v18, 2  ;;  %v3659_v7 = vadd.f32 %v3597_v50, %v3586_v3  ;;  %v3421_v38 = vrot.slane %v3420_v54, 2 }
 0x1d8   :  { %v5912_v20 = vrot.slane %v3250_v51, %v5825_v26  ;;  %2300 = vmatmul.mubr.bf16.gmra.mxu0 %v7038_v40  ;;  %v3392_v22 = vadd.f32 %v3391_v41, %v3390_v49  ;;  %v3649_v5 = vadd.f32 %v3596_v43, %v3585_v6  ;;  %v3598_v39 = vmul.f32 %v5679_v13, %v7069_v48  ;;  %v5924_v41 = vpop.f32.mrf.mxu1  ;;  %v7072_v48 = vld [vmem:[#allocation45_spill] sm:$0xff] }
 0x1d9   :  { %v3412_v45 = vadd.f32 %v3411_v55, %v3410_v44  ;;  %v3402_v63 = vadd.f32 %v3401_v17, %v3400_v18  ;;  %2309 = vmatprep.mubr.bf16.mxu0 %v6999_v8  ;;  %v3606_v50 = vmul.f32 %v5694_v16, %v7070_v28  ;;  %v3422_v34 = vadd.f32 %v3421_v38, %v3420_v54  ;;  %v5926_v44 = vpop.f32.mrf.mxu0 }
 0x1da   :  { %v3281_v46 = vcombine.low %v5899_v19, %v5912_v20  ;;  %v3393_v3 = vrot.slane %v3392_v22, 1  ;;  %v3608_v40 = vmul.f32 %v5706_v4, %v7071_v31  ;;  %v3669_v49 = vadd.f32 %v3598_v39, %v3587_v23 }
 0x1db   :  { %v3413_v6 = vrot.slane %v3412_v45, 1  ;;  %v3403_v43 = vrot.slane %v3402_v63, 1  ;;  %v3640_v8 = vadd.f32 %v3639_v42, %v3606_v50  ;;  %v3423_v51 = vrot.slane %v3422_v34, 1  ;;  %v5942_v50 = vpop.f32.mrf.mxu0 }
 0x1dc   :  { %v3394_v18 = vadd.f32 %v3393_v3, %v3392_v22  ;;  %v3660_v27 = vadd.f32 %v3659_v7, %v3608_v40  ;;  %v3607_v28 = vmul.f32 %v5726_v37, %v7072_v48  ;;  %v3609_v54 = vmul.f32 %v5735_v52, %v5758_v15  ;;  %v5938_v22 = vpop.f32.mrf.mxu1 }
 0x1dd   :  { %v3414_v55 = vadd.f32 %v3413_v6, %v3412_v45  ;;  %v3404_v17 = vadd.f32 %v3403_v43, %v3402_v63  ;;  %v3424_v38 = vadd.f32 %v3423_v51, %v3422_v34  ;;  %v3617_v31 = vmul.f32 %v5747_v11, %v5743_v0  ;;  %v7074_v51 = vld [vmem:[#allocation29_spill] sm:$0xff] }
 0x1de   :  { %v3619_v23 = vmul.f32 %v5750_v21, %v5782_v60  ;;  %v3618_v42 = vmul.f32 %v5762_v30, %v5764_v47  ;;  %v3650_v45 = vadd.f32 %v3649_v5, %v3607_v28  ;;  %v3670_v63 = vadd.f32 %v3669_v49, %v3609_v54  ;;  %v1912_v49 = vpop.f32.mrf.mxu1 }
 0x1df   :  { %v3506_v7 = vcombine.low %v3394_v18, %v3404_v17  ;;  %v3620_v39 = vmul.f32 %v5776_v59, %v5799_v62  ;;  %v3507_v15 = vcombine.low %v3414_v55, %v3424_v38  ;;  %v3641_v0 = vadd.f32 %v3640_v8, %v3617_v31  ;;  %v7073_v8 = vld [vmem:[#allocation24_spill] sm:$0xff]  ;;  %v1783_v55 = vpop.f32.mrf.mxu0  ;;  %v7076_v31 = vld [vmem:[#allocation25_spill] sm:$0xff] }
 0x1e0   :  { %2310 = vmatmul.mubr.bf16.gmra.mxu0 %v7046_v29  ;;  %v3661_v3 = vadd.f32 %v3660_v27, %v3619_v23  ;;  %v3628_v60 = vmul.f32 %v5790_v58, %v5788_v2  ;;  %v3651_v34 = vadd.f32 %v3650_v45, %v3618_v42  ;;  %v3630_v5 = vmul.f32 %v5797_v61, %v5827_v14  ;;  %v7078_v45 = vld [vmem:[#allocation17_spill] sm:$0xff] }
 0x1e1   :  { %v5948_v47 = vrot.slane %v3506_v7, %v5825_v26  ;;  %v3671_v40 = vadd.f32 %v3670_v63, %v3620_v39  ;;  %v5953_v62 = vrot.slane %v3507_v15, %v5825_v26  ;;  %v3629_v29 = vmul.f32 %v5814_v25, %v5808_v57  ;;  %v7075_v57 = vld [vmem:[#allocation27_spill] sm:$0xff]  ;;  %v7077_v7 = vld [vmem:[#allocation28_spill] sm:$0xff]  ;;  %v1914_v39 = vpop.f32.mrf.mxu1 }
 0x1e2   :  { %v3642_v6 = vadd.f32 %v3641_v0, %v3628_v60  ;;  %v3631_v43 = vmul.f32 %v5837_v35, %v5845_v24  ;;  %v3662_v2 = vadd.f32 %v3661_v3, %v3630_v5  ;;  %v3838_v18 = vmul.f32 %v5227_v12, %v7073_v8  ;;  %v7079_v60 = vld [vmem:[#allocation26_spill] sm:$0xff] }
 0x1e3   :  { %v3840_v27 = vmul.f32 %v5265_v36, %v7074_v51  ;;  %v3538_v14 = vcombine.low %v5948_v47, %v5953_v62  ;;  %v3652_v48 = vadd.f32 %v3651_v34, %v3629_v29  ;;  %v3839_v38 = vmul.f32 %v5615_v10, %v7075_v57  ;;  %v1785_v10 = vpop.f32.mrf.mxu0  ;;  %v7080_v29 = vld [vmem:[#allocation30_spill] sm:$0xff]  ;;  %v7090_v62 = vld [vmem:[#allocation15_spill] sm:$0xff] }
 0x1e4   :  { %v3643_v17 = vrot.slane %v3642_v6, 4  ;;  %v3672_v28 = vadd.f32 %v3671_v40, %v3631_v43  ;;  %v3663_v54 = vrot.slane %v3662_v2, 4  ;;  %v3849_v24 = vmul.f32 %v5642_v33, %v5866_v9 }
 0x1e5   :  { %v3851_v12 = vmul.f32 %v5654_v32, %v7076_v31  ;;  %v3653_v42 = vrot.slane %v3652_v48, 4  ;;  %v3841_v63 = vmul.f32 %v7078_v45, %v7077_v7  ;;  %v3850_v34 = vmul.f32 %v5672_v56, %v7079_v60  ;;  %v1916_v56 = vpop.f32.mrf.mxu1 }
 0x1e6   :  { %v3644_v23 = vadd.f32 %v3643_v17, %v3642_v6  ;;  %v3673_v36 = vrot.slane %v3672_v28, 4  ;;  %v3664_v15 = vadd.f32 %v3663_v54, %v3662_v2  ;;  %v3893_v0 = vadd.f32 %v3849_v24, %v3838_v18 }
 0x1e7   :  { %v3913_v3 = vadd.f32 %v3851_v12, %v3840_v27  ;;  %v3654_v5 = vadd.f32 %v3653_v42, %v3652_v48  ;;  %v3852_v32 = vmul.f32 %v5679_v13, %v5907_v1  ;;  %v3903_v6 = vadd.f32 %v3850_v34, %v3839_v38 }
 0x1e8   :  { %v3645_v40 = vrot.slane %v3644_v23, 2  ;;  %v3674_v33 = vadd.f32 %v3673_v36, %v3672_v28  ;;  %v3665_v9 = vrot.slane %v3664_v15, 2  ;;  %v3860_v43 = vmul.f32 %v5694_v16, %v7080_v29  ;;  %v1918_v36 = vpop.f32.mrf.mxu1 }
 0x1e9   :  { %v3862_v2 = vmul.f32 %v5706_v4, %v5924_v41  ;;  %v3655_v18 = vrot.slane %v3654_v5, 2  ;;  %v3923_v27 = vadd.f32 %v3852_v32, %v3841_v63  ;;  %v3861_v28 = vmul.f32 %v5726_v37, %v5909_v53  ;;  %v5983_v13 = vpop.f32.mrf.mxu0 }
 0x1ea   :  { %v3646_v8 = vadd.f32 %v3645_v40, %v3644_v23  ;;  %v3675_v51 = vrot.slane %v3674_v33, 2  ;;  %v3666_v17 = vadd.f32 %v3665_v9, %v3664_v15  ;;  %v3894_v54 = vadd.f32 %v3893_v0, %v3860_v43  ;;  %v7081_v9 = vld [vmem:[#allocation11_spill] sm:$0xff] }
 0x1eb   :  { %v3914_v48 = vadd.f32 %v3913_v3, %v3862_v2  ;;  %v3656_v57 = vadd.f32 %v3655_v18, %v3654_v5  ;;  %v3863_v16 = vmul.f32 %v5735_v52, %v5938_v22  ;;  %v3904_v41 = vadd.f32 %v3903_v6, %v3861_v28  ;;  %v5990_v12 = vpop.f32.mrf.mxu0  ;;  %v7082_v6 = vld [vmem:[#allocation10_spill] sm:$0xff] }
 0x1ec   :  { %v3647_v1 = vrot.slane %v3646_v8, 1  ;;  %v3676_v38 = vadd.f32 %v3675_v51, %v3674_v33  ;;  %v3667_v4 = vrot.slane %v3666_v17, 1  ;;  %v3871_v24 = vmul.f32 %v5747_v11, %v5926_v44 }
 0x1ed   :  { %v3873_v31 = vmul.f32 %v5750_v21, %v1912_v49  ;;  %v3657_v42 = vrot.slane %v3656_v57, 1  ;;  %v3924_v53 = vadd.f32 %v3923_v27, %v3863_v16  ;;  %v3872_v52 = vmul.f32 %v5762_v30, %v5942_v50  ;;  %v5994_v22 = vpop.f32.mrf.mxu0 }
 0x1ee   :  { %v3648_v23 = vadd.f32 %v3647_v1, %v3646_v8  ;;  %v3677_v37 = vrot.slane %v3676_v38, 1  ;;  %v3668_v7 = vadd.f32 %v3667_v4, %v3666_v17  ;;  %v3895_v45 = vadd.f32 %v3894_v54, %v3871_v24 }
 0x1ef   :  { %v3915_v63 = vadd.f32 %v3914_v48, %v3873_v31  ;;  %v3658_v15 = vadd.f32 %v3657_v42, %v3656_v57  ;;  %v3874_v11 = vmul.f32 %v5776_v59, %v1914_v39  ;;  %v3882_v21 = vmul.f32 %v5790_v58, %v1783_v55  ;;  %v6001_v34 = vpop.f32.mrf.mxu0  ;;  %v7083_v58 = vld [vmem:[#allocation12_spill] sm:$0xff]  ;;  %v4222_v48 = vld [vmem:[%s6921_s1 + $0x8] sm:$0xff]  ;;  %v4223_v57 = vld [vmem:[%s6921_s1 + $0x10] sm:$0x3f] }
 0x1f0   :  { %v3678_v0 = vadd.f32 %v3677_v37, %v3676_v38  ;;  %v3905_v44 = vadd.f32 %v3904_v41, %v3872_v52  ;;  %v3884_v49 = vmul.f32 %v5797_v61, %v1916_v56  ;;  %v3883_v3 = vmul.f32 %v5814_v25, %v1785_v10 }
 0x1f1   :  { %v3885_v60 = vmul.f32 %v5837_v35, %v1918_v36  ;;  %v3760_v40 = vcombine.low %v3648_v23, %v3658_v15  ;;  %v3925_v30 = vadd.f32 %v3924_v53, %v3874_v11  ;;  %v3896_v50 = vadd.f32 %v3895_v45, %v3882_v21  ;;  %v6005_v39 = vpop.f32.mrf.mxu0 }
 0x1f2   :  { %v3761_v5 = vcombine.low %v3668_v7, %v3678_v0  ;;  %v3916_v33 = vadd.f32 %v3915_v63, %v3884_v49  ;;  %v3906_v32 = vadd.f32 %v3905_v44, %v3883_v3  ;;  %v90_v59 = vmul.f32 %v7082_v6, %v7081_v9 }
 0x1f3   :  { %v91_v61 = vmul.f32 %v7083_v58, %v7081_v9  ;;  %v3770_v25 = vrot.slane %v3760_v40, %v5825_v26  ;;  %v3897_v55 = vrot.slane %v3896_v50, 4  ;;  %v3926_v10 = vadd.f32 %v3925_v30, %v3885_v60  ;;  %v6011_v8 = vpop.f32.mrf.mxu0 }
 0x1f4   :  { %v3777_v35 = vrot.slane %v3761_v5, %v5825_v26  ;;  %v3917_v29 = vrot.slane %v3916_v33, 4  ;;  %v3907_v43 = vrot.slane %v3906_v32, 4  ;;  %v96_v2 = vrot.slane %v90_v59, 7 }
 0x1f5   :  { %v97_v18 = vrot.slane %v91_v61, 7  ;;  %v3898_v27 = vadd.f32 %v3897_v55, %v3896_v50  ;;  %v3927_v56 = vrot.slane %v3926_v10, 4  ;;  %v6016_v1 = vpop.f32.mrf.mxu0  ;;  %v6037_v5 = vrot.slane %v3281_v46, %v5825_v26 }
 0x1f6   :  { %v3792_v51 = vcombine.low %v3770_v25, %v3777_v35  ;;  %v3918_v17 = vadd.f32 %v3917_v29, %v3916_v33  ;;  %v3908_v54 = vadd.f32 %v3907_v43, %v3906_v32  ;;  %v102_v28 = vadd.f32 %v4222_v48, %v96_v2  ;;  %v6021_v41 = vpop.f32.mrf.mxu1  ;;  %v7088_v43 = vld [vmem:[#allocation13_spill] sm:$0xff] }
 0x1f7   :  { %v103_v38 = vadd.f32 %v4223_v57, %v97_v18  ;;  %v3899_v16 = vrot.slane %v3898_v27, 2  ;;  %v3928_v4 = vadd.f32 %v3927_v56, %v3926_v10  ;;  %v6023_v42 = vpop.f32.mrf.mxu0  ;;  %7084 = vst [vmem:[#allocation32_spill] sm:$0xff] %v6037_v5  ;;  %v6047_v25 = vrot.slane %v3538_v14, %v5825_v26  ;;  %v7089_v56 = vld [vmem:[#allocation14_spill] sm:$0xff]  ;;  %v7093_v57 = vld [vmem:[#allocation16_spill] sm:$0xff] }
 0x1f8   :  { %v3919_v24 = vrot.slane %v3918_v17, 2  ;;  %v3909_v31 = vrot.slane %v3908_v54, 2  ;;  %v2434_v23 = vadd.f32 1.0, %v102_v28  ;;  %v6025_v7 = vpop.f32.mrf.mxu1  ;;  %v6050_v19 = vrot.slane %v3792_v51, %v5825_v26 }
 0x1f9   :  { %v2435_v37 = vadd.f32 1.0, %v103_v38  ;;  %v3900_v53 = vadd.f32 %v3899_v16, %v3898_v27  ;;  %v3929_v36 = vrot.slane %v3928_v4, 2  ;;  %v6027_v15 = vpop.f32.mrf.mxu0  ;;  %7085 = vst [vmem:[#allocation31_spill] sm:$0xff] %v6047_v25 }
 0x1fa   :  { %v3920_v45 = vadd.f32 %v3919_v24, %v3918_v17  ;;  %v3910_v63 = vadd.f32 %v3909_v31, %v3908_v54  ;;  %v2437_v52 = vmul.f32 17.5, %v2434_v23  ;;  %v6029_v44 = vpop.f32.mrf.mxu1  ;;  %7086 = vst [vmem:[#allocation34_spill] sm:$0xff] %v6050_v19 }
 0x1fb   :  { %v2438_v0 = vmul.f32 17.5, %v2435_v37  ;;  %v3901_v11 = vrot.slane %v3900_v53, 1  ;;  %v3930_v21 = vadd.f32 %v3929_v36, %v3928_v4  ;;  %v6031_v40 = vpop.f32.mrf.mxu0 }
 0x1fc   :  { %v3921_v49 = vrot.slane %v3920_v45, 1  ;;  %v3911_v3 = vrot.slane %v3910_v63, 1  ;;  %v2440_v60 = vfloor.f32 %v2437_v52  ;;  %v6039_v33 = vpop.f32.mrf.mxu1 }
 0x1fd   :  { %v3902_v30 = vadd.f32 %v3901_v11, %v3900_v53  ;;  %v3931_v50 = vrot.slane %v3930_v21, 1  ;;  %v2441_v32 = vfloor.f32 %v2438_v0  ;;  %v6041_v61 = vpop.f32.mrf.mxu0 }
 0x1fe   :  { %v3922_v9 = vadd.f32 %v3921_v49, %v3920_v45  ;;  %v3912_v6 = vadd.f32 %v3911_v3, %v3910_v63  ;;  %v2443_v59 = vsub.f32 %v2437_v52, %v2440_v60  ;;  %v4183_v58 = vtrunc.f32 %v2440_v60  ;;  %v6052_v46 = vpop.f32.mrf.mxu1  ;;  %v7095_v60 = vld [vmem:[#allocation5_spill] sm:$0xff] }
 0x1ff   :  { %v3932_v20 = vadd.f32 %v3931_v50, %v3930_v21  ;;  %v6054_v35 = vsub.f32 %v2438_v0, %v2441_v32  ;;  %v6057_v18 = vpop.f32.mrf.mxu0  ;;  %v6063_v51 = vtrunc.f32 %v2441_v32 }
 0x200   :  { %v4014_v55 = vcombine.low %v3902_v30, %v3912_v6  ;;  %v2446_v10 = vsub.f32 1.0, %v2443_v59  ;;  %v4184_v29 = vcvt.f32.s32 %v4183_v58  ;;  %v2883_v2 = vrot.slane %v2443_v59, %v7088_v43  ;;  %v6061_v17 = vpop.f32.mrf.mxu1 }
 0x201   :  { %7087 = vst [vmem:[#allocation33_spill] sm:$0xff] %v6054_v35  ;;  %v4015_v27 = vcombine.low %v3922_v9, %v3932_v20  ;;  %v2891_v47 = vrot.slane %v2443_v59, %v7089_v56  ;;  %v2887_v14 = vrot.slane %v2443_v59, %v7090_v62  ;;  %7091 = vst [vmem:[#allocation36_spill] sm:$0xff] %v6063_v51  ;;  %v6071_v16 = vpop.f32.mrf.mxu0 }
 0x202   :  { %v6066_v54 = vrot.slane %v4014_v55, %v5825_v26  ;;  %v2470_v48 = vrot.slane %v4184_v29, %v7088_v43  ;;  %v2671_v28 = vrot.slane %v2446_v10, %v7088_v43  ;;  %v2895_v38 = vrot.slane %v2443_v59, %v7093_v57  ;;  %v6081_v37 = vpop.f32.mrf.mxu1 }
 0x203   :  { %v6074_v4 = vrot.slane %v4015_v27, %v5825_v26  ;;  %v6077_v24 = vrot.slane %v2883_v2, %v7088_v43  ;;  %v2478_v31 = vrot.slane %v4184_v29, %v7089_v56  ;;  %v2679_v23 = vrot.slane %v2446_v10, %v7089_v56  ;;  %v6091_v52 = vpop.f32.mrf.mxu0 }
 0x204   :  { %7092 = vst [vmem:[#allocation35_spill] sm:$0xff] %v6066_v54  ;;  %v6084_v53 = vrot.slane %v2470_v48, %v7088_v43  ;;  %v6087_v36 = vrot.slane %v2891_v47, %v7088_v43  ;;  %v2474_v45 = vrot.slane %v4184_v29, %v7090_v62  ;;  %v2675_v63 = vrot.slane %v2446_v10, %v7090_v62  ;;  %v6104_v3 = vpop.f32.mrf.mxu1 }
 0x205   :  { %7094 = vst [vmem:[#allocation19_spill] sm:$0xff] %v6074_v4  ;;  %v6096_v11 = vrot.slane %v2671_v28, %v7088_v43  ;;  %v6099_v21 = vrot.slane %v2478_v31, %v7088_v43  ;;  %v6102_v49 = vrot.slane %v2679_v23, %v7088_v43  ;;  %v6112_v32 = vrot.slane %v2887_v14, %v7088_v43  ;;  %v6115_v6 = vpop.f32.mrf.mxu0 }
 0x206   :  { %v2543_v30 = vsub.s32 %v7095_v60, %v6084_v53  ;;  %v6109_v50 = vrot.slane %v2474_v45, %v7088_v43  ;;  %v2482_v9 = vrot.slane %v4184_v29, %v7093_v57  ;;  %v6120_v58 = vrot.slane %v2675_v63, %v7088_v43  ;;  %v6126_v2 = vpop.f32.mrf.mxu1 }
 0x207   :  { %v2545_v59 = vsub.s32 %v7095_v60, %v6099_v21  ;;  %v2683_v20 = vrot.slane %v2446_v10, %v7093_v57  ;;  %v6124_v55 = vrot.slane %v2895_v38, %v7088_v43  ;;  %v6133_v47 = vpop.f32.mrf.mxu0 }
 0x208   :  { %vm2598_vm8 = vcmp.eq.s32.totalorder %v2543_v30, 0  ;;  %vm2810_vm9 = vcmp.eq.s32.totalorder %v2543_v30, 1  ;;  %v2544_v29 = vsub.s32 %v7095_v60, %v6109_v50  ;;  %v6131_v27 = vrot.slane %v2482_v9, %v7088_v43  ;;  %7096 = vst [vmem:[#allocation20_spill] sm:$0xff] %v6133_v47  ;;  %v6137_v10 = vpop.f32.mrf.mxu1 }
 0x209   :  { %v2755_v14 = vsel %vm2598_vm8, %v6096_v11, 0.0  ;;  %v2967_v48 = vsel %vm2810_vm9, %v6077_v24, 0.0  ;;  %vm2600_vm10 = vcmp.eq.s32.totalorder %v2545_v59, 0  ;;  %vm2812_vm11 = vcmp.eq.s32.totalorder %v2545_v59, 1  ;;  %v6143_v31 = vpop.f32.mrf.mxu0 }
 0x20a   :  { %v6139_v28 = vadd.f32 %v2967_v48, %v2755_v14  ;;  %v2757_v57 = vsel %vm2600_vm10, %v6102_v49, 0.0  ;;  %v2969_v38 = vsel %vm2812_vm11, %v6087_v36, 0.0  ;;  %vm2599_vm12 = vcmp.eq.s32.totalorder %v2544_v29, 0  ;;  %7097 = vst [vmem:[#allocation37_spill] sm:$0xff] %v6143_v31  ;;  %v6150_v30 = vpop.f32.mrf.mxu1  ;;  %v7098_v48 = vld [vmem:[#allocation9_spill] sm:$0xff] }
 0x20b   :  { %v6145_v23 = vadd.f32 %v2969_v38, %v2757_v57  ;;  %v2756_v45 = vsel %vm2599_vm12, %v6120_v58, 0.0  ;;  %vm2811_vm13 = vcmp.eq.s32.totalorder %v2544_v29, 1  ;;  %v2546_v63 = vsub.s32 %v7095_v60, %v6131_v27  ;;  %v6160_v38 = vpop.f32.mrf.mxu0 }
 0x20c   :  { %v3077_v9 = vmul.f32 %v6139_v28, %v5983_v13  ;;  %v2968_v59 = vsel %vm2811_vm13, %v6112_v32, 0.0  ;;  %v6156_v14 = vrot.slane %v2683_v20, %v7088_v43  ;;  %v2554_v57 = vsub.s32 %v7098_v48, %v6084_v53  ;;  %7099 = vst [vmem:[#allocation18_spill] sm:$0xff] %v6160_v38  ;;  %v6166_v56 = vpop.f32.mrf.mxu1 }
 0x20d   :  { %v3079_v29 = vmul.f32 %v6145_v23, %v6021_v41  ;;  %v6164_v0 = vadd.f32 %v2968_v59, %v2756_v45  ;;  %vm2601_vm14 = vcmp.eq.s32.totalorder %v2546_v63, 0  ;;  %vm2813_vm15 = vcmp.eq.s32.totalorder %v2546_v63, 1  ;;  %v6170_v20 = vpop.f32.mrf.mxu0 }
 0x20e   :  { %v2758_v13 = vsel %vm2601_vm14, %v6156_v14, 0.0  ;;  %v2970_v4 = vsel %vm2813_vm15, %v6124_v55, 0.0  ;;  %vm2609_vm0 = vcmp.eq.s32.totalorder %v2554_v57, 0  ;;  %vm2821_vm1 = vcmp.eq.s32.totalorder %v2554_v57, 1  ;;  %7100 = vst [vmem:[#allocation21_spill] sm:$0xff] %v6170_v20  ;;  %v6178_v63 = vpop.f32.mrf.mxu1 }
 0x20f   :  { %v3078_v54 = vmul.f32 %v6164_v0, %v5990_v12  ;;  %v6174_v60 = vadd.f32 %v2970_v4, %v2758_v13  ;;  %v2766_v41 = vsel %vm2609_vm0, %v6096_v11, 0.0  ;;  %v2978_v45 = vsel %vm2821_vm1, %v6077_v24, 0.0  ;;  %v6188_v12 = vpop.f32.mrf.mxu0  ;;  %v7103_v13 = vld [vmem:[#allocation7_spill] sm:$0xff] }
 0x210   :  { %v6180_v59 = vadd.f32 %v2978_v45, %v2766_v41  ;;  %v2556_v19 = vsub.s32 %v7098_v48, %v6099_v21  ;;  %v2555_v57 = vsub.s32 %v7098_v48, %v6109_v50  ;;  %v2557_v62 = vsub.s32 %v7098_v48, %v6131_v27  ;;  %7102 = vst [vmem:[#allocation40_spill] sm:$0xff] %v6188_v12  ;;  %v6198_v51 = vpop.f32.mrf.mxu1 }
 0x211   :  { %7101 = vst [vmem:[#allocation38_spill] sm:$0xff] %v6174_v60  ;;  %v3080_v4 = vmul.f32 %v6174_v60, %v6025_v7  ;;  %v2565_v43 = vsub.s32 %v7103_v13, %v6084_v53  ;;  %v2567_v41 = vsub.s32 %v7103_v13, %v6099_v21  ;;  %v2566_v45 = vsub.s32 %v7103_v13, %v6109_v50  ;;  %v6202_v48 = vpop.f32.mrf.mxu0 }
 0x212   :  { %v3088_v35 = vmul.f32 %v6180_v59, %v5994_v22  ;;  %vm2611_vm2 = vcmp.eq.s32.totalorder %v2556_v19, 0  ;;  %vm2823_vm3 = vcmp.eq.s32.totalorder %v2556_v19, 1  ;;  %vm2610_vm4 = vcmp.eq.s32.totalorder %v2555_v57, 0  ;;  %7104 = vst [vmem:[#allocation39_spill] sm:$0xff] %v6202_v48  ;;  %v6207_v26 = vpop.f32.mrf.mxu1 }
 0x213   :  { %v2768_v7 = vsel %vm2611_vm2, %v6102_v49, 0.0  ;;  %v2980_v25 = vsel %vm2823_vm3, %v6087_v36, 0.0  ;;  %v2767_v5 = vsel %vm2610_vm4, %v6120_v58, 0.0  ;;  %vm2822_vm5 = vcmp.eq.s32.totalorder %v2555_v57, 1  ;;  %v6212_v22 = vpop.f32.mrf.mxu0 }
 0x214   :  { %v3168_v12 = vadd.f32 %v3088_v35, %v3077_v9  ;;  %v6209_v20 = vadd.f32 %v2980_v25, %v2768_v7  ;;  %v2979_v38 = vsel %vm2822_vm5, %v6112_v32, 0.0  ;;  %vm2612_vm6 = vcmp.eq.s32.totalorder %v2557_v62, 0  ;;  %7105 = vst [vmem:[#allocation42_spill] sm:$0xff] %v6212_v22  ;;  %v6217_v31 = vpop.f32.mrf.mxu1 }
 0x215   :  { %v6214_v19 = vadd.f32 %v2979_v38, %v2767_v5  ;;  %v2769_v48 = vsel %vm2612_vm6, %v6156_v14, 0.0  ;;  %vm2824_vm7 = vcmp.eq.s32.totalorder %v2557_v62, 1  ;;  %vm2620_vm8 = vcmp.eq.s32.totalorder %v2565_v43, 0  ;;  %7106 = vst [vmem:[#allocation41_spill] sm:$0xff] %v6217_v31  ;;  %v6223_v9 = vpop.f32.mrf.mxu0 }
 0x216   :  { %v3090_v57 = vmul.f32 %v6209_v20, %v6029_v44  ;;  %v2981_v35 = vsel %vm2824_vm7, %v6124_v55, 0.0  ;;  %v2777_v25 = vsel %vm2620_vm8, %v6096_v11, 0.0  ;;  %vm2832_vm9 = vcmp.eq.s32.totalorder %v2565_v43, 1  ;;  %7107 = vst [vmem:[#allocation44_spill] sm:$0xff] %v6223_v9  ;;  %v6230_v7 = vpop.f32.mrf.mxu1 }
 0x217   :  { %v3089_v5 = vmul.f32 %v6214_v19, %v6001_v34  ;;  %v6227_v38 = vadd.f32 %v2981_v35, %v2769_v48  ;;  %v2989_v62 = vsel %vm2832_vm9, %v6077_v24, 0.0  ;;  %vm2622_vm10 = vcmp.eq.s32.totalorder %v2567_v41, 0  ;;  %v6235_v47 = vpop.f32.mrf.mxu0 }
 0x218   :  { %v3188_v22 = vadd.f32 %v3090_v57, %v3079_v29  ;;  %v6232_v31 = vadd.f32 %v2989_v62, %v2777_v25  ;;  %v2779_v44 = vsel %vm2622_vm10, %v6102_v49, 0.0  ;;  %vm2834_vm11 = vcmp.eq.s32.totalorder %v2567_v41, 1  ;;  %7108 = vst [vmem:[#allocation43_spill] sm:$0xff] %v6235_v47  ;;  %v6240_v48 = vpop.f32.mrf.mxu1 }
 0x219   :  { %v3178_v43 = vadd.f32 %v3089_v5, %v3078_v54  ;;  %v3091_v9 = vmul.f32 %v6227_v38, %v6039_v33  ;;  %v2991_v34 = vsel %vm2834_vm11, %v6087_v36, 0.0  ;;  %vm2621_vm12 = vcmp.eq.s32.totalorder %v2566_v45, 0  ;;  %7109 = vst [vmem:[#allocation22_spill] sm:$0xff] %v6240_v48  ;;  %v7110_v33 = vld [vmem:[#allocation8_spill] sm:$0xff]  ;;  %v6254_v47 = vpop.f32.mrf.mxu0 }
 0x21a   :  { %v3099_v35 = vmul.f32 %v6232_v31, %v6005_v39  ;;  %v6244_v29 = vadd.f32 %v2991_v34, %v2779_v44  ;;  %v2778_v57 = vsel %vm2621_vm12, %v6120_v58, 0.0  ;;  %vm2833_vm13 = vcmp.eq.s32.totalorder %v2566_v45, 1  ;;  %v6252_v62 = vpop.f32.mrf.mxu1  ;;  %7111 = vst [vmem:[#allocation45_spill] sm:$0xff] %v6254_v47 }
 0x21b   :  { %v3198_v41 = vadd.f32 %v3091_v9, %v3080_v4  ;;  %v2990_v25 = vsel %vm2833_vm13, %v6112_v32, 0.0  ;;  %v2568_v54 = vsub.s32 %v7103_v13, %v6131_v27  ;;  %v2576_v5 = vsub.s32 %v7110_v33, %v6084_v53  ;;  %v6264_v9 = vpop.f32.mrf.mxu0 }
 0x21c   :  { %v3169_v48 = vadd.f32 %v3168_v12, %v3099_v35  ;;  %v3101_v39 = vmul.f32 %v6244_v29, %v6052_v46  ;;  %v6258_v44 = vadd.f32 %v2990_v25, %v2778_v57  ;;  %v2578_v4 = vsub.s32 %v7110_v33, %v6099_v21  ;;  %v6262_v45 = vpop.f32.mrf.mxu1  ;;  %7112 = vst [vmem:[#allocation24_spill] sm:$0xff] %v6264_v9 }
 0x21d   :  { %vm2623_vm14 = vcmp.eq.s32.totalorder %v2568_v54, 0  ;;  %vm2835_vm15 = vcmp.eq.s32.totalorder %v2568_v54, 1  ;;  %vm2631_vm0 = vcmp.eq.s32.totalorder %v2576_v5, 0  ;;  %vm2843_vm1 = vcmp.eq.s32.totalorder %v2576_v5, 1  ;;  %v6276_v13 = vpop.f32.mrf.mxu0 }
 0x21e   :  { %v3189_v34 = vadd.f32 %v3188_v22, %v3101_v39  ;;  %v3100_v12 = vmul.f32 %v6258_v44, %v6011_v8  ;;  %v2780_v35 = vsel %vm2623_vm14, %v6156_v14, 0.0  ;;  %v2992_v46 = vsel %vm2835_vm15, %v6124_v55, 0.0  ;;  %v6274_v5 = vpop.f32.mrf.mxu1  ;;  %7114 = vst [vmem:[#allocation27_spill] sm:$0xff] %v6276_v13 }
 0x21f   :  { %v6270_v57 = vadd.f32 %v2992_v46, %v2780_v35  ;;  %v2788_v25 = vsel %vm2631_vm0, %v6096_v11, 0.0  ;;  %v3000_v54 = vsel %vm2843_vm1, %v6077_v24, 0.0  ;;  %vm2633_vm2 = vcmp.eq.s32.totalorder %v2578_v4, 0  ;;  %7113 = vst [vmem:[#allocation29_spill] sm:$0xff] %v6274_v5 }
 0x220   :  { %v3179_v9 = vadd.f32 %v3178_v43, %v3100_v12  ;;  %v6278_v22 = vadd.f32 %v3000_v54, %v2788_v25  ;;  %v2790_v8 = vsel %vm2633_vm2, %v6102_v49, 0.0  ;;  %vm2845_vm3 = vcmp.eq.s32.totalorder %v2578_v4, 1  ;;  %v6288_v5 = vpop.f32.mrf.mxu1  ;;  %v7116_v4 = vld [vmem:[#allocation6_spill] sm:$0xff] }
 0x221   :  { %v3102_v39 = vmul.f32 %v6270_v57, %v6061_v17  ;;  %v3002_v35 = vsel %vm2845_vm3, %v6087_v36, 0.0  ;;  %v2577_v46 = vsub.s32 %v7110_v33, %v6109_v50  ;;  %v2579_v47 = vsub.s32 %v7110_v33, %v6131_v27  ;;  %7115 = vst [vmem:[#allocation25_spill] sm:$0xff] %v6288_v5  ;;  %v6300_v33 = vpop.f32.mrf.mxu0 }
 0x222   :  { %v3110_v43 = vmul.f32 %v6278_v22, %v6016_v1  ;;  %v6292_v12 = vadd.f32 %v3002_v35, %v2790_v8  ;;  %v2587_v25 = vsub.s32 %v7116_v4, %v6084_v53  ;;  %v2589_v17 = vsub.s32 %v7116_v4, %v6099_v21  ;;  %v6298_v13 = vpop.f32.mrf.mxu1  ;;  %7117 = vst [vmem:[#allocation28_spill] sm:$0xff] %v6300_v33 }
 0x223   :  { %v3199_v54 = vadd.f32 %v3198_v41, %v3102_v39  ;;  %vm2632_vm4 = vcmp.eq.s32.totalorder %v2577_v46, 0  ;;  %vm2844_vm5 = vcmp.eq.s32.totalorder %v2577_v46, 1  ;;  %vm2634_vm6 = vcmp.eq.s32.totalorder %v2579_v47, 0 }
 0x224   :  { %v3170_v5 = vadd.f32 %v3169_v48, %v3110_v43  ;;  %v3112_v1 = vmul.f32 %v6292_v12, %v6081_v37  ;;  %v2789_v8 = vsel %vm2632_vm4, %v6120_v58, 0.0  ;;  %v3001_v35 = vsel %vm2844_vm5, %v6112_v32, 0.0  ;;  %v6309_v41 = vpop.f32.mrf.mxu1 }
 0x225   :  { %v6306_v53 = vadd.f32 %v3001_v35, %v2789_v8  ;;  %v2791_v21 = vsel %vm2634_vm6, %v6156_v14, 0.0  ;;  %vm2846_vm7 = vcmp.eq.s32.totalorder %v2579_v47, 1  ;;  %vm2642_vm8 = vcmp.eq.s32.totalorder %v2587_v25, 0  ;;  %v6320_v47 = vpop.f32.mrf.mxu0 }
 0x226   :  { %v3190_v39 = vadd.f32 %v3189_v34, %v3112_v1  ;;  %v3003_v46 = vsel %vm2846_vm7, %v6124_v55, 0.0  ;;  %v2799_v48 = vsel %vm2642_vm8, %v6096_v11, 0.0  ;;  %vm2854_vm9 = vcmp.eq.s32.totalorder %v2587_v25, 1  ;;  %v6318_v35 = vpop.f32.mrf.mxu1 }
 0x227   :  { %v3111_v37 = vmul.f32 %v6306_v53, %v6023_v42  ;;  %v6315_v43 = vadd.f32 %v3003_v46, %v2791_v21  ;;  %v3011_v8 = vsel %vm2854_vm9, %v6077_v24, 0.0  ;;  %vm2644_vm10 = vcmp.eq.s32.totalorder %v2589_v17, 0 }
 0x228   :  { %v6322_v33 = vadd.f32 %v3011_v8, %v2799_v48  ;;  %v2801_v34 = vsel %vm2644_vm10, %v6102_v49, 0.0  ;;  %vm2856_vm11 = vcmp.eq.s32.totalorder %v2589_v17, 1  ;;  %v2588_v11 = vsub.s32 %v7116_v4, %v6109_v50  ;;  %v6332_v21 = vpop.f32.mrf.mxu1 }
 0x229   :  { %v3180_v25 = vadd.f32 %v3179_v9, %v3111_v37  ;;  %v3113_v42 = vmul.f32 %v6315_v43, %v6104_v3  ;;  %v3013_v1 = vsel %vm2856_vm11, %v6087_v36, 0.0  ;;  %v2590_v24 = vsub.s32 %v7116_v4, %v6131_v27  ;;  %v6342_v36 = vpop.f32.mrf.mxu0 }
 0x22a   :  { %v3121_v46 = vmul.f32 %v6322_v33, %v6027_v15  ;;  %v6336_v48 = vadd.f32 %v3013_v1, %v2801_v34  ;;  %vm2643_vm12 = vcmp.eq.s32.totalorder %v2588_v11, 0  ;;  %vm2855_vm13 = vcmp.eq.s32.totalorder %v2588_v11, 1  ;;  %v6340_v3 = vpop.f32.mrf.mxu1 }
 0x22b   :  { %v3200_v49 = vadd.f32 %v3199_v54, %v3113_v42  ;;  %v2800_v50 = vsel %vm2643_vm12, %v6120_v58, 0.0  ;;  %v3012_v9 = vsel %vm2855_vm13, %v6112_v32, 0.0  ;;  %vm2645_vm14 = vcmp.eq.s32.totalorder %v2590_v24, 0  ;;  %v6370_v1 = vpop.f32.mrf.mxu0 }
 0x22c   :  { %v3171_v27 = vadd.f32 %v3170_v5, %v3121_v46  ;;  %v3123_v17 = vmul.f32 %v6336_v48, %v6126_v2  ;;  %v6346_v37 = vadd.f32 %v3012_v9, %v2800_v50  ;;  %v2802_v15 = vsel %vm2645_vm14, %v6156_v14, 0.0  ;;  %v6355_v8 = vpop.f32.mrf.mxu1 }
 0x22d   :  { %vm2857_vm15 = vcmp.eq.s32.totalorder %v2590_v24, 1  ;;  %v3334_v54 = vmul.f32 %v6139_v28, %v6041_v61  ;;  %v3336_v32 = vmul.f32 %v6145_v23, %v6150_v30  ;;  %v3335_v58 = vmul.f32 %v6164_v0, %v6057_v18 }
 0x22e   :  { %v3172_v5 = vrot.slane %v3171_v27, 4  ;;  %v3191_v34 = vadd.f32 %v3190_v39, %v3123_v17  ;;  %v3122_v2 = vmul.f32 %v6346_v37, %v6031_v40  ;;  %v3014_v11 = vsel %vm2857_vm15, %v6124_v55, 0.0  ;;  %v6368_v42 = vpop.f32.mrf.mxu1 }
 0x22f   :  { %v6360_v14 = vadd.f32 %v3014_v11, %v2802_v15  ;;  %v3337_v61 = vmul.f32 %v6174_v60, %v6166_v56  ;;  %v3345_v30 = vmul.f32 %v6180_v59, %v6071_v16  ;;  %v3347_v18 = vmul.f32 %v6209_v20, %v6178_v63 }
 0x230   :  { %v3173_v39 = vadd.f32 %v3172_v5, %v3171_v27  ;;  %v3192_v24 = vrot.slane %v3191_v34, 4  ;;  %v3181_v40 = vadd.f32 %v3180_v25, %v3122_v2  ;;  %v3346_v55 = vmul.f32 %v6214_v19, %v6091_v52  ;;  %v6382_v27 = vpop.f32.mrf.mxu1 }
 0x231   :  { %v3124_v46 = vmul.f32 %v6360_v14, %v6137_v10  ;;  %v3425_v56 = vadd.f32 %v3345_v30, %v3334_v54  ;;  %v3445_v50 = vadd.f32 %v3347_v18, %v3336_v32  ;;  %v3348_v16 = vmul.f32 %v6227_v38, %v6198_v51  ;;  %v6384_v10 = vpop.f32.mrf.mxu0  ;;  %v7118_v51 = vld [vmem:[#allocation20_spill] sm:$0xff] }
 0x232   :  { %v3174_v9 = vrot.slane %v3173_v39, 2  ;;  %v3193_v63 = vadd.f32 %v3192_v24, %v3191_v34  ;;  %v3182_v17 = vrot.slane %v3181_v40, 4  ;;  %v3435_v15 = vadd.f32 %v3346_v55, %v3335_v58 }
 0x233   :  { %v3201_v11 = vadd.f32 %v3200_v49, %v3124_v46  ;;  %v3455_v4 = vadd.f32 %v3348_v16, %v3337_v61  ;;  %v3356_v25 = vmul.f32 %v6232_v31, %v6115_v6  ;;  %v3358_v52 = vmul.f32 %v6244_v29, %v6207_v26  ;;  %v7119_v61 = vld [vmem:[#allocation41_spill] sm:$0xff] }
 0x234   :  { %v3175_v54 = vadd.f32 %v3174_v9, %v3173_v39  ;;  %v3194_v32 = vrot.slane %v3193_v63, 2  ;;  %v3183_v5 = vadd.f32 %v3182_v17, %v3181_v40  ;;  %v3357_v34 = vmul.f32 %v6258_v44, %v7118_v51  ;;  %v7120_v16 = vld [vmem:[#allocation37_spill] sm:$0xff]  ;;  %v6394_v9 = vpop.f32.mrf.mxu1  ;;  %v6396_v17 = vpop.f32.mrf.mxu0 }
 0x235   :  { %v3202_v2 = vrot.slane %v3201_v11, 4  ;;  %v3426_v58 = vadd.f32 %v3425_v56, %v3356_v25  ;;  %v3446_v49 = vadd.f32 %v3445_v50, %v3358_v52  ;;  %v3359_v30 = vmul.f32 %v6270_v57, %v7119_v61  ;;  %7121 = vst [vmem:[#allocation17_spill] sm:$0xff] %v6396_v17  ;;  %v7122_v52 = vld [vmem:[#allocation18_spill] sm:$0xff] }
 0x236   :  { %v3176_v6 = vrot.slane %v3175_v54, 1  ;;  %v3195_v18 = vadd.f32 %v3194_v32, %v3193_v63  ;;  %v3184_v24 = vrot.slane %v3183_v5, 2  ;;  %v3436_v26 = vadd.f32 %v3435_v15, %v3357_v34 }
 0x237   :  { %v3203_v55 = vadd.f32 %v3202_v2, %v3201_v11  ;;  %v3456_v46 = vadd.f32 %v3455_v4, %v3359_v30  ;;  %v3367_v39 = vmul.f32 %v6278_v22, %v7120_v16  ;;  %v3369_v40 = vmul.f32 %v6292_v12, %v6230_v7  ;;  %v7123_v4 = vld [vmem:[#allocation22_spill] sm:$0xff]  ;;  %v7124_v7 = vld [vmem:[#allocation21_spill] sm:$0xff] }
 0x238   :  { %v3177_v56 = vadd.f32 %v3176_v6, %v3175_v54  ;;  %v3196_v50 = vrot.slane %v3195_v18, 1  ;;  %v3185_v25 = vadd.f32 %v3184_v24, %v3183_v5  ;;  %v3368_v63 = vmul.f32 %v6306_v53, %v7122_v52  ;;  %v7125_v5 = vld [vmem:[#allocation40_spill] sm:$0xff]  ;;  %v6408_v24 = vpop.f32.mrf.mxu1  ;;  %v7128_v52 = vld [vmem:[#allocation29_spill] sm:$0xff] }
 0x239   :  { %v3204_v32 = vrot.slane %v3203_v55, 2  ;;  %v3427_v15 = vadd.f32 %v3426_v58, %v3367_v39  ;;  %v3447_v11 = vadd.f32 %v3446_v49, %v3369_v40  ;;  %v3370_v51 = vmul.f32 %v6315_v43, %v7123_v4  ;;  %v6410_v58 = vpop.f32.mrf.mxu0 }
 0x23a   :  { %v3197_v34 = vadd.f32 %v3196_v50, %v3195_v18  ;;  %v3186_v2 = vrot.slane %v3185_v25, 1  ;;  %v3437_v61 = vadd.f32 %v3436_v26, %v3368_v63  ;;  %v3378_v30 = vmul.f32 %v6322_v33, %v7124_v7  ;;  %7126 = vst [vmem:[#allocation26_spill] sm:$0xff] %v6410_v58  ;;  %v7127_v26 = vld [vmem:[#allocation39_spill] sm:$0xff] }
 0x23b   :  { %v3205_v16 = vadd.f32 %v3204_v32, %v3203_v55  ;;  %v3457_v17 = vadd.f32 %v3456_v46, %v3370_v51  ;;  %v3380_v54 = vmul.f32 %v6336_v48, %v6252_v62  ;;  %v3379_v6 = vmul.f32 %v6346_v37, %v7125_v5  ;;  %v7129_v51 = vld [vmem:[#allocation42_spill] sm:$0xff]  ;;  %v6422_v5 = vpop.f32.mrf.mxu1  ;;  %v7135_v58 = vld [vmem:[#allocation43_spill] sm:$0xff] }
 0x23c   :  { %v3187_v49 = vadd.f32 %v3186_v2, %v3185_v25  ;;  %v3428_v39 = vadd.f32 %v3427_v15, %v3378_v30  ;;  %v3381_v18 = vmul.f32 %v6360_v14, %v6262_v45  ;;  %v3588_v40 = vmul.f32 %v6139_v28, %v7127_v26  ;;  %v7130_v30 = vld [vmem:[#allocation25_spill] sm:$0xff]  ;;  %7131 = vst [vmem:[#allocation30_spill] sm:$0xff] %v6422_v5  ;;  %v6424_v26 = vpop.f32.mrf.mxu0 }
 0x23d   :  { %v3206_v55 = vrot.slane %v3205_v16, 1  ;;  %v3448_v46 = vadd.f32 %v3447_v11, %v3380_v54  ;;  %v3438_v50 = vadd.f32 %v3437_v61, %v3379_v6  ;;  %v3590_v62 = vmul.f32 %v6145_v23, %v7128_v52  ;;  %7132 = vst [vmem:[#allocation11_spill] sm:$0xff] %v6424_v26  ;;  %v7133_v11 = vld [vmem:[#allocation23_spill] sm:$0xff] }
 0x23e   :  { %v3251_v63 = vcombine.low %v3177_v56, %v3187_v49  ;;  %v3429_v32 = vrot.slane %v3428_v39, 4  ;;  %v3458_v4 = vadd.f32 %v3457_v17, %v3381_v18  ;;  %v3589_v7 = vmul.f32 %v6164_v0, %v7129_v51  ;;  %v7134_v56 = vld [vmem:[#allocation44_spill] sm:$0xff] }
 0x23f   :  { %v3207_v25 = vadd.f32 %v3206_v55, %v3205_v16  ;;  %v3449_v15 = vrot.slane %v3448_v46, 4  ;;  %v3439_v2 = vrot.slane %v3438_v50, 4  ;;  %v3591_v45 = vmul.f32 %v6174_v60, %v7130_v30  ;;  %v6434_v60 = vpop.f32.mrf.mxu1 }
 0x240   :  { %v3273_v61 = vrot.slane %v3251_v63, %v7133_v11  ;;  %v3430_v54 = vadd.f32 %v3429_v32, %v3428_v39  ;;  %v3459_v6 = vrot.slane %v3458_v4, 4  ;;  %v3599_v17 = vmul.f32 %v6180_v59, %v7134_v56  ;;  %v6436_v56 = vpop.f32.mrf.mxu0 }
 0x241   :  { %v3252_v49 = vcombine.low %v3197_v34, %v3207_v25  ;;  %v3450_v18 = vadd.f32 %v3449_v15, %v3448_v46  ;;  %v3440_v52 = vadd.f32 %v3439_v2, %v3438_v50  ;;  %v3601_v16 = vmul.f32 %v6209_v20, %v6298_v13  ;;  %v7136_v15 = vld [vmem:[#allocation45_spill] sm:$0xff] }
 0x242   :  { %v3431_v55 = vrot.slane %v3430_v54, 2  ;;  %v3460_v51 = vadd.f32 %v3459_v6, %v3458_v4  ;;  %v3679_v30 = vadd.f32 %v3599_v17, %v3588_v40  ;;  %v3600_v5 = vmul.f32 %v6214_v19, %v7135_v58 }
 0x243   :  { %v3280_v26 = vrot.slane %v3252_v49, %v7133_v11  ;;  %v3451_v63 = vrot.slane %v3450_v18, 2  ;;  %v3441_v39 = vrot.slane %v3440_v52, 2  ;;  %v3699_v32 = vadd.f32 %v3601_v16, %v3590_v62 }
 0x244   :  { %v3432_v34 = vadd.f32 %v3431_v55, %v3430_v54  ;;  %v3461_v46 = vrot.slane %v3460_v51, 2  ;;  %v3689_v50 = vadd.f32 %v3600_v5, %v3589_v7  ;;  %v3602_v13 = vmul.f32 %v6227_v38, %v6309_v41  ;;  %v6445_v5 = vpop.f32.mrf.mxu1  ;;  %v6447_v41 = vpop.f32.mrf.mxu0 }
 0x245   :  { %v3282_v4 = vcombine.low %v3273_v61, %v3280_v26  ;;  %v3452_v40 = vadd.f32 %v3451_v63, %v3450_v18  ;;  %v3442_v25 = vadd.f32 %v3441_v39, %v3440_v52  ;;  %v3610_v58 = vmul.f32 %v6232_v31, %v7136_v15  ;;  %v7137_v52 = vld [vmem:[#allocation24_spill] sm:$0xff] }
 0x246   :  { %v3433_v2 = vrot.slane %v3432_v34, 1  ;;  %v3462_v6 = vadd.f32 %v3461_v46, %v3460_v51  ;;  %v3709_v17 = vadd.f32 %v3602_v13, %v3591_v45  ;;  %v3612_v62 = vmul.f32 %v6244_v29, %v6318_v35  ;;  %v7138_v51 = vld [vmem:[#allocation32_spill] sm:$0xff] }
 0x247   :  { %v3296_v49 = vrot.slane %v3282_v4, %v7133_v11  ;;  %v3453_v54 = vrot.slane %v3452_v40, 1  ;;  %v3443_v16 = vrot.slane %v3442_v25, 1  ;;  %v3680_v7 = vadd.f32 %v3679_v30, %v3610_v58  ;;  %v7139_v30 = vld [vmem:[#allocation27_spill] sm:$0xff]  ;;  %v7140_v58 = vld [vmem:[#allocation28_spill] sm:$0xff] }
 0x248   :  { %v3434_v26 = vadd.f32 %v3433_v2, %v3432_v34  ;;  %v3463_v61 = vrot.slane %v3462_v6, 1  ;;  %v3700_v18 = vadd.f32 %v3699_v32, %v3612_v62  ;;  %v3611_v55 = vmul.f32 %v6258_v44, %v7137_v52 }
 0x249   :  { %v3297_v45 = vcombine.low %v7138_v51, %v3296_v49  ;;  %v3454_v63 = vadd.f32 %v3453_v54, %v3452_v40  ;;  %v3444_v39 = vadd.f32 %v3443_v16, %v3442_v25  ;;  %v3613_v35 = vmul.f32 %v6270_v57, %v6332_v21  ;;  %v6465_v25 = vpop.f32.mrf.mxu1 }
 0x24a   :  { %v3464_v46 = vadd.f32 %v3463_v61, %v3462_v6  ;;  %v3690_v13 = vadd.f32 %v3689_v50, %v3611_v55  ;;  %v3621_v4 = vmul.f32 %v6278_v22, %v7139_v30  ;;  %v3623_v34 = vmul.f32 %v6292_v12, %v6340_v3  ;;  %v6467_v50 = vpop.f32.mrf.mxu0 }
 0x24b   :  { %3323 = vst [vmem:[%s6923_s3] ss:$4 sm:$0xff] %v3297_v45  ;;  %v3508_v32 = vcombine.low %v3434_v26, %v3444_v39  ;;  %v3710_v15 = vadd.f32 %v3709_v17, %v3613_v35  ;;  %v3622_v40 = vmul.f32 %v6306_v53, %v7140_v58  ;;  %v3624_v21 = vmul.f32 %v6315_v43, %v6355_v8 }
 0x24c   :  { %v3509_v2 = vcombine.low %v3454_v63, %v3464_v46  ;;  %v3681_v6 = vadd.f32 %v3680_v7, %v3621_v4  ;;  %v3701_v62 = vadd.f32 %v3700_v18, %v3623_v34  ;;  %v3632_v3 = vmul.f32 %v6322_v33, %v6320_v47  ;;  %v2049_v51 = vpop.f32.mrf.mxu0  ;;  %v7141_v46 = vld [vmem:[#allocation38_spill] sm:$0xff] }
 0x24d   :  { %v3530_v49 = vrot.slane %v3508_v32, %v7133_v11  ;;  %v3691_v54 = vadd.f32 %v3690_v13, %v3622_v40  ;;  %v3711_v17 = vadd.f32 %v3710_v15, %v3624_v21  ;;  %v3634_v16 = vmul.f32 %v6336_v48, %v6368_v42  ;;  %v2178_v42 = vpop.f32.mrf.mxu1  ;;  %v7142_v13 = vld [vmem:[#allocation17_spill] sm:$0xff]  ;;  %v7144_v15 = vld [vmem:[#allocation26_spill] sm:$0xff] }
 0x24e   :  { %v3537_v26 = vrot.slane %v3509_v2, %v7133_v11  ;;  %v3682_v8 = vadd.f32 %v3681_v6, %v3632_v3  ;;  %v3633_v61 = vmul.f32 %v6346_v37, %v6342_v36  ;;  %v3635_v7 = vmul.f32 %v6360_v14, %v6382_v27  ;;  %v2051_v21 = vpop.f32.mrf.mxu0 }
 0x24f   :  { %v3702_v18 = vadd.f32 %v3701_v62, %v3634_v16  ;;  %v3842_v47 = vmul.f32 %v6139_v28, %v6370_v1  ;;  %v3844_v52 = vmul.f32 %v6145_v23, %v6394_v9  ;;  %v3843_v55 = vmul.f32 %v6164_v0, %v6384_v10  ;;  %v7143_v28 = vld [vmem:[#allocation30_spill] sm:$0xff]  ;;  %v2180_v40 = vpop.f32.mrf.mxu1 }
 0x250   :  { %v3539_v45 = vcombine.low %v3530_v49, %v3537_v26  ;;  %v3683_v63 = vrot.slane %v3682_v8, 4  ;;  %v3692_v39 = vadd.f32 %v3691_v54, %v3633_v61  ;;  %v3712_v35 = vadd.f32 %v3711_v17, %v3635_v7  ;;  %v7146_v54 = vld [vmem:[#allocation11_spill] sm:$0xff] }
 0x251   :  { %v3703_v36 = vrot.slane %v3702_v18, 4  ;;  %v3845_v27 = vmul.f32 %v7141_v46, %v6408_v24  ;;  %v3853_v30 = vmul.f32 %v6180_v59, %v7142_v13  ;;  %v3855_v1 = vmul.f32 %v6209_v20, %v7143_v28  ;;  %v7145_v24 = vld [vmem:[#allocation31_spill] sm:$0xff] }
 0x252   :  { %v3553_v23 = vrot.slane %v3539_v45, %v7133_v11  ;;  %v3684_v9 = vadd.f32 %v3683_v63, %v3682_v8  ;;  %v3693_v0 = vrot.slane %v3692_v39, 4  ;;  %v3713_v10 = vrot.slane %v3712_v35, 4 }
 0x253   :  { %v3704_v4 = vadd.f32 %v3703_v36, %v3702_v18  ;;  %v3933_v34 = vadd.f32 %v3853_v30, %v3842_v47  ;;  %v3953_v32 = vadd.f32 %v3855_v1, %v3844_v52  ;;  %v3854_v58 = vmul.f32 %v6214_v19, %v7144_v15 }
 0x254   :  { %v3554_v2 = vcombine.low %v7145_v24, %v3553_v23  ;;  %v3685_v6 = vrot.slane %v3684_v9, 2  ;;  %v3694_v59 = vadd.f32 %v3693_v0, %v3692_v39  ;;  %v3714_v62 = vadd.f32 %v3713_v10, %v3712_v35  ;;  %v7147_v24 = vld [vmem:[#allocation33_spill] sm:$0xff] }
 0x255   :  { %v3705_v3 = vrot.slane %v3704_v4, 2  ;;  %v3943_v20 = vadd.f32 %v3854_v58, %v3843_v55  ;;  %v3856_v49 = vmul.f32 %v6227_v38, %v6434_v60  ;;  %v3864_v17 = vmul.f32 %v6232_v31, %v7146_v54  ;;  %v2182_v60 = vpop.f32.mrf.mxu1 }
 0x256   :  { %4115 = vst [vmem:[%s6923_s3 + $0x1] ss:$4 sm:$0xff] %v3554_v2  ;;  %v3686_v19 = vadd.f32 %v3685_v6, %v3684_v9  ;;  %v3695_v16 = vrot.slane %v3694_v59, 2  ;;  %v3715_v26 = vrot.slane %v3714_v62, 2  ;;  %v3866_v8 = vmul.f32 %v6244_v29, %v6445_v5  ;;  %v6506_v38 = vpop.f32.mrf.mxu0 }
 0x257   :  { %v3706_v61 = vadd.f32 %v3705_v3, %v3704_v4  ;;  %v3963_v7 = vadd.f32 %v3856_v49, %v3845_v27  ;;  %v3934_v18 = vadd.f32 %v3933_v34, %v3864_v17  ;;  %v3865_v47 = vmul.f32 %v6258_v44, %v6436_v56  ;;  %v2184_v1 = vpop.f32.mrf.mxu1 }
 0x258   :  { %v3687_v31 = vrot.slane %v3686_v19, 1  ;;  %v3696_v52 = vadd.f32 %v3695_v16, %v3694_v59  ;;  %v3716_v55 = vadd.f32 %v3715_v26, %v3714_v62  ;;  %v3954_v45 = vadd.f32 %v3953_v32, %v3866_v8  ;;  %v6512_v5 = vpop.f32.mrf.mxu0 }
 0x259   :  { %v3707_v63 = vrot.slane %v3706_v61, 1  ;;  %v3944_v39 = vadd.f32 %v3943_v20, %v3865_v47  ;;  %v3867_v35 = vmul.f32 %v6270_v57, %v6465_v25  ;;  %v3875_v29 = vmul.f32 %v6278_v22, %v6447_v41 }
 0x25a   :  { %v3688_v36 = vadd.f32 %v3687_v31, %v3686_v19  ;;  %v3697_v46 = vrot.slane %v3696_v52, 1  ;;  %v3717_v44 = vrot.slane %v3716_v55, 1  ;;  %v3877_v56 = vmul.f32 %v6292_v12, %v2178_v42  ;;  %v6517_v23 = vpop.f32.mrf.mxu0 }
 0x25b   :  { %v3708_v27 = vadd.f32 %v3707_v63, %v3706_v61  ;;  %v3964_v13 = vadd.f32 %v3963_v7, %v3867_v35  ;;  %v3935_v30 = vadd.f32 %v3934_v18, %v3875_v29  ;;  %v3876_v28 = vmul.f32 %v6306_v53, %v6467_v50  ;;  %v7151_v35 = vld [vmem:[#allocation34_spill] sm:$0xff] }
 0x25c   :  { %v3698_v57 = vadd.f32 %v3697_v46, %v3696_v52  ;;  %v3718_v25 = vadd.f32 %v3717_v44, %v3716_v55  ;;  %v3955_v9 = vadd.f32 %v3954_v45, %v3877_v56  ;;  %v3878_v22 = vmul.f32 %v6315_v43, %v2180_v40  ;;  %v6523_v42 = vpop.f32.mrf.mxu0  ;;  %v7150_v45 = vld [vmem:[#allocation15_spill] sm:$0xff]  ;;  %v7152_v46 = vld [vmem:[#allocation5_spill] sm:$0xff] }
 0x25d   :  { %v3945_v41 = vadd.f32 %v3944_v39, %v3876_v28  ;;  %v3886_v0 = vmul.f32 %v6322_v33, %v2049_v51  ;;  %v3888_v10 = vmul.f32 %v6336_v48, %v2182_v60  ;;  %v3887_v12 = vmul.f32 %v6346_v37, %v2051_v21  ;;  %v7148_v51 = vld [vmem:[#allocation36_spill] sm:$0xff] }
 0x25e   :  { %v3762_v4 = vcombine.low %v3688_v36, %v3698_v57  ;;  %v3763_v34 = vcombine.low %v3708_v27, %v3718_v25  ;;  %v3965_v53 = vadd.f32 %v3964_v13, %v3878_v22  ;;  %v3889_v50 = vmul.f32 %v6360_v14, %v2184_v1  ;;  %v6529_v43 = vpop.f32.mrf.mxu0  ;;  %v7149_v14 = vld [vmem:[#allocation13_spill] sm:$0xff] }
 0x25f   :  { %v3936_v32 = vadd.f32 %v3935_v30, %v3886_v0  ;;  %v3956_v15 = vadd.f32 %v3955_v9, %v3888_v10  ;;  %v3946_v58 = vadd.f32 %v3945_v41, %v3887_v12  ;;  %v6527_v2 = vsub.f32 1.0, %v7147_v24 }
 0x260   :  { %v3784_v33 = vrot.slane %v3762_v4, %v7133_v11  ;;  %v3791_v48 = vrot.slane %v3763_v34, %v7133_v11  ;;  %v3966_v37 = vadd.f32 %v3965_v53, %v3889_v50  ;;  %v6534_v40 = vcvt.f32.s32 %v7148_v51  ;;  %v6538_v3 = vpop.f32.mrf.mxu0 }
 0x261   :  { %v3937_v21 = vrot.slane %v3936_v32, 4  ;;  %v3957_v6 = vrot.slane %v3956_v15, 4  ;;  %v3947_v59 = vrot.slane %v3946_v58, 4  ;;  %v2687_v62 = vrot.slane %v6527_v2, %v7149_v14 }
 0x262   :  { %v3793_v20 = vcombine.low %v3784_v33, %v3791_v48  ;;  %v3967_v49 = vrot.slane %v3966_v37, 4  ;;  %v2486_v54 = vrot.slane %v6534_v40, %v7149_v14  ;;  %v2899_v17 = vrot.slane %v7147_v24, %v7149_v14  ;;  %v6547_v61 = vpop.f32.mrf.mxu0 }
 0x263   :  { %v3938_v19 = vadd.f32 %v3937_v21, %v3936_v32  ;;  %v3958_v16 = vadd.f32 %v3957_v6, %v3956_v15  ;;  %v3948_v26 = vadd.f32 %v3947_v59, %v3946_v58  ;;  %v6545_v8 = vrot.slane %v2687_v62, %v7149_v14  ;;  %v7153_v59 = vld [vmem:[#allocation35_spill] sm:$0xff] }
 0x264   :  { %v3807_v7 = vrot.slane %v3793_v20, %v7133_v11  ;;  %v3968_v18 = vadd.f32 %v3967_v49, %v3966_v37  ;;  %v6551_v47 = vrot.slane %v2486_v54, %v7149_v14  ;;  %v6554_v60 = vrot.slane %v2899_v17, %v7149_v14  ;;  %v6558_v39 = vpop.f32.mrf.mxu0  ;;  %v7154_v62 = vld [vmem:[#allocation19_spill] sm:$0xff] }
 0x265   :  { %v3939_v31 = vrot.slane %v3938_v19, 2  ;;  %v3959_v52 = vrot.slane %v3958_v16, 2  ;;  %v3949_v55 = vrot.slane %v3948_v26, 2  ;;  %v2490_v63 = vrot.slane %v6534_v40, %v7150_v45 }
 0x266   :  { %v3808_v29 = vcombine.low %v7151_v35, %v3807_v7  ;;  %v3969_v36 = vrot.slane %v3968_v18, 2  ;;  %v2547_v44 = vsub.s32 %v7152_v46, %v6551_v47  ;;  %v2691_v56 = vrot.slane %v6527_v2, %v7150_v45 }
 0x267   :  { %v3940_v27 = vadd.f32 %v3939_v31, %v3938_v19  ;;  %v3960_v13 = vadd.f32 %v3959_v52, %v3958_v16  ;;  %v3950_v30 = vadd.f32 %v3949_v55, %v3948_v26  ;;  %v6566_v28 = vrot.slane %v2490_v63, %v7149_v14  ;;  %v6568_v1 = vpop.f32.mrf.mxu1  ;;  %v7156_v19 = vld [vmem:[#allocation9_spill] sm:$0xff]  ;;  %v7157_v55 = vld [vmem:[#allocation7_spill] sm:$0xff] }
 0x268   :  { %v6570_v57 = vpop.f32.mrf.mxu0  ;;  %4117 = vst [vmem:[%s6923_s3 + $0x2] ss:$4 sm:$0xff] %v3808_v29  ;;  %v3970_v25 = vadd.f32 %v3969_v36, %v3968_v18  ;;  %vm2602_vm0 = vcmp.eq.s32.totalorder %v2547_v44, 0  ;;  %vm2814_vm1 = vcmp.eq.s32.totalorder %v2547_v44, 1  ;;  %v6576_v9 = vrot.slane %v2691_v56, %v7149_v14 }
 0x269   :  { %v3941_v22 = vrot.slane %v3940_v27, 1  ;;  %v3961_v41 = vrot.slane %v3960_v13, 1  ;;  %v3951_v0 = vrot.slane %v3950_v30, 1  ;;  %v2759_v10 = vsel %vm2602_vm0, %v6545_v8, 0.0  ;;  %v6579_v12 = vpop.f32.mrf.mxu1 }
 0x26a   :  { %v6581_v4 = vpop.f32.mrf.mxu0  ;;  %v3971_v34 = vrot.slane %v3970_v25, 1  ;;  %v2971_v53 = vsel %vm2814_vm1, %v6554_v60, 0.0  ;;  %v2548_v50 = vsub.s32 %v7152_v46, %v6566_v28  ;;  %v2903_v32 = vrot.slane %v7147_v24, %v7150_v45 }
 0x26b   :  { %v3942_v15 = vadd.f32 %v3941_v22, %v3940_v27  ;;  %v3962_v58 = vadd.f32 %v3961_v41, %v3960_v13  ;;  %v3952_v33 = vadd.f32 %v3951_v0, %v3950_v30  ;;  %v6588_v48 = vadd.f32 %v2971_v53, %v2759_v10  ;;  %v6590_v37 = vpop.f32.mrf.mxu1 }
 0x26c   :  { %v6592_v51 = vpop.f32.mrf.mxu0  ;;  %v3972_v21 = vadd.f32 %v3971_v34, %v3970_v25  ;;  %vm2603_vm2 = vcmp.eq.s32.totalorder %v2548_v50, 0  ;;  %vm2815_vm3 = vcmp.eq.s32.totalorder %v2548_v50, 1  ;;  %v6595_v6 = vrot.slane %v2903_v32, %v7149_v14 }
 0x26d   :  { %v7155_v20 = vcombine.low %v7153_v59, %v7154_v62  ;;  %v4016_v54 = vcombine.low %v3942_v15, %v3952_v33  ;;  %v2760_v17 = vsel %vm2603_vm2, %v6576_v9, 0.0  ;;  %v2558_v16 = vsub.s32 %v7156_v19, %v6551_v47  ;;  %v6604_v26 = vpop.f32.mrf.mxu1 }
 0x26e   :  { %v6606_v7 = vpop.f32.mrf.mxu0  ;;  %v4017_v18 = vcombine.low %v3962_v58, %v3972_v21  ;;  %v2972_v31 = vsel %vm2815_vm3, %v6595_v6, 0.0  ;;  %v2559_v52 = vsub.s32 %v7156_v19, %v6566_v28  ;;  %v2569_v45 = vsub.s32 %v7157_v55, %v6551_v47  ;;  %v7158_v21 = vld [vmem:[#allocation14_spill] sm:$0xff] }
 0x26f   :  { %v4054_v49 = vrot.slane %v7155_v20, %v7133_v11  ;;  %v4038_v63 = vrot.slane %v4016_v54, %v7133_v11  ;;  %v3081_v35 = vmul.f32 %v6588_v48, %v6506_v38  ;;  %vm2613_vm4 = vcmp.eq.s32.totalorder %v2558_v16, 0  ;;  %v6616_v29 = vpop.f32.mrf.mxu1 }
 0x270   :  { %vm2825_vm5 = vcmp.eq.s32.totalorder %v2558_v16, 1  ;;  %v6618_v36 = vpop.f32.mrf.mxu0  ;;  %v4045_v44 = vrot.slane %v4017_v18, %v7133_v11  ;;  %v2770_v56 = vsel %vm2613_vm4, %v6545_v8, 0.0  ;;  %vm2614_vm6 = vcmp.eq.s32.totalorder %v2559_v52, 0 }
 0x271   :  { %v2982_v27 = vsel %vm2825_vm5, %v6554_v60, 0.0  ;;  %v6623_v13 = vadd.f32 %v2972_v31, %v2760_v17  ;;  %v2771_v25 = vsel %vm2614_vm6, %v6576_v9, 0.0  ;;  %vm2826_vm7 = vcmp.eq.s32.totalorder %v2559_v52, 1  ;;  %v6628_v38 = vpop.f32.mrf.mxu1 }
 0x272   :  { %v6625_v30 = vadd.f32 %v2982_v27, %v2770_v56  ;;  %v6630_v22 = vpop.f32.mrf.mxu0  ;;  %v4047_v41 = vcombine.low %v4038_v63, %v4045_v44  ;;  %v2983_v0 = vsel %vm2826_vm7, %v6595_v6, 0.0  ;;  %vm2624_vm8 = vcmp.eq.s32.totalorder %v2569_v45, 0 }
 0x273   :  { %vm2836_vm9 = vcmp.eq.s32.totalorder %v2569_v45, 1  ;;  %v6635_v34 = vadd.f32 %v2983_v0, %v2771_v25  ;;  %v2781_v53 = vsel %vm2624_vm8, %v6545_v8, 0.0  ;;  %v6641_v15 = vpop.f32.mrf.mxu1  ;;  %v2494_v59 = vrot.slane %v6534_v40, %v7158_v21  ;;  %v7159_v25 = vld [vmem:[#allocation8_spill] sm:$0xff] }
 0x274   :  { %v3092_v10 = vmul.f32 %v6625_v30, %v6517_v23  ;;  %v2993_v50 = vsel %vm2836_vm9, %v6554_v60, 0.0  ;;  %v6639_v32 = vpop.f32.mrf.mxu0  ;;  %v4061_v58 = vrot.slane %v4047_v41, %v7133_v11  ;;  %v2695_v23 = vrot.slane %v6527_v2, %v7158_v21 }
 0x275   :  { %v6644_v33 = vadd.f32 %v2993_v50, %v2781_v53  ;;  %v3082_v62 = vmul.f32 %v6623_v13, %v6512_v5  ;;  %v3093_v20 = vmul.f32 %v6635_v34, %v6523_v42  ;;  %v2907_v54 = vrot.slane %v7147_v24, %v7158_v21  ;;  %v6660_v18 = vpop.f32.mrf.mxu1 }
 0x276   :  { %v2570_v17 = vsub.s32 %v7157_v55, %v6566_v28  ;;  %v6658_v16 = vpop.f32.mrf.mxu0  ;;  %v4062_v40 = vcombine.low %v4054_v49, %v4061_v58  ;;  %v3208_v31 = vadd.f32 %v3092_v10, %v3081_v35  ;;  %v6665_v5 = vrot.slane %v2494_v59, %v7149_v14 }
 0x277   :  { %v3103_v2 = vmul.f32 %v6644_v33, %v6529_v43  ;;  %v3218_v52 = vadd.f32 %v3093_v20, %v3082_v62  ;;  %v6668_v42 = vrot.slane %v2695_v23, %v7149_v14  ;;  %v6678_v43 = vrot.slane %v2907_v54, %v7149_v14  ;;  %v6682_v35 = vpop.f32.mrf.mxu1 }
 0x278   :  { %vm2625_vm10 = vcmp.eq.s32.totalorder %v2570_v17, 0  ;;  %vm2837_vm11 = vcmp.eq.s32.totalorder %v2570_v17, 1  ;;  %v6670_v24 = vpop.f32.mrf.mxu0  ;;  %4119 = vst [vmem:[%s6923_s3 + $0x3] ss:$4 sm:$0xff] %v4062_v40  ;;  %v2571_v49 = vsub.s32 %v7157_v55, %v6665_v5  ;;  %v2549_v27 = vsub.s32 %v7152_v46, %v6665_v5 }
 0x279   :  { %v2782_v45 = vsel %vm2625_vm10, %v6576_v9, 0.0  ;;  %v2994_v63 = vsel %vm2837_vm11, %v6595_v6, 0.0  ;;  %v3209_v44 = vadd.f32 %v3208_v31, %v3103_v2  ;;  %v2580_v41 = vsub.s32 %v7159_v25, %v6551_v47  ;;  %v6705_v59 = vpop.f32.mrf.mxu1 }
 0x27a   :  { %v6684_v56 = vadd.f32 %v2994_v63, %v2782_v45  ;;  %v6690_v0 = vpop.f32.mrf.mxu0  ;;  %vm2626_vm12 = vcmp.eq.s32.totalorder %v2571_v49, 0  ;;  %vm2838_vm13 = vcmp.eq.s32.totalorder %v2571_v49, 1  ;;  %v2582_v14 = vsub.s32 %v7159_v25, %v6665_v5 }
 0x27b   :  { %v2581_v55 = vsub.s32 %v7159_v25, %v6566_v28  ;;  %v2783_v10 = vsel %vm2626_vm12, %v6668_v42, 0.0  ;;  %v2995_v53 = vsel %vm2838_vm13, %v6678_v43, 0.0  ;;  %vm2604_vm14 = vcmp.eq.s32.totalorder %v2549_v27, 0  ;;  %v6725_v63 = vpop.f32.mrf.mxu1 }
 0x27c   :  { %v3104_v46 = vmul.f32 %v6684_v56, %v6538_v3  ;;  %v6700_v50 = vpop.f32.mrf.mxu0  ;;  %v6702_v58 = vadd.f32 %v2995_v53, %v2783_v10  ;;  %v2761_v21 = vsel %vm2604_vm14, %v6668_v42, 0.0  ;;  %vm2816_vm15 = vcmp.eq.s32.totalorder %v2549_v27, 1  ;;  %v7160_v53 = vld [vmem:[#allocation6_spill] sm:$0xff] }
 0x27d   :  { %vm2635_vm0 = vcmp.eq.s32.totalorder %v2580_v41, 0  ;;  %v2973_v23 = vsel %vm2816_vm15, %v6678_v43, 0.0  ;;  %vm2847_vm1 = vcmp.eq.s32.totalorder %v2580_v41, 1  ;;  %v2560_v20 = vsub.s32 %v7156_v19, %v6665_v5 }
 0x27e   :  { %v2792_v62 = vsel %vm2635_vm0, %v6545_v8, 0.0  ;;  %v6711_v3 = vpop.f32.mrf.mxu0  ;;  %v3219_v54 = vadd.f32 %v3218_v52, %v3104_v46  ;;  %v6713_v17 = vadd.f32 %v2973_v23, %v2761_v21  ;;  %v3004_v40 = vsel %vm2847_vm1, %v6554_v60, 0.0 }
 0x27f   :  { %vm2637_vm2 = vcmp.eq.s32.totalorder %v2582_v14, 0  ;;  %v6716_v31 = vadd.f32 %v3004_v40, %v2792_v62  ;;  %vm2849_vm3 = vcmp.eq.s32.totalorder %v2582_v14, 1  ;;  %vm2636_vm4 = vcmp.eq.s32.totalorder %v2581_v55, 0 }
 0x280   :  { %v2794_v2 = vsel %vm2637_vm2, %v6668_v42, 0.0  ;;  %v6719_v49 = vpop.f32.mrf.mxu0  ;;  %v3105_v45 = vmul.f32 %v6568_v1, %v6702_v58  ;;  %v3006_v19 = vsel %vm2849_vm3, %v6678_v43, 0.0  ;;  %v2793_v52 = vsel %vm2636_vm4, %v6576_v9, 0.0 }
 0x281   :  { %vm2848_vm5 = vcmp.eq.s32.totalorder %v2581_v55, 1  ;;  %v3114_v27 = vmul.f32 %v6716_v31, %v6547_v61  ;;  %v6729_v25 = vadd.f32 %v3006_v19, %v2794_v2  ;;  %vm2615_vm6 = vcmp.eq.s32.totalorder %v2560_v20, 0 }
 0x282   :  { %v3005_v41 = vsel %vm2848_vm5, %v6595_v6, 0.0  ;;  %v6732_v14 = vpop.f32.mrf.mxu0  ;;  %v2772_v1 = vsel %vm2615_vm6, %v6668_v42, 0.0  ;;  %vm2827_vm7 = vcmp.eq.s32.totalorder %v2560_v20, 1  ;;  %v2591_v55 = vsub.s32 %v7160_v53, %v6551_v47  ;;  %v6750_v20 = vpop.f32.mrf.mxu1 }
 0x283   :  { %v6734_v10 = vadd.f32 %v3005_v41, %v2793_v52  ;;  %v3083_v46 = vmul.f32 %v6713_v17, %v6579_v12  ;;  %v3210_v21 = vadd.f32 %v3209_v44, %v3114_v27  ;;  %v2984_v61 = vsel %vm2827_vm7, %v6678_v43, 0.0 }
 0x284   :  { %v2592_v23 = vsub.s32 %v7160_v53, %v6566_v28  ;;  %v6744_v62 = vpop.f32.mrf.mxu0  ;;  %v6748_v2 = vadd.f32 %v2984_v61, %v2772_v1  ;;  %vm2646_vm8 = vcmp.eq.s32.totalorder %v2591_v55, 0  ;;  %vm2858_vm9 = vcmp.eq.s32.totalorder %v2591_v55, 1  ;;  %v6763_v27 = vpop.f32.mrf.mxu1 }
 0x285   :  { %v3115_v40 = vmul.f32 %v6734_v10, %v6558_v39  ;;  %v2803_v47 = vsel %vm2646_vm8, %v6545_v8, 0.0  ;;  %v3015_v12 = vsel %vm2858_vm9, %v6554_v60, 0.0  ;;  %v3116_v28 = vmul.f32 %v6590_v37, %v6729_v25 }
 0x286   :  { %vm2647_vm10 = vcmp.eq.s32.totalorder %v2592_v23, 0  ;;  %vm2859_vm11 = vcmp.eq.s32.totalorder %v2592_v23, 1  ;;  %v6754_v44 = vpop.f32.mrf.mxu0  ;;  %v3094_v39 = vmul.f32 %v6748_v2, %v6604_v26  ;;  %v6760_v19 = vadd.f32 %v3015_v12, %v2803_v47  ;;  %v6787_v23 = vpop.f32.mrf.mxu1 }
 0x287   :  { %v2804_v52 = vsel %vm2647_vm10, %v6576_v9, 0.0  ;;  %v3220_v41 = vadd.f32 %v3219_v54, %v3115_v40  ;;  %v3016_v8 = vsel %vm2859_vm11, %v6595_v6, 0.0  ;;  %v3351_v60 = vmul.f32 %v6616_v29, %v6748_v2 }
 0x288   :  { %v2593_v1 = vsub.s32 %v7160_v53, %v6665_v5  ;;  %v6770_v55 = vpop.f32.mrf.mxu0  ;;  %v3228_v37 = vadd.f32 %v3094_v39, %v3083_v46  ;;  %v3125_v26 = vmul.f32 %v6760_v19, %v6570_v57  ;;  %v6774_v61 = vadd.f32 %v3016_v8, %v2804_v52 }
 0x289   :  { %v3338_v9 = vmul.f32 %v6588_v48, %v6592_v51  ;;  %v3339_v6 = vmul.f32 %v6623_v13, %v6606_v7  ;;  %v3349_v29 = vmul.f32 %v6625_v30, %v6618_v36  ;;  %v3350_v7 = vmul.f32 %v6635_v34, %v6630_v22 }
 0x28a   :  { %vm2648_vm12 = vcmp.eq.s32.totalorder %v2593_v1, 0  ;;  %vm2860_vm13 = vcmp.eq.s32.totalorder %v2593_v1, 1  ;;  %v6782_v5 = vpop.f32.mrf.mxu0  ;;  %v3229_v54 = vadd.f32 %v3228_v37, %v3105_v45  ;;  %v3211_v53 = vadd.f32 %v3210_v21, %v3125_v26  ;;  %v6808_v37 = vpop.f32.mrf.mxu1 }
 0x28b   :  { %v3126_v57 = vmul.f32 %v6774_v61, %v6581_v4  ;;  %v2805_v46 = vsel %vm2648_vm12, %v6668_v42, 0.0  ;;  %v3017_v51 = vsel %vm2860_vm13, %v6678_v43, 0.0  ;;  %v3465_v40 = vadd.f32 %v3349_v29, %v3338_v9 }
 0x28c   :  { %v3360_v36 = vmul.f32 %v6644_v33, %v6639_v32  ;;  %v6794_v47 = vpop.f32.mrf.mxu0  ;;  %v3212_v45 = vrot.slane %v3211_v53, 4  ;;  %v6796_v12 = vadd.f32 %v3017_v51, %v2805_v46  ;;  %v3230_v4 = vadd.f32 %v3229_v54, %v3116_v28 }
 0x28d   :  { %v3221_v21 = vadd.f32 %v3220_v41, %v3126_v57  ;;  %v3475_v39 = vadd.f32 %v3350_v7, %v3339_v6  ;;  %v3361_v52 = vmul.f32 %v6684_v56, %v6658_v16  ;;  %v3362_v43 = vmul.f32 %v6641_v15, %v6702_v58  ;;  %v2405_v7 = vpop.f32.mrf.mxu1 }
 0x28e   :  { %v3466_v42 = vadd.f32 %v3465_v40, %v3360_v36  ;;  %v6802_v8 = vpop.f32.mrf.mxu0  ;;  %v3213_v22 = vadd.f32 %v3212_v45, %v3211_v53  ;;  %v3127_v32 = vmul.f32 %v6796_v12, %v6628_v38  ;;  %v3371_v41 = vmul.f32 %v6716_v31, %v6670_v24 }
 0x28f   :  { %v3222_v1 = vrot.slane %v3221_v21, 4  ;;  %v3476_v28 = vadd.f32 %v3475_v39, %v3361_v52  ;;  %v3340_v26 = vmul.f32 %v6713_v17, %v6660_v18  ;;  %v3372_v16 = vmul.f32 %v6734_v10, %v6690_v0 }
 0x290   :  { %v3594_v15 = vmul.f32 %v6682_v35, %v6713_v17  ;;  %v6816_v9 = vpop.f32.mrf.mxu0  ;;  %v3214_v6 = vrot.slane %v3213_v22, 2  ;;  %v3231_v38 = vadd.f32 %v3230_v4, %v3127_v32  ;;  %v3467_v54 = vadd.f32 %v3466_v42, %v3371_v41 }
 0x291   :  { %v3223_v29 = vadd.f32 %v3222_v1, %v3221_v21  ;;  %v3485_v53 = vadd.f32 %v3351_v60, %v3340_v26  ;;  %v3477_v24 = vadd.f32 %v3476_v28, %v3372_v16  ;;  %v3382_v57 = vmul.f32 %v6760_v19, %v6700_v50  ;;  %v4173_v26 = vpop.f32.mrf.mxu1 }
 0x292   :  { %v3373_v18 = vmul.f32 %v6729_v25, %v6705_v59  ;;  %v6822_v46 = vpop.f32.mrf.mxu0  ;;  %v3215_v0 = vadd.f32 %v3214_v6, %v3213_v22  ;;  %v3232_v40 = vrot.slane %v3231_v38, 4  ;;  %v3383_v35 = vmul.f32 %v6774_v61, %v6711_v3 }
 0x293   :  { %v3224_v51 = vrot.slane %v3223_v29, 2  ;;  %v3468_v36 = vadd.f32 %v3467_v54, %v3382_v57  ;;  %v3486_v45 = vadd.f32 %v3485_v53, %v3362_v43  ;;  %v3605_v60 = vmul.f32 %v6725_v63, %v6748_v2 }
 0x294   :  { %v3592_v50 = vmul.f32 %v6588_v48, %v6719_v49  ;;  %v6830_v21 = vpop.f32.mrf.mxu0  ;;  %v3216_v59 = vrot.slane %v3215_v0, 1  ;;  %v3233_v39 = vadd.f32 %v3232_v40, %v3231_v38  ;;  %v3478_v42 = vadd.f32 %v3477_v24, %v3383_v35 }
 0x295   :  { %v3225_v4 = vadd.f32 %v3224_v51, %v3223_v29  ;;  %v3469_v52 = vrot.slane %v3468_v36, 4  ;;  %v3487_v22 = vadd.f32 %v3486_v45, %v3373_v18  ;;  %v3739_v1 = vadd.f32 %v3605_v60, %v3594_v15 }
 0x296   :  { %v3384_v3 = vmul.f32 %v6796_v12, %v6750_v20  ;;  %v6834_v32 = vpop.f32.mrf.mxu0  ;;  %v3217_v43 = vadd.f32 %v3216_v59, %v3215_v0  ;;  %v3234_v63 = vrot.slane %v3233_v39, 2  ;;  %v3479_v28 = vrot.slane %v3478_v42, 4 }
 0x297   :  { %v3226_v41 = vrot.slane %v3225_v4, 1  ;;  %v3470_v49 = vadd.f32 %v3469_v52, %v3468_v36  ;;  %v3593_v6 = vmul.f32 %v6623_v13, %v6732_v14  ;;  %v3603_v29 = vmul.f32 %v6625_v30, %v6744_v62 }
 0x298   :  { %v3488_v16 = vadd.f32 %v3487_v22, %v3384_v3  ;;  %v6840_v38 = vpop.f32.mrf.mxu0  ;;  %v3235_v54 = vadd.f32 %v3234_v63, %v3233_v39  ;;  %v3480_v20 = vadd.f32 %v3479_v28, %v3478_v42  ;;  %v3638_v53 = vmul.f32 %v6763_v27, %v6796_v12  ;;  %v2418_v27 = vpop.f32.mrf.mxu1 }
 0x299   :  { %v3227_v15 = vadd.f32 %v3226_v41, %v3225_v4  ;;  %v7161_v24 = vlaneseq  ;;  %v3471_v18 = vrot.slane %v3470_v49, 2  ;;  %v3719_v51 = vadd.f32 %v3603_v29, %v3592_v50 }
 0x29a   :  { %v3489_v0 = vrot.slane %v3488_v16, 4  ;;  %v3604_v14 = vmul.f32 %v6635_v34, %v6754_v44  ;;  %v6851_v62 = vpop.f32.mrf.mxu0  ;;  %v3236_v35 = vrot.slane %v3235_v54, 1  ;;  %v3481_v36 = vrot.slane %v3480_v20, 2 }
 0x29b   :  { %vm6845_vm14 = vcmp.lt.s32.totalorder %v7161_v24, 384  ;;  %v3298_v40 = vcombine.low %v3217_v43, %v3227_v15  ;;  %v3616_v45 = vmul.f32 %v6702_v58, %v6787_v23  ;;  %v3472_v60 = vadd.f32 %v3471_v18, %v3470_v49 }
 0x29c   :  { %v3490_v59 = vadd.f32 %v3489_v0, %v3488_v16  ;;  %v3729_v4 = vadd.f32 %v3604_v14, %v3593_v6  ;;  %v3614_v39 = vmul.f32 %v6644_v33, %v6770_v55  ;;  %v2305_v42 = vpop.f32.mrf.mxu0  ;;  %v3237_v52 = vadd.f32 %v3236_v35, %v3235_v54  ;;  %v4174_v6 = vpop.f32.mrf.mxu1 }
 0x29d   :  { %v3305_v50 = vrot.slane %v3298_v40, %v7133_v11  ;;  %v3482_v44 = vadd.f32 %v3481_v36, %v3480_v20  ;;  %v3740_v22 = vadd.f32 %v3739_v1, %v3616_v45  ;;  %v3473_v3 = vrot.slane %v3472_v60, 1 }
 0x29e   :  { %v3491_v43 = vrot.slane %v3490_v59, 2  ;;  %v3720_v41 = vadd.f32 %v3719_v51, %v3614_v39  ;;  %v3848_v63 = vmul.f32 %v6808_v37, %v6713_v17  ;;  %v2307_v23 = vpop.f32.mrf.mxu0  ;;  %v3312_v28 = vrot.slane %v3237_v52, %v7133_v11 }
 0x29f   :  { %v3483_v49 = vrot.slane %v3482_v44, 1  ;;  %v3615_v16 = vmul.f32 %v6684_v56, %v6782_v5  ;;  %v3627_v55 = vmul.f32 %v6729_v25, %v2405_v7  ;;  %v3474_v29 = vadd.f32 %v3473_v3, %v3472_v60 }
 0x2a0   :  { %v3492_v15 = vadd.f32 %v3491_v43, %v3490_v59  ;;  %v3625_v1 = vmul.f32 %v6716_v31, %v6794_v47  ;;  %v3881_v54 = vmul.f32 %v4173_v26, %v6729_v25  ;;  %v2311_v20 = vpop.f32.mrf.mxu0  ;;  %v3313_v24 = vcombine.low %v3305_v50, %v3312_v28  ;;  %v2421_v25 = vpop.f32.mrf.mxu1 }
 0x2a1   :  { %v3484_v17 = vadd.f32 %v3483_v49, %v3482_v44  ;;  %v3730_v37 = vadd.f32 %v3729_v4, %v3615_v16  ;;  %v3741_v18 = vadd.f32 %v3740_v22, %v3627_v55  ;;  %v3626_v5 = vmul.f32 %v6734_v10, %v6802_v8 }
 0x2a2   :  { %v3493_v0 = vrot.slane %v3492_v15, 1  ;;  %v3721_v51 = vadd.f32 %v3720_v41, %v3625_v1  ;;  %v3859_v7 = vmul.f32 %v6748_v2, %v2418_v27  ;;  %v3320_v14 = vrot.slane %v3313_v24, %v7133_v11  ;;  %v2313_v26 = vpop.f32.mrf.mxu0 }
 0x2a3   :  { %v3555_v40 = vcombine.low %v3474_v29, %v3484_v17  ;;  %v3742_v35 = vadd.f32 %v3741_v18, %v3638_v53  ;;  %v3636_v47 = vmul.f32 %v6760_v19, %v6816_v9  ;;  %v3731_v45 = vadd.f32 %v3730_v37, %v3626_v5 }
 0x2a4   :  { %v3494_v36 = vadd.f32 %v3493_v0, %v3492_v15  ;;  %v3993_v60 = vadd.f32 %v3859_v7, %v3848_v63  ;;  %v3892_v59 = vmul.f32 %v4174_v6, %v6796_v12  ;;  %4114 = vst.msk [vmem:[%s6923_s3 + $0x20] ss:$4 sm:$0x7] %vm6845_vm14, %v3320_v14  ;;  %v3637_v9 = vmul.f32 %v6774_v61, %v6822_v46  ;;  %v2315_v3 = vpop.f32.mrf.mxu0 }
 0x2a5   :  { %v3562_v2 = vrot.slane %v3555_v40, %v7133_v11  ;;  %v3743_v8 = vrot.slane %v3742_v35, 4  ;;  %v3722_v53 = vadd.f32 %v3721_v51, %v3636_v47  ;;  %v3870_v4 = vmul.f32 %v6702_v58, %v2421_v25 }
 0x2a6   :  { %v3569_v27 = vrot.slane %v3494_v36, %v7133_v11  ;;  %v3846_v12 = vmul.f32 %v6588_v48, %v6830_v21  ;;  %v3847_v39 = vmul.f32 %v6623_v13, %v6834_v32  ;;  %v3732_v44 = vadd.f32 %v3731_v45, %v3637_v9  ;;  %v2317_v29 = vpop.f32.mrf.mxu0 }
 0x2a7   :  { %v3744_v50 = vadd.f32 %v3743_v8, %v3742_v35  ;;  %v3723_v52 = vrot.slane %v3722_v53, 4  ;;  %v3857_v22 = vmul.f32 %v6625_v30, %v6840_v38  ;;  %v3994_v41 = vadd.f32 %v3993_v60, %v3870_v4 }
 0x2a8   :  { %v3570_v43 = vcombine.low %v3562_v2, %v3569_v27  ;;  %v3858_v46 = vmul.f32 %v6635_v34, %v6851_v62  ;;  %v3868_v58 = vmul.f32 %v6644_v33, %v2305_v42  ;;  %v3733_v48 = vrot.slane %v3732_v44, 4 }
 0x2a9   :  { %v3745_v63 = vrot.slane %v3744_v50, 2  ;;  %v3724_v28 = vadd.f32 %v3723_v52, %v3722_v53  ;;  %v3973_v21 = vadd.f32 %v3857_v22, %v3846_v12  ;;  %v3995_v32 = vadd.f32 %v3994_v41, %v3881_v54 }
 0x2aa   :  { %v3577_v13 = vrot.slane %v3570_v43, %v7133_v11  ;;  %v3983_v49 = vadd.f32 %v3858_v46, %v3847_v39  ;;  %v3869_v16 = vmul.f32 %v6684_v56, %v2307_v23  ;;  %v3734_v38 = vadd.f32 %v3733_v48, %v3732_v44 }
 0x2ab   :  { %v3746_v55 = vadd.f32 %v3745_v63, %v3744_v50  ;;  %v3725_v30 = vrot.slane %v3724_v28, 2  ;;  %v3974_v6 = vadd.f32 %v3973_v21, %v3868_v58  ;;  %v3996_v34 = vadd.f32 %v3995_v32, %v3892_v59 }
 0x2ac   :  { %4116 = vst.msk [vmem:[%s6923_s3 + $0x21] ss:$4 sm:$0x7] %vm6845_vm14, %v3577_v13  ;;  %v3984_v33 = vadd.f32 %v3983_v49, %v3869_v16  ;;  %v3879_v62 = vmul.f32 %v6716_v31, %v2311_v20  ;;  %v3880_v42 = vmul.f32 %v6734_v10, %v2313_v26  ;;  %v3735_v1 = vrot.slane %v3734_v38, 2 }
 0x2ad   :  { %v3726_v15 = vadd.f32 %v3725_v30, %v3724_v28  ;;  %v3890_v56 = vmul.f32 %v6760_v19, %v2315_v3  ;;  %v3997_v23 = vrot.slane %v3996_v34, 4  ;;  %v3891_v17 = vmul.f32 %v6774_v61, %v2317_v29 }
 0x2ae   :  { %v3975_v54 = vadd.f32 %v3974_v6, %v3879_v62  ;;  %v3985_v24 = vadd.f32 %v3984_v33, %v3880_v42  ;;  %v3747_v37 = vrot.slane %v3746_v55, 1  ;;  %v3736_v0 = vadd.f32 %v3735_v1, %v3734_v38 }
 0x2af   :  { %v3727_v18 = vrot.slane %v3726_v15, 1  ;;  %v3998_v51 = vadd.f32 %v3997_v23, %v3996_v34 }
 0x2b0   :  { %v3976_v5 = vadd.f32 %v3975_v54, %v3890_v56  ;;  %v3986_v7 = vadd.f32 %v3985_v24, %v3891_v17  ;;  %v3737_v14 = vrot.slane %v3736_v0, 1  ;;  %v3748_v10 = vadd.f32 %v3747_v37, %v3746_v55 }
 0x2b1   :  { %v3999_v40 = vrot.slane %v3998_v51, 2  ;;  %v3728_v35 = vadd.f32 %v3727_v18, %v3726_v15 }
 0x2b2   :  { %v3977_v31 = vrot.slane %v3976_v5, 4  ;;  %v3987_v20 = vrot.slane %v3986_v7, 4  ;;  %v3738_v47 = vadd.f32 %v3737_v14, %v3736_v0  ;;  %v3823_v61 = vrot.slane %v3748_v10, %v7133_v11 }
 0x2b3   :  { %v4000_v25 = vadd.f32 %v3999_v40, %v3998_v51 }
 0x2b4   :  { %v3978_v19 = vadd.f32 %v3977_v31, %v3976_v5  ;;  %v3988_v26 = vadd.f32 %v3987_v20, %v3986_v7  ;;  %v3809_v36 = vcombine.low %v3728_v35, %v3738_v47 }
 0x2b5   :  { %v4001_v2 = vrot.slane %v4000_v25, 1 }
 0x2b6   :  { %v3979_v45 = vrot.slane %v3978_v19, 2  ;;  %v3989_v60 = vrot.slane %v3988_v26, 2  ;;  %v3816_v59 = vrot.slane %v3809_v36, %v7133_v11 }
 0x2b7   :  { %v4002_v39 = vadd.f32 %v4001_v2, %v4000_v25 }
 0x2b8   :  { %v3980_v8 = vadd.f32 %v3979_v45, %v3978_v19  ;;  %v3990_v53 = vadd.f32 %v3989_v60, %v3988_v26  ;;  %v3824_v9 = vcombine.low %v3816_v59, %v3823_v61 }
 0x2b9   :  { %v4077_v22 = vrot.slane %v4002_v39, %v7133_v11 }
 0x2ba   :  { %v3981_v27 = vrot.slane %v3980_v8, 1  ;;  %v3991_v4 = vrot.slane %v3990_v53, 1  ;;  %v3831_v12 = vrot.slane %v3824_v9, %v7133_v11 }
 0x2bc   :  { %v3982_v50 = vadd.f32 %v3981_v27, %v3980_v8  ;;  %v3992_v52 = vadd.f32 %v3991_v4, %v3990_v53  ;;  %4118 = vst.msk [vmem:[%s6923_s3 + $0x22] ss:$4 sm:$0x7] %vm6845_vm14, %v3831_v12 }
 0x2be   :  { %v4063_v44 = vcombine.low %v3982_v50, %v3992_v52 }
 0x2c0   :  { %v4070_v3 = vrot.slane %v4063_v44, %v7133_v11 }
 0x2c2   :  { %v4078_v43 = vcombine.low %v4070_v3, %v4077_v22 }
 0x2c4   :  { %v4085_v41 = vrot.slane %v4078_v43, %v7133_v11 }
 0x2c6   :  { %4120 = vst.msk [vmem:[%s6923_s3 + $0x23] ss:$4 sm:$0x7] %vm6845_vm14, %v4085_v41 }
 0x2c7   :  { %4096 = vsyncpa [#allocation3], 1 }

</bundles_post_ra>
